<compile_context>
chip_gen: v5e
topology: v5e:2x2
jax: 0.10.0
libtpu: 0.0.40
codegen_flags: <defaults>
</compile_context>

<pallas_src>
import jax
import jax.numpy as jnp
from jax.experimental import pallas as pl
from jax.experimental.pallas import tpu as pltpu

BN_EPS = 1e-5


# --------------------------------------------------------------------------
# tiling helper
# --------------------------------------------------------------------------
def _row_tile(H, W):
    """Largest divisor of H giving ~128 output pixels per row tile."""
    cap = max(1, 128 // W)
    th = H
    for t in range(min(H, cap), 0, -1):
        if H % t == 0:
            th = t
            break
    if (th * W) % 8 != 0 and th != H:
        th = H   # fall back: one tile == full image (block == full dim)
    return th


# --------------------------------------------------------------------------
# kernels
# --------------------------------------------------------------------------
def _make_conv_bn_stats_kernel(H, W, TH, cin, cout, pre_act):
    """conv3x3 (stride=1, pad=1) over one row tile + fused BN partial stats.

    If pre_act, applies the previous layer's BN+ReLU (affine a*x+b, relu)
    to the input image while building the padded VMEM copy.
    """
    Hp, Wp = H + 2, W + 2
    K = 9 * cin

    def kernel(*refs):
        if pre_act:
            x_ref, ab_ref, w_ref, y_ref, st_ref, pad_ref, cols_ref = refs
        else:
            x_ref, w_ref, y_ref, st_ref, pad_ref, cols_ref = refs
            ab_ref = None

        r = pl.program_id(1)

        # Build the zero-padded (optionally BN+ReLU'd) image once per batch
        # element; it persists in VMEM scratch across the row tiles of the
        # same image (row axis is innermost and marked "arbitrary").
        @pl.when(r == 0)
        def _build_padded():
            zrow = jnp.zeros((1, Wp, cin), jnp.float32)
            pad_ref[0:1, :, :] = zrow                       # zero only the halo
            pad_ref[Hp - 1:Hp, :, :] = zrow
            zcol = jnp.zeros((H, 1, cin), jnp.float32)
            pad_ref[1:H + 1, 0:1, :] = zcol
            pad_ref[1:H + 1, Wp - 1:Wp, :] = zcol

            xin = x_ref[...].astype(jnp.float32)            # (H*W, cin)
            if pre_act:
                a = ab_ref[0:1, :]                          # inv_std
                b = ab_ref[1:2, :]                          # -mean*inv_std
                xin = jnp.maximum(xin * a + b, 0.0)         # fused BN + ReLU
            pad_ref[1:H + 1, 1:W + 1, :] = xin.reshape(H, W, cin)

        # im2col for this row tile: 9 shifted windows -> one K = 9*cin matmul.
        row0 = pl.multiple_of(r * TH, TH)
        for k in range(9):                                  # static unroll
            ky, kx = k // 3, k % 3
            win = pad_ref[pl.ds(row0 + ky, TH), kx:kx + W, :]   # (TH, W, cin)
            cols_ref[:, :, k * cin:(k + 1) * cin] = win

        cols = cols_ref[...].reshape(TH * W, K).astype(jnp.bfloat16)
        acc = jnp.dot(cols, w_ref[...],                     # (TH*W, cout) f32
                      preferred_element_type=jnp.float32)

        # BN statistics fused into the conv epilogue (per-tile partial sums).
        st_ref[0:1, :] = jnp.sum(acc, axis=0, keepdims=True)
        st_ref[1:2, :] = jnp.sum(acc * acc, axis=0, keepdims=True)

        y_ref[...] = acc.astype(y_ref.dtype)

    return kernel


def _bn_relu_kernel(y_ref, ab_ref, o_ref):
    a = ab_ref[0:1, :]
    b = ab_ref[1:2, :]
    o_ref[...] = jnp.maximum(y_ref[...].astype(jnp.float32) * a + b, 0.0)


# --------------------------------------------------------------------------
# pallas_call wrappers
# --------------------------------------------------------------------------
def _conv_bn_stats(x_flat, ab, w_flat, *, N, H, W, TH, cin, cout, pre_act):
    R = H // TH
    kernel = _make_conv_bn_stats_kernel(H, W, TH, cin, cout, pre_act)

    in_specs = [pl.BlockSpec((None, H * W, cin), lambda n, r: (n, 0, 0))]
    operands = [x_flat]
    if pre_act:
        in_specs.append(pl.BlockSpec((2, cin), lambda n, r: (0, 0)))
        operands.append(ab)
    in_specs.append(pl.BlockSpec((9 * cin, cout), lambda n, r: (0, 0)))
    operands.append(w_flat)

    y, st = pl.pallas_call(
        kernel,
        grid=(N, R),
        in_specs=in_specs,
        out_specs=(
            pl.BlockSpec((None, TH * W, cout), lambda n, r: (n, r, 0)),
            pl.BlockSpec((None, None, 2, cout), lambda n, r: (n, r, 0, 0)),
        ),
        out_shape=(
            jax.ShapeDtypeStruct((N, H * W, cout), jnp.float32),   # pre-BN conv
            jax.ShapeDtypeStruct((N, R, 2, cout), jnp.float32),    # [sum, sumsq]
        ),
        scratch_shapes=[
            pltpu.VMEM((H + 2, W + 2, cin), jnp.float32),   # padded image
            pltpu.VMEM((TH, W, 9 * cin), jnp.float32),      # im2col buffer
        ],
        compiler_params=pltpu.CompilerParams(
            dimension_semantics=("parallel", "arbitrary"),
            vmem_limit_bytes=64 * 1024 * 1024,
        ),
    )(*operands)
    return y, st


def _bn_relu(y_flat, ab, *, N, H, W, TH, cout):
    R = H // TH
    return pl.pallas_call(
        _bn_relu_kernel,
        grid=(N, R),
        in_specs=[
            pl.BlockSpec((None, TH * W, cout), lambda n, r: (n, r, 0)),
            pl.BlockSpec((2, cout), lambda n, r: (0, 0)),
        ],
        out_specs=pl.BlockSpec((None, TH * W, cout), lambda n, r: (n, r, 0)),
        out_shape=jax.ShapeDtypeStruct((N, H * W, cout), jnp.float32),
        compiler_params=pltpu.CompilerParams(
            dimension_semantics=("parallel", "parallel"),
            vmem_limit_bytes=64 * 1024 * 1024,
        ),
    )(y_flat, ab)


def _bn_affine(stats, count):
    """Reduce per-tile [sum, sumsq] -> (inv_std, -mean*inv_std) per channel."""
    s = jnp.sum(stats[:, :, 0, :], axis=(0, 1))
    ss = jnp.sum(stats[:, :, 1, :], axis=(0, 1))
    mean = s / count
    var = jnp.maximum(ss / count - mean * mean, 0.0)   # biased var (PyTorch BN)
    inv = jax.lax.rsqrt(var + BN_EPS)
    return jnp.stack([inv, -mean * inv]).astype(jnp.float32)   # (2, C)


def double_conv(x_nchw, w1_hwio, b1, w2_hwio, b2):
    """DoubleConv forward. x: (N, Cin, H, W) NCHW; weights HWIO (3,3,ci,co).

    Conv biases are accepted but unused: a per-channel constant added before
    BatchNorm (gamma=1, beta=0) is cancelled exactly by the mean subtraction.
    """
    del b1, b2
    N, Cin, H, W = x_nchw.shape
    Cmid = w1_hwio.shape[-1]
    Cout = w2_hwio.shape[-1]
    TH = _row_tile(H, W)
    count = N * H * W

    # NCHW -> NHWC flattened to (N, H*W, C); bf16 feeds the MXU hot path.
    x_flat = jnp.transpose(x_nchw, (0, 2, 3, 1)).reshape(N, H * W, Cin)
    x_flat = x_flat.astype(jnp.bfloat16)
    w1 = w1_hwio.reshape(9 * Cin, Cmid).astype(jnp.bfloat16)
    w2 = w2_hwio.reshape(9 * Cmid, Cout).astype(jnp.bfloat16)

    # pass 1: conv1 + fused BN1 partial statistics
    y1, st1 = _conv_bn_stats(x_flat, None, w1, N=N, H=H, W=W, TH=TH,
                             cin=Cin, cout=Cmid, pre_act=False)
    ab1 = _bn_affine(st1, count)

    # pass 2: BN1+ReLU on the fly, conv2 + fused BN2 partial statistics
    y2, st2 = _conv_bn_stats(y1, ab1, w2, N=N, H=H, W=W, TH=TH,
                             cin=Cmid, cout=Cout, pre_act=True)
    ab2 = _bn_affine(st2, count)

    # pass 3: final BN2 + ReLU (elementwise)
    out_flat = _bn_relu(y2, ab2, N=N, H=H, W=W, TH=TH, cout=Cout)

    return jnp.transpose(out_flat.reshape(N, H, W, Cout), (0, 3, 1, 2))


# --------------------------------------------------------------------------
# deterministic parameter init (xavier_uniform, bias=0.01) and f32 reference
# --------------------------------------------------------------------------
def xavier_uniform_conv(key, cin, cout):
    # PyTorch xavier_uniform_ on (cout, cin, 3, 3): fan_in=cin*9, fan_out=cout*9
    bound = (6.0 / (cin * 9 + cout * 9)) ** 0.5
    return jax.random.uniform(key, (3, 3, cin, cout), jnp.float32, -bound, bound)


def ref_forward(x, w1_hwio, b1, w2_hwio, b2):
    def conv(h, w, b):
        y = jax.lax.conv_general_dilated(
            h, w, (1, 1), "SAME",
            dimension_numbers=("NCHW", "HWIO", "NCHW"),
            precision=jax.lax.Precision.HIGHEST)
        return y + b.reshape(1, -1, 1, 1)

    def bn_relu(h):
        mean = jnp.mean(h, axis=(0, 2, 3), keepdims=True)
        var = jnp.mean((h - mean) ** 2, axis=(0, 2, 3), keepdims=True)
        return jnp.maximum((h - mean) * jax.lax.rsqrt(var + BN_EPS), 0.0)

    h = bn_relu(conv(x, w1_hwio, b1))
    return bn_relu(conv(h, w2_hwio, b2))


if __name__ == "__main__":
    N, Cin, H, W = 2, 4, 16, 16
    Cout = 8
    Cmid = Cout  # module default: mid_channels = out_channels

    key = jax.random.PRNGKey(0)
    kx, k1, k2 = jax.random.split(key, 3)

    x = jax.random.normal(kx, (N, Cin, H, W), jnp.float32)
    w1 = xavier_uniform_conv(k1, Cin, Cmid)
    b1 = jnp.full((Cmid,), 0.01, jnp.float32)
    w2 = xavier_uniform_conv(k2, Cmid, Cout)
    b2 = jnp.full((Cout,), 0.01, jnp.float32)

    out = jax.jit(double_conv)(x, w1, b1, w2, b2)
    out = jax.block_until_ready(out)

    ref = ref_forward(x, w1, b1, w2, b2)
    assert out.shape == (N, Cout, H, W)
    # Kernel uses bf16 MXU operands with f32 accumulation -> compare at
    # bf16-conv fidelity (deliberately relaxed from 1e-4).
    assert jnp.allclose(out, ref, rtol=2e-2, atol=2e-2), "mismatch vs reference"

    print("KERNEL_OK")
</pallas_src>

<mosaic_0001>
module attributes {stable_mosaic.version = 11 : i64} {
  func.func @kernel(%arg0: i32, %arg1: i32, %arg2: memref<1x256x4xbf16, #tpu.memory_space<vmem>>, %arg3: memref<36x8xbf16, #tpu.memory_space<vmem>>, %arg4: memref<1x128x8xf32, #tpu.memory_space<vmem>>, %arg5: memref<1x1x2x8xf32, #tpu.memory_space<vmem>>, %arg6: memref<18x18x4xf32, #tpu.memory_space<vmem>>, %arg7: memref<8x16x36xf32, #tpu.memory_space<vmem>>) attributes {dimension_semantics = [#tpu.dimension_semantics<parallel>, #tpu.dimension_semantics<arbitrary>], iteration_bounds = array<i64: 2, 2>, scalar_prefetch = 0 : i64, scratch_operands = 2 : i64, tpu.core_type = #tpu.core_type<tc>, window_params = [{transform_indices = @transform_0, window_bounds = array<i64: 1, 256, 4>}, {pipeline_mode = #tpu.pipeline_mode<synchronous>, transform_indices = @transform_1, window_bounds = array<i64: 36, 8>}, {transform_indices = @transform_2, window_bounds = array<i64: 1, 128, 8>}, {transform_indices = @transform_3, window_bounds = array<i64: 1, 1, 2, 8>}]} {
    %c0_i32 = arith.constant 0 : i32
    %0 = arith.cmpi eq, %arg1, %c0_i32 : i32
    %1 = arith.extui %0 : i1 to i32
    %c0_i32_0 = arith.constant 0 : i32
    %2 = arith.cmpi ne, %1, %c0_i32_0 : i32
    scf.if %2 {
      %cst_60 = arith.constant 0.000000e+00 : f32
      %60 = vector.broadcast %cst_60 : f32 to vector<1x18x4xf32>
      %c0_61 = arith.constant 0 : index
      %c0_62 = arith.constant 0 : index
      %c0_63 = arith.constant 0 : index
      %61 = vector.load %arg6[%c0_61, %c0_62, %c0_63] : memref<18x18x4xf32, #tpu.memory_space<vmem>>, vector<1x18x4xf32>
      tpu.vector_store %arg6[%c0_61, %c0_62, %c0_63], %60 {strides = array<i32>} : memref<18x18x4xf32, #tpu.memory_space<vmem>>, vector<1x18x4xf32>,
      %c17 = arith.constant 17 : index
      %c0_64 = arith.constant 0 : index
      %c0_65 = arith.constant 0 : index
      %62 = vector.load %arg6[%c17, %c0_64, %c0_65] : memref<18x18x4xf32, #tpu.memory_space<vmem>>, vector<1x18x4xf32>
      tpu.vector_store %arg6[%c17, %c0_64, %c0_65], %60 {strides = array<i32>} : memref<18x18x4xf32, #tpu.memory_space<vmem>>, vector<1x18x4xf32>,
      %cst_66 = arith.constant 0.000000e+00 : f32
      %63 = vector.broadcast %cst_66 : f32 to vector<16x1x4xf32>
      %c1_67 = arith.constant 1 : index
      %c0_68 = arith.constant 0 : index
      %c0_69 = arith.constant 0 : index
      %64 = vector.load %arg6[%c1_67, %c0_68, %c0_69] : memref<18x18x4xf32, #tpu.memory_space<vmem>>, vector<16x1x4xf32>
      tpu.vector_store %arg6[%c1_67, %c0_68, %c0_69], %63 {strides = array<i32>} : memref<18x18x4xf32, #tpu.memory_space<vmem>>, vector<16x1x4xf32>,
      %c1_70 = arith.constant 1 : index
      %c17_71 = arith.constant 17 : index
      %c0_72 = arith.constant 0 : index
      %65 = vector.load %arg6[%c1_70, %c17_71, %c0_72] : memref<18x18x4xf32, #tpu.memory_space<vmem>>, vector<16x1x4xf32>
      tpu.vector_store %arg6[%c1_70, %c17_71, %c0_72], %63 {strides = array<i32>} : memref<18x18x4xf32, #tpu.memory_space<vmem>>, vector<16x1x4xf32>,
      %c0_73 = arith.constant 0 : index
      %c0_74 = arith.constant 0 : index
      %c0_75 = arith.constant 0 : index
      %66 = vector.load %arg2[%c0_73, %c0_74, %c0_75] : memref<1x256x4xbf16, #tpu.memory_space<vmem>>, vector<1x256x4xbf16>
      %67 = vector.shape_cast %66 : vector<1x256x4xbf16> to vector<256x4xbf16>
      %68 = arith.extf %67 : vector<256x4xbf16> to vector<256x4xf32>
      %69 = vector.shape_cast %68 : vector<256x4xf32> to vector<16x16x4xf32>
      %c1_76 = arith.constant 1 : index
      %c1_77 = arith.constant 1 : index
      %c0_78 = arith.constant 0 : index
      %70 = vector.load %arg6[%c1_76, %c1_77, %c0_78] : memref<18x18x4xf32, #tpu.memory_space<vmem>>, vector<16x16x4xf32>
      tpu.vector_store %arg6[%c1_76, %c1_77, %c0_78], %69 {strides = array<i32>} : memref<18x18x4xf32, #tpu.memory_space<vmem>>, vector<16x16x4xf32>,
    } else {
    }
    %c8_i32 = arith.constant 8 : i32
    %3 = arith.muli %arg1, %c8_i32 : i32
    %4 = tpu.assume_multiple %3, 8 : i32
    %c0_i32_1 = arith.constant 0 : i32
    %5 = arith.addi %4, %c0_i32_1 : i32
    %6 = arith.index_cast %5 : i32 to index
    %c0 = arith.constant 0 : index
    %c0_2 = arith.constant 0 : index
    %7 = vector.load %arg6[%6, %c0, %c0_2] : memref<18x18x4xf32, #tpu.memory_space<vmem>>, vector<8x16x4xf32>
    %c0_3 = arith.constant 0 : index
    %c0_4 = arith.constant 0 : index
    %c0_5 = arith.constant 0 : index
    %8 = vector.load %arg7[%c0_3, %c0_4, %c0_5] : memref<8x16x36xf32, #tpu.memory_space<vmem>>, vector<8x16x4xf32>
    tpu.vector_store %arg7[%c0_3, %c0_4, %c0_5], %7 {strides = array<i32>} : memref<8x16x36xf32, #tpu.memory_space<vmem>>, vector<8x16x4xf32>,
    %c0_i32_6 = arith.constant 0 : i32
    %9 = arith.addi %4, %c0_i32_6 : i32
    %10 = arith.index_cast %9 : i32 to index
    %c1 = arith.constant 1 : index
    %c0_7 = arith.constant 0 : index
    %11 = vector.load %arg6[%10, %c1, %c0_7] : memref<18x18x4xf32, #tpu.memory_space<vmem>>, vector<8x16x4xf32>
    %c0_8 = arith.constant 0 : index
    %c0_9 = arith.constant 0 : index
    %c4 = arith.constant 4 : index
    %12 = vector.load %arg7[%c0_8, %c0_9, %c4] : memref<8x16x36xf32, #tpu.memory_space<vmem>>, vector<8x16x4xf32>
    tpu.vector_store %arg7[%c0_8, %c0_9, %c4], %11 {strides = array<i32>} : memref<8x16x36xf32, #tpu.memory_space<vmem>>, vector<8x16x4xf32>,
    %c0_i32_10 = arith.constant 0 : i32
    %13 = arith.addi %4, %c0_i32_10 : i32
    %14 = arith.index_cast %13 : i32 to index
    %c2 = arith.constant 2 : index
    %c0_11 = arith.constant 0 : index
    %15 = vector.load %arg6[%14, %c2, %c0_11] : memref<18x18x4xf32, #tpu.memory_space<vmem>>, vector<8x16x4xf32>
    %c0_12 = arith.constant 0 : index
    %c0_13 = arith.constant 0 : index
    %c8 = arith.constant 8 : index
    %16 = vector.load %arg7[%c0_12, %c0_13, %c8] : memref<8x16x36xf32, #tpu.memory_space<vmem>>, vector<8x16x4xf32>
    tpu.vector_store %arg7[%c0_12, %c0_13, %c8], %15 {strides = array<i32>} : memref<8x16x36xf32, #tpu.memory_space<vmem>>, vector<8x16x4xf32>,
    %c1_i32 = arith.constant 1 : i32
    %17 = arith.addi %4, %c1_i32 : i32
    %18 = arith.index_cast %17 : i32 to index
    %c0_14 = arith.constant 0 : index
    %c0_15 = arith.constant 0 : index
    %19 = vector.load %arg6[%18, %c0_14, %c0_15] : memref<18x18x4xf32, #tpu.memory_space<vmem>>, vector<8x16x4xf32>
    %c0_16 = arith.constant 0 : index
    %c0_17 = arith.constant 0 : index
    %c12 = arith.constant 12 : index
    %20 = vector.load %arg7[%c0_16, %c0_17, %c12] : memref<8x16x36xf32, #tpu.memory_space<vmem>>, vector<8x16x4xf32>
    tpu.vector_store %arg7[%c0_16, %c0_17, %c12], %19 {strides = array<i32>} : memref<8x16x36xf32, #tpu.memory_space<vmem>>, vector<8x16x4xf32>,
    %c1_i32_18 = arith.constant 1 : i32
    %21 = arith.addi %4, %c1_i32_18 : i32
    %22 = arith.index_cast %21 : i32 to index
    %c1_19 = arith.constant 1 : index
    %c0_20 = arith.constant 0 : index
    %23 = vector.load %arg6[%22, %c1_19, %c0_20] : memref<18x18x4xf32, #tpu.memory_space<vmem>>, vector<8x16x4xf32>
    %c0_21 = arith.constant 0 : index
    %c0_22 = arith.constant 0 : index
    %c16 = arith.constant 16 : index
    %24 = vector.load %arg7[%c0_21, %c0_22, %c16] : memref<8x16x36xf32, #tpu.memory_space<vmem>>, vector<8x16x4xf32>
    tpu.vector_store %arg7[%c0_21, %c0_22, %c16], %23 {strides = array<i32>} : memref<8x16x36xf32, #tpu.memory_space<vmem>>, vector<8x16x4xf32>,
    %c1_i32_23 = arith.constant 1 : i32
    %25 = arith.addi %4, %c1_i32_23 : i32
    %26 = arith.index_cast %25 : i32 to index
    %c2_24 = arith.constant 2 : index
    %c0_25 = arith.constant 0 : index
    %27 = vector.load %arg6[%26, %c2_24, %c0_25] : memref<18x18x4xf32, #tpu.memory_space<vmem>>, vector<8x16x4xf32>
    %c0_26 = arith.constant 0 : index
    %c0_27 = arith.constant 0 : index
    %c20 = arith.constant 20 : index
    %28 = vector.load %arg7[%c0_26, %c0_27, %c20] : memref<8x16x36xf32, #tpu.memory_space<vmem>>, vector<8x16x4xf32>
    tpu.vector_store %arg7[%c0_26, %c0_27, %c20], %27 {strides = array<i32>} : memref<8x16x36xf32, #tpu.memory_space<vmem>>, vector<8x16x4xf32>,
    %c2_i32 = arith.constant 2 : i32
    %29 = arith.addi %4, %c2_i32 : i32
    %30 = arith.index_cast %29 : i32 to index
    %c0_28 = arith.constant 0 : index
    %c0_29 = arith.constant 0 : index
    %31 = vector.load %arg6[%30, %c0_28, %c0_29] : memref<18x18x4xf32, #tpu.memory_space<vmem>>, vector<8x16x4xf32>
    %c0_30 = arith.constant 0 : index
    %c0_31 = arith.constant 0 : index
    %c24 = arith.constant 24 : index
    %32 = vector.load %arg7[%c0_30, %c0_31, %c24] : memref<8x16x36xf32, #tpu.memory_space<vmem>>, vector<8x16x4xf32>
    tpu.vector_store %arg7[%c0_30, %c0_31, %c24], %31 {strides = array<i32>} : memref<8x16x36xf32, #tpu.memory_space<vmem>>, vector<8x16x4xf32>,
    %c2_i32_32 = arith.constant 2 : i32
    %33 = arith.addi %4, %c2_i32_32 : i32
    %34 = arith.index_cast %33 : i32 to index
    %c1_33 = arith.constant 1 : index
    %c0_34 = arith.constant 0 : index
    %35 = vector.load %arg6[%34, %c1_33, %c0_34] : memref<18x18x4xf32, #tpu.memory_space<vmem>>, vector<8x16x4xf32>
    %c0_35 = arith.constant 0 : index
    %c0_36 = arith.constant 0 : index
    %c28 = arith.constant 28 : index
    %36 = vector.load %arg7[%c0_35, %c0_36, %c28] : memref<8x16x36xf32, #tpu.memory_space<vmem>>, vector<8x16x4xf32>
    tpu.vector_store %arg7[%c0_35, %c0_36, %c28], %35 {strides = array<i32>} : memref<8x16x36xf32, #tpu.memory_space<vmem>>, vector<8x16x4xf32>,
    %c2_i32_37 = arith.constant 2 : i32
    %37 = arith.addi %4, %c2_i32_37 : i32
    %38 = arith.index_cast %37 : i32 to index
    %c2_38 = arith.constant 2 : index
    %c0_39 = arith.constant 0 : index
    %39 = vector.load %arg6[%38, %c2_38, %c0_39] : memref<18x18x4xf32, #tpu.memory_space<vmem>>, vector<8x16x4xf32>
    %c0_40 = arith.constant 0 : index
    %c0_41 = arith.constant 0 : index
    %c32 = arith.constant 32 : index
    %40 = vector.load %arg7[%c0_40, %c0_41, %c32] : memref<8x16x36xf32, #tpu.memory_space<vmem>>, vector<8x16x4xf32>
    tpu.vector_store %arg7[%c0_40, %c0_41, %c32], %39 {strides = array<i32>} : memref<8x16x36xf32, #tpu.memory_space<vmem>>, vector<8x16x4xf32>,
    %c0_42 = arith.constant 0 : index
    %c0_43 = arith.constant 0 : index
    %c0_44 = arith.constant 0 : index
    %41 = vector.load %arg7[%c0_42, %c0_43, %c0_44] : memref<8x16x36xf32, #tpu.memory_space<vmem>>, vector<8x16x36xf32>
    %42 = vector.shape_cast %41 : vector<8x16x36xf32> to vector<128x36xf32>
    %43 = arith.truncf %42 : vector<128x36xf32> to vector<128x36xbf16>
    %c0_45 = arith.constant 0 : index
    %c0_46 = arith.constant 0 : index
    %44 = vector.load %arg3[%c0_45, %c0_46] : memref<36x8xbf16, #tpu.memory_space<vmem>>, vector<36x8xbf16>
    %cst = arith.constant dense<0.000000e+00> : vector<128x8xf32>
    %45 = tpu.matmul %43, %44, %cst {dimension_numbers = #tpu.dot_dimension_numbers<[1], [0], [0], [1], [0, 0, 1, 1], [], []>} : vector<128x36xbf16>, vector<36x8xbf16>, vector<128x8xf32> -> vector<128x8xf32>
    %cst_47 = arith.constant dense<0.000000e+00> : vector<8xf32>
    %46 = vector.multi_reduction <add>, %45, %cst_47 [0] : vector<128x8xf32> to vector<8xf32>
    %47 = vector.shape_cast %46 : vector<8xf32> to vector<1x8xf32>
    %c0_48 = arith.constant 0 : index
    %c0_49 = arith.constant 0 : index
    %c0_50 = arith.constant 0 : index
    %c0_51 = arith.constant 0 : index
    %48 = vector.load %arg5[%c0_48, %c0_49, %c0_50, %c0_51] : memref<1x1x2x8xf32, #tpu.memory_space<vmem>>, vector<1x1x1x8xf32>
    %49 = vector.shape_cast %48 : vector<1x1x1x8xf32> to vector<1x8xf32>
    %50 = vector.shape_cast %47 : vector<1x8xf32> to vector<1x1x1x8xf32>
    tpu.vector_store %arg5[%c0_48, %c0_49, %c0_50, %c0_51], %50 {strides = array<i32>} : memref<1x1x2x8xf32, #tpu.memory_space<vmem>>, vector<1x1x1x8xf32>,
    %51 = arith.mulf %45, %45 : vector<128x8xf32>
    %cst_52 = arith.constant dense<0.000000e+00> : vector<8xf32>
    %52 = vector.multi_reduction <add>, %51, %cst_52 [0] : vector<128x8xf32> to vector<8xf32>
    %53 = vector.shape_cast %52 : vector<8xf32> to vector<1x8xf32>
    %c0_53 = arith.constant 0 : index
    %c0_54 = arith.constant 0 : index
    %c1_55 = arith.constant 1 : index
    %c0_56 = arith.constant 0 : index
    %54 = vector.load %arg5[%c0_53, %c0_54, %c1_55, %c0_56] : memref<1x1x2x8xf32, #tpu.memory_space<vmem>>, vector<1x1x1x8xf32>
    %55 = vector.shape_cast %54 : vector<1x1x1x8xf32> to vector<1x8xf32>
    %56 = vector.shape_cast %53 : vector<1x8xf32> to vector<1x1x1x8xf32>
    tpu.vector_store %arg5[%c0_53, %c0_54, %c1_55, %c0_56], %56 {strides = array<i32>} : memref<1x1x2x8xf32, #tpu.memory_space<vmem>>, vector<1x1x1x8xf32>,
    %c0_57 = arith.constant 0 : index
    %c0_58 = arith.constant 0 : index
    %c0_59 = arith.constant 0 : index
    %57 = vector.load %arg4[%c0_57, %c0_58, %c0_59] : memref<1x128x8xf32, #tpu.memory_space<vmem>>, vector<1x128x8xf32>
    %58 = vector.shape_cast %57 : vector<1x128x8xf32> to vector<128x8xf32>
    %59 = vector.shape_cast %45 : vector<128x8xf32> to vector<1x128x8xf32>
    tpu.vector_store %arg4[%c0_57, %c0_58, %c0_59], %59 {strides = array<i32>} : memref<1x128x8xf32, #tpu.memory_space<vmem>>, vector<1x128x8xf32>,
    return
  }
  func.func @transform_0(%arg0: i32, %arg1: i32) -> (i32, i32, i32) {
    %c0_i32 = arith.constant 0 : i32
    %c0_i32_0 = arith.constant 0 : i32
    %c0_i32_1 = arith.constant 0 : i32
    return %arg0, %c0_i32, %c0_i32_0 : i32, i32, i32
  }
  func.func @transform_1(%arg0: i32, %arg1: i32) -> (i32, i32) {
    %c0_i32 = arith.constant 0 : i32
    %c0_i32_0 = arith.constant 0 : i32
    %c0_i32_1 = arith.constant 0 : i32
    return %c0_i32, %c0_i32_0 : i32, i32
  }
  func.func @transform_2(%arg0: i32, %arg1: i32) -> (i32, i32, i32) {
    %c0_i32 = arith.constant 0 : i32
    %c0_i32_0 = arith.constant 0 : i32
    return %arg0, %arg1, %c0_i32 : i32, i32, i32
  }
  func.func @transform_3(%arg0: i32, %arg1: i32) -> (i32, i32, i32, i32) {
    %c0_i32 = arith.constant 0 : i32
    %c0_i32_0 = arith.constant 0 : i32
    %c0_i32_1 = arith.constant 0 : i32
    return %arg0, %arg1, %c0_i32, %c0_i32_0 : i32, i32, i32, i32
  }
}

module attributes {stable_mosaic.version = 11 : i64} {
  func.func @_bn_relu_kernel(%arg0: i32, %arg1: i32, %arg2: memref<1x128x8xf32, #tpu.memory_space<vmem>>, %arg3: memref<2x8xf32, #tpu.memory_space<vmem>>, %arg4: memref<1x128x8xf32, #tpu.memory_space<vmem>>) attributes {dimension_semantics = [#tpu.dimension_semantics<parallel>, #tpu.dimension_semantics<parallel>], iteration_bounds = array<i64: 2, 2>, scalar_prefetch = 0 : i64, scratch_operands = 0 : i64, tpu.core_type = #tpu.core_type<tc>, window_params = [{transform_indices = @transform_0, window_bounds = array<i64: 1, 128, 8>}, {pipeline_mode = #tpu.pipeline_mode<synchronous>, transform_indices = @transform_1, window_bounds = array<i64: 2, 8>}, {transform_indices = @transform_2, window_bounds = array<i64: 1, 128, 8>}]} {
    %c0 = arith.constant 0 : index
    %c0_0 = arith.constant 0 : index
    %0 = vector.load %arg3[%c0, %c0_0] : memref<2x8xf32, #tpu.memory_space<vmem>>, vector<1x8xf32>
    %c1 = arith.constant 1 : index
    %c0_1 = arith.constant 0 : index
    %1 = vector.load %arg3[%c1, %c0_1] : memref<2x8xf32, #tpu.memory_space<vmem>>, vector<1x8xf32>
    %c0_2 = arith.constant 0 : index
    %c0_3 = arith.constant 0 : index
    %c0_4 = arith.constant 0 : index
    %2 = vector.load %arg2[%c0_2, %c0_3, %c0_4] : memref<1x128x8xf32, #tpu.memory_space<vmem>>, vector<1x128x8xf32>
    %3 = vector.shape_cast %2 : vector<1x128x8xf32> to vector<128x8xf32>
    %4 = vector.broadcast %0 : vector<1x8xf32> to vector<128x8xf32>
    %5 = arith.mulf %3, %4 : vector<128x8xf32>
    %6 = vector.broadcast %1 : vector<1x8xf32> to vector<128x8xf32>
    %7 = arith.addf %5, %6 : vector<128x8xf32>
    %cst = arith.constant 0.000000e+00 : f32
    %8 = vector.broadcast %cst : f32 to vector<128x8xf32>
    %9 = arith.maximumf %7, %8 : vector<128x8xf32>
    %c0_5 = arith.constant 0 : index
    %c0_6 = arith.constant 0 : index
    %c0_7 = arith.constant 0 : index
    %10 = vector.load %arg4[%c0_5, %c0_6, %c0_7] : memref<1x128x8xf32, #tpu.memory_space<vmem>>, vector<1x128x8xf32>
    %11 = vector.shape_cast %10 : vector<1x128x8xf32> to vector<128x8xf32>
    %12 = vector.shape_cast %9 : vector<128x8xf32> to vector<1x128x8xf32>
    tpu.vector_store %arg4[%c0_5, %c0_6, %c0_7], %12 {strides = array<i32>} : memref<1x128x8xf32, #tpu.memory_space<vmem>>, vector<1x128x8xf32>,
    return
  }
  func.func @transform_0(%arg0: i32, %arg1: i32) -> (i32, i32, i32) {
    %c0_i32 = arith.constant 0 : i32
    %c0_i32_0 = arith.constant 0 : i32
    return %arg0, %arg1, %c0_i32 : i32, i32, i32
  }
  func.func @transform_1(%arg0: i32, %arg1: i32) -> (i32, i32) {
    %c0_i32 = arith.constant 0 : i32
    %c0_i32_0 = arith.constant 0 : i32
    %c0_i32_1 = arith.constant 0 : i32
    return %c0_i32, %c0_i32_0 : i32, i32
  }
  func.func @transform_2(%arg0: i32, %arg1: i32) -> (i32, i32, i32) {
    %c0_i32 = arith.constant 0 : i32
    %c0_i32_0 = arith.constant 0 : i32
    return %arg0, %arg1, %c0_i32 : i32, i32, i32
  }
}

module attributes {stable_mosaic.version = 11 : i64} {
  func.func @kernel(%arg0: i32, %arg1: i32, %arg2: memref<1x256x8xf32, #tpu.memory_space<vmem>>, %arg3: memref<2x8xf32, #tpu.memory_space<vmem>>, %arg4: memref<72x8xbf16, #tpu.memory_space<vmem>>, %arg5: memref<1x128x8xf32, #tpu.memory_space<vmem>>, %arg6: memref<1x1x2x8xf32, #tpu.memory_space<vmem>>, %arg7: memref<18x18x8xf32, #tpu.memory_space<vmem>>, %arg8: memref<8x16x72xf32, #tpu.memory_space<vmem>>) attributes {dimension_semantics = [#tpu.dimension_semantics<parallel>, #tpu.dimension_semantics<arbitrary>], iteration_bounds = array<i64: 2, 2>, scalar_prefetch = 0 : i64, scratch_operands = 2 : i64, tpu.core_type = #tpu.core_type<tc>, window_params = [{transform_indices = @transform_0, window_bounds = array<i64: 1, 256, 8>}, {pipeline_mode = #tpu.pipeline_mode<synchronous>, transform_indices = @transform_1, window_bounds = array<i64: 2, 8>}, {pipeline_mode = #tpu.pipeline_mode<synchronous>, transform_indices = @transform_2, window_bounds = array<i64: 72, 8>}, {transform_indices = @transform_3, window_bounds = array<i64: 1, 128, 8>}, {transform_indices = @transform_4, window_bounds = array<i64: 1, 1, 2, 8>}]} {
    %c0_i32 = arith.constant 0 : i32
    %0 = arith.cmpi eq, %arg1, %c0_i32 : i32
    %1 = arith.extui %0 : i1 to i32
    %c0_i32_0 = arith.constant 0 : i32
    %2 = arith.cmpi ne, %1, %c0_i32_0 : i32
    scf.if %2 {
      %cst_60 = arith.constant 0.000000e+00 : f32
      %60 = vector.broadcast %cst_60 : f32 to vector<1x18x8xf32>
      %c0_61 = arith.constant 0 : index
      %c0_62 = arith.constant 0 : index
      %c0_63 = arith.constant 0 : index
      %61 = vector.load %arg7[%c0_61, %c0_62, %c0_63] : memref<18x18x8xf32, #tpu.memory_space<vmem>>, vector<1x18x8xf32>
      tpu.vector_store %arg7[%c0_61, %c0_62, %c0_63], %60 {strides = array<i32>} : memref<18x18x8xf32, #tpu.memory_space<vmem>>, vector<1x18x8xf32>,
      %c17 = arith.constant 17 : index
      %c0_64 = arith.constant 0 : index
      %c0_65 = arith.constant 0 : index
      %62 = vector.load %arg7[%c17, %c0_64, %c0_65] : memref<18x18x8xf32, #tpu.memory_space<vmem>>, vector<1x18x8xf32>
      tpu.vector_store %arg7[%c17, %c0_64, %c0_65], %60 {strides = array<i32>} : memref<18x18x8xf32, #tpu.memory_space<vmem>>, vector<1x18x8xf32>,
      %cst_66 = arith.constant 0.000000e+00 : f32
      %63 = vector.broadcast %cst_66 : f32 to vector<16x1x8xf32>
      %c1_67 = arith.constant 1 : index
      %c0_68 = arith.constant 0 : index
      %c0_69 = arith.constant 0 : index
      %64 = vector.load %arg7[%c1_67, %c0_68, %c0_69] : memref<18x18x8xf32, #tpu.memory_space<vmem>>, vector<16x1x8xf32>
      tpu.vector_store %arg7[%c1_67, %c0_68, %c0_69], %63 {strides = array<i32>} : memref<18x18x8xf32, #tpu.memory_space<vmem>>, vector<16x1x8xf32>,
      %c1_70 = arith.constant 1 : index
      %c17_71 = arith.constant 17 : index
      %c0_72 = arith.constant 0 : index
      %65 = vector.load %arg7[%c1_70, %c17_71, %c0_72] : memref<18x18x8xf32, #tpu.memory_space<vmem>>, vector<16x1x8xf32>
      tpu.vector_store %arg7[%c1_70, %c17_71, %c0_72], %63 {strides = array<i32>} : memref<18x18x8xf32, #tpu.memory_space<vmem>>, vector<16x1x8xf32>,
      %c0_73 = arith.constant 0 : index
      %c0_74 = arith.constant 0 : index
      %c0_75 = arith.constant 0 : index
      %66 = vector.load %arg2[%c0_73, %c0_74, %c0_75] : memref<1x256x8xf32, #tpu.memory_space<vmem>>, vector<1x256x8xf32>
      %67 = vector.shape_cast %66 : vector<1x256x8xf32> to vector<256x8xf32>
      %c0_76 = arith.constant 0 : index
      %c0_77 = arith.constant 0 : index
      %68 = vector.load %arg3[%c0_76, %c0_77] : memref<2x8xf32, #tpu.memory_space<vmem>>, vector<1x8xf32>
      %c1_78 = arith.constant 1 : index
      %c0_79 = arith.constant 0 : index
      %69 = vector.load %arg3[%c1_78, %c0_79] : memref<2x8xf32, #tpu.memory_space<vmem>>, vector<1x8xf32>
      %70 = vector.broadcast %68 : vector<1x8xf32> to vector<256x8xf32>
      %71 = arith.mulf %67, %70 : vector<256x8xf32>
      %72 = vector.broadcast %69 : vector<1x8xf32> to vector<256x8xf32>
      %73 = arith.addf %71, %72 : vector<256x8xf32>
      %cst_80 = arith.constant 0.000000e+00 : f32
      %74 = vector.broadcast %cst_80 : f32 to vector<256x8xf32>
      %75 = arith.maximumf %73, %74 : vector<256x8xf32>
      %76 = vector.shape_cast %75 : vector<256x8xf32> to vector<16x16x8xf32>
      %c1_81 = arith.constant 1 : index
      %c1_82 = arith.constant 1 : index
      %c0_83 = arith.constant 0 : index
      %77 = vector.load %arg7[%c1_81, %c1_82, %c0_83] : memref<18x18x8xf32, #tpu.memory_space<vmem>>, vector<16x16x8xf32>
      tpu.vector_store %arg7[%c1_81, %c1_82, %c0_83], %76 {strides = array<i32>} : memref<18x18x8xf32, #tpu.memory_space<vmem>>, vector<16x16x8xf32>,
    } else {
    }
    %c8_i32 = arith.constant 8 : i32
    %3 = arith.muli %arg1, %c8_i32 : i32
    %4 = tpu.assume_multiple %3, 8 : i32
    %c0_i32_1 = arith.constant 0 : i32
    %5 = arith.addi %4, %c0_i32_1 : i32
    %6 = arith.index_cast %5 : i32 to index
    %c0 = arith.constant 0 : index
    %c0_2 = arith.constant 0 : index
    %7 = vector.load %arg7[%6, %c0, %c0_2] : memref<18x18x8xf32, #tpu.memory_space<vmem>>, vector<8x16x8xf32>
    %c0_3 = arith.constant 0 : index
    %c0_4 = arith.constant 0 : index
    %c0_5 = arith.constant 0 : index
    %8 = vector.load %arg8[%c0_3, %c0_4, %c0_5] : memref<8x16x72xf32, #tpu.memory_space<vmem>>, vector<8x16x8xf32>
    tpu.vector_store %arg8[%c0_3, %c0_4, %c0_5], %7 {strides = array<i32>} : memref<8x16x72xf32, #tpu.memory_space<vmem>>, vector<8x16x8xf32>,
    %c0_i32_6 = arith.constant 0 : i32
    %9 = arith.addi %4, %c0_i32_6 : i32
    %10 = arith.index_cast %9 : i32 to index
    %c1 = arith.constant 1 : index
    %c0_7 = arith.constant 0 : index
    %11 = vector.load %arg7[%10, %c1, %c0_7] : memref<18x18x8xf32, #tpu.memory_space<vmem>>, vector<8x16x8xf32>
    %c0_8 = arith.constant 0 : index
    %c0_9 = arith.constant 0 : index
    %c8 = arith.constant 8 : index
    %12 = vector.load %arg8[%c0_8, %c0_9, %c8] : memref<8x16x72xf32, #tpu.memory_space<vmem>>, vector<8x16x8xf32>
    tpu.vector_store %arg8[%c0_8, %c0_9, %c8], %11 {strides = array<i32>} : memref<8x16x72xf32, #tpu.memory_space<vmem>>, vector<8x16x8xf32>,
    %c0_i32_10 = arith.constant 0 : i32
    %13 = arith.addi %4, %c0_i32_10 : i32
    %14 = arith.index_cast %13 : i32 to index
    %c2 = arith.constant 2 : index
    %c0_11 = arith.constant 0 : index
    %15 = vector.load %arg7[%14, %c2, %c0_11] : memref<18x18x8xf32, #tpu.memory_space<vmem>>, vector<8x16x8xf32>
    %c0_12 = arith.constant 0 : index
    %c0_13 = arith.constant 0 : index
    %c16 = arith.constant 16 : index
    %16 = vector.load %arg8[%c0_12, %c0_13, %c16] : memref<8x16x72xf32, #tpu.memory_space<vmem>>, vector<8x16x8xf32>
    tpu.vector_store %arg8[%c0_12, %c0_13, %c16], %15 {strides = array<i32>} : memref<8x16x72xf32, #tpu.memory_space<vmem>>, vector<8x16x8xf32>,
    %c1_i32 = arith.constant 1 : i32
    %17 = arith.addi %4, %c1_i32 : i32
    %18 = arith.index_cast %17 : i32 to index
    %c0_14 = arith.constant 0 : index
    %c0_15 = arith.constant 0 : index
    %19 = vector.load %arg7[%18, %c0_14, %c0_15] : memref<18x18x8xf32, #tpu.memory_space<vmem>>, vector<8x16x8xf32>
    %c0_16 = arith.constant 0 : index
    %c0_17 = arith.constant 0 : index
    %c24 = arith.constant 24 : index
    %20 = vector.load %arg8[%c0_16, %c0_17, %c24] : memref<8x16x72xf32, #tpu.memory_space<vmem>>, vector<8x16x8xf32>
    tpu.vector_store %arg8[%c0_16, %c0_17, %c24], %19 {strides = array<i32>} : memref<8x16x72xf32, #tpu.memory_space<vmem>>, vector<8x16x8xf32>,
    %c1_i32_18 = arith.constant 1 : i32
    %21 = arith.addi %4, %c1_i32_18 : i32
    %22 = arith.index_cast %21 : i32 to index
    %c1_19 = arith.constant 1 : index
    %c0_20 = arith.constant 0 : index
    %23 = vector.load %arg7[%22, %c1_19, %c0_20] : memref<18x18x8xf32, #tpu.memory_space<vmem>>, vector<8x16x8xf32>
    %c0_21 = arith.constant 0 : index
    %c0_22 = arith.constant 0 : index
    %c32 = arith.constant 32 : index
    %24 = vector.load %arg8[%c0_21, %c0_22, %c32] : memref<8x16x72xf32, #tpu.memory_space<vmem>>, vector<8x16x8xf32>
    tpu.vector_store %arg8[%c0_21, %c0_22, %c32], %23 {strides = array<i32>} : memref<8x16x72xf32, #tpu.memory_space<vmem>>, vector<8x16x8xf32>,
    %c1_i32_23 = arith.constant 1 : i32
    %25 = arith.addi %4, %c1_i32_23 : i32
    %26 = arith.index_cast %25 : i32 to index
    %c2_24 = arith.constant 2 : index
    %c0_25 = arith.constant 0 : index
    %27 = vector.load %arg7[%26, %c2_24, %c0_25] : memref<18x18x8xf32, #tpu.memory_space<vmem>>, vector<8x16x8xf32>
    %c0_26 = arith.constant 0 : index
    %c0_27 = arith.constant 0 : index
    %c40 = arith.constant 40 : index
    %28 = vector.load %arg8[%c0_26, %c0_27, %c40] : memref<8x16x72xf32, #tpu.memory_space<vmem>>, vector<8x16x8xf32>
    tpu.vector_store %arg8[%c0_26, %c0_27, %c40], %27 {strides = array<i32>} : memref<8x16x72xf32, #tpu.memory_space<vmem>>, vector<8x16x8xf32>,
    %c2_i32 = arith.constant 2 : i32
    %29 = arith.addi %4, %c2_i32 : i32
    %30 = arith.index_cast %29 : i32 to index
    %c0_28 = arith.constant 0 : index
    %c0_29 = arith.constant 0 : index
    %31 = vector.load %arg7[%30, %c0_28, %c0_29] : memref<18x18x8xf32, #tpu.memory_space<vmem>>, vector<8x16x8xf32>
    %c0_30 = arith.constant 0 : index
    %c0_31 = arith.constant 0 : index
    %c48 = arith.constant 48 : index
    %32 = vector.load %arg8[%c0_30, %c0_31, %c48] : memref<8x16x72xf32, #tpu.memory_space<vmem>>, vector<8x16x8xf32>
    tpu.vector_store %arg8[%c0_30, %c0_31, %c48], %31 {strides = array<i32>} : memref<8x16x72xf32, #tpu.memory_space<vmem>>, vector<8x16x8xf32>,
    %c2_i32_32 = arith.constant 2 : i32
    %33 = arith.addi %4, %c2_i32_32 : i32
    %34 = arith.index_cast %33 : i32 to index
    %c1_33 = arith.constant 1 : index
    %c0_34 = arith.constant 0 : index
    %35 = vector.load %arg7[%34, %c1_33, %c0_34] : memref<18x18x8xf32, #tpu.memory_space<vmem>>, vector<8x16x8xf32>
    %c0_35 = arith.constant 0 : index
    %c0_36 = arith.constant 0 : index
    %c56 = arith.constant 56 : index
    %36 = vector.load %arg8[%c0_35, %c0_36, %c56] : memref<8x16x72xf32, #tpu.memory_space<vmem>>, vector<8x16x8xf32>
    tpu.vector_store %arg8[%c0_35, %c0_36, %c56], %35 {strides = array<i32>} : memref<8x16x72xf32, #tpu.memory_space<vmem>>, vector<8x16x8xf32>,
    %c2_i32_37 = arith.constant 2 : i32
    %37 = arith.addi %4, %c2_i32_37 : i32
    %38 = arith.index_cast %37 : i32 to index
    %c2_38 = arith.constant 2 : index
    %c0_39 = arith.constant 0 : index
    %39 = vector.load %arg7[%38, %c2_38, %c0_39] : memref<18x18x8xf32, #tpu.memory_space<vmem>>, vector<8x16x8xf32>
    %c0_40 = arith.constant 0 : index
    %c0_41 = arith.constant 0 : index
    %c64 = arith.constant 64 : index
    %40 = vector.load %arg8[%c0_40, %c0_41, %c64] : memref<8x16x72xf32, #tpu.memory_space<vmem>>, vector<8x16x8xf32>
    tpu.vector_store %arg8[%c0_40, %c0_41, %c64], %39 {strides = array<i32>} : memref<8x16x72xf32, #tpu.memory_space<vmem>>, vector<8x16x8xf32>,
    %c0_42 = arith.constant 0 : index
    %c0_43 = arith.constant 0 : index
    %c0_44 = arith.constant 0 : index
    %41 = vector.load %arg8[%c0_42, %c0_43, %c0_44] : memref<8x16x72xf32, #tpu.memory_space<vmem>>, vector<8x16x72xf32>
    %42 = vector.shape_cast %41 : vector<8x16x72xf32> to vector<128x72xf32>
    %43 = arith.truncf %42 : vector<128x72xf32> to vector<128x72xbf16>
    %c0_45 = arith.constant 0 : index
    %c0_46 = arith.constant 0 : index
    %44 = vector.load %arg4[%c0_45, %c0_46] : memref<72x8xbf16, #tpu.memory_space<vmem>>, vector<72x8xbf16>
    %cst = arith.constant dense<0.000000e+00> : vector<128x8xf32>
    %45 = tpu.matmul %43, %44, %cst {dimension_numbers = #tpu.dot_dimension_numbers<[1], [0], [0], [1], [0, 0, 1, 1], [], []>} : vector<128x72xbf16>, vector<72x8xbf16>, vector<128x8xf32> -> vector<128x8xf32>
    %cst_47 = arith.constant dense<0.000000e+00> : vector<8xf32>
    %46 = vector.multi_reduction <add>, %45, %cst_47 [0] : vector<128x8xf32> to vector<8xf32>
    %47 = vector.shape_cast %46 : vector<8xf32> to vector<1x8xf32>
    %c0_48 = arith.constant 0 : index
    %c0_49 = arith.constant 0 : index
    %c0_50 = arith.constant 0 : index
    %c0_51 = arith.constant 0 : index
    %48 = vector.load %arg6[%c0_48, %c0_49, %c0_50, %c0_51] : memref<1x1x2x8xf32, #tpu.memory_space<vmem>>, vector<1x1x1x8xf32>
    %49 = vector.shape_cast %48 : vector<1x1x1x8xf32> to vector<1x8xf32>
    %50 = vector.shape_cast %47 : vector<1x8xf32> to vector<1x1x1x8xf32>
    tpu.vector_store %arg6[%c0_48, %c0_49, %c0_50, %c0_51], %50 {strides = array<i32>} : memref<1x1x2x8xf32, #tpu.memory_space<vmem>>, vector<1x1x1x8xf32>,
    %51 = arith.mulf %45, %45 : vector<128x8xf32>
    %cst_52 = arith.constant dense<0.000000e+00> : vector<8xf32>
    %52 = vector.multi_reduction <add>, %51, %cst_52 [0] : vector<128x8xf32> to vector<8xf32>
    %53 = vector.shape_cast %52 : vector<8xf32> to vector<1x8xf32>
    %c0_53 = arith.constant 0 : index
    %c0_54 = arith.constant 0 : index
    %c1_55 = arith.constant 1 : index
    %c0_56 = arith.constant 0 : index
    %54 = vector.load %arg6[%c0_53, %c0_54, %c1_55, %c0_56] : memref<1x1x2x8xf32, #tpu.memory_space<vmem>>, vector<1x1x1x8xf32>
    %55 = vector.shape_cast %54 : vector<1x1x1x8xf32> to vector<1x8xf32>
    %56 = vector.shape_cast %53 : vector<1x8xf32> to vector<1x1x1x8xf32>
    tpu.vector_store %arg6[%c0_53, %c0_54, %c1_55, %c0_56], %56 {strides = array<i32>} : memref<1x1x2x8xf32, #tpu.memory_space<vmem>>, vector<1x1x1x8xf32>,
    %c0_57 = arith.constant 0 : index
    %c0_58 = arith.constant 0 : index
    %c0_59 = arith.constant 0 : index
    %57 = vector.load %arg5[%c0_57, %c0_58, %c0_59] : memref<1x128x8xf32, #tpu.memory_space<vmem>>, vector<1x128x8xf32>
    %58 = vector.shape_cast %57 : vector<1x128x8xf32> to vector<128x8xf32>
    %59 = vector.shape_cast %45 : vector<128x8xf32> to vector<1x128x8xf32>
    tpu.vector_store %arg5[%c0_57, %c0_58, %c0_59], %59 {strides = array<i32>} : memref<1x128x8xf32, #tpu.memory_space<vmem>>, vector<1x128x8xf32>,
    return
  }
  func.func @transform_0(%arg0: i32, %arg1: i32) -> (i32, i32, i32) {
    %c0_i32 = arith.constant 0 : i32
    %c0_i32_0 = arith.constant 0 : i32
    %c0_i32_1 = arith.constant 0 : i32
    return %arg0, %c0_i32, %c0_i32_0 : i32, i32, i32
  }
  func.func @transform_1(%arg0: i32, %arg1: i32) -> (i32, i32) {
    %c0_i32 = arith.constant 0 : i32
    %c0_i32_0 = arith.constant 0 : i32
    %c0_i32_1 = arith.constant 0 : i32
    return %c0_i32, %c0_i32_0 : i32, i32
  }
  func.func @transform_2(%arg0: i32, %arg1: i32) -> (i32, i32) {
    %c0_i32 = arith.constant 0 : i32
    %c0_i32_0 = arith.constant 0 : i32
    %c0_i32_1 = arith.constant 0 : i32
    return %c0_i32, %c0_i32_0 : i32, i32
  }
  func.func @transform_3(%arg0: i32, %arg1: i32) -> (i32, i32, i32) {
    %c0_i32 = arith.constant 0 : i32
    %c0_i32_0 = arith.constant 0 : i32
    return %arg0, %arg1, %c0_i32 : i32, i32, i32
  }
  func.func @transform_4(%arg0: i32, %arg1: i32) -> (i32, i32, i32, i32) {
    %c0_i32 = arith.constant 0 : i32
    %c0_i32_0 = arith.constant 0 : i32
    %c0_i32_1 = arith.constant 0 : i32
    return %arg0, %arg1, %c0_i32, %c0_i32_0 : i32, i32, i32, i32
  }
}

</mosaic_0001>

<bundles_post_ra>
// kernel: double_conv.5
= control target key start
LH: loop header
LB: loop body
LE: loop exit
PB: predicated region body
PF: predicated region fallthrough
CT: control target
= control target key end

     0   :  { %s468_s9 = smov 0   ;;  %s470_s10 = smov 0   ;;  %s595_s0 = inlined_call_operand.vmem [shape: f32[2,256,8], index: 0, kind: input, shape index: {}]   ;;  %s596_s1 = inlined_call_operand.vmem [shape: f32[2,8], index: 1, kind: input, shape index: {}]   ;;  %s597_s2 = inlined_call_operand.vmem [shape: f32[2,256,8], index: 2, kind: output, shape index: {}]  }
   0x1   :  { %s472_s11 = smov 0   ;;  %s474_s12 = smov 0  }
   0x2   :  { %s476_s13 = smov 0  }
   0x3 LB: > { %s21_s14 = sadd.s32 1, %s443_s11  ;;  %s24_s15 = sadd.s32 1, %s447_s12  ;;  %s451_s13 = sphi %s476_s13, %s12_s13   ;;  %s447_s12 = sphi %s474_s12, %s601_s12   ;;  %s443_s11 = sphi %s472_s11, %s600_s11   ;;  %s439_s10 = sphi %s470_s10, %s599_s10   ;;  %s435_s9 = sphi %s468_s9, %s598_s9  }
   0x4   : > { %p22_p0 = scmp.ge.s32.totalorder %s21_s14, 2  ;;  %p362_p1 = scmp.ge.s32.totalorder %s451_s13, 1 }
   0x5   : > { %p133_p2 = scmp.lt.s32.totalorder %s451_s13, 5 }
   0x6   : > { %s603_s14 = smov (%p22_p0, %s21_s14), 0  ;;  %s605_s15 = smov (!%p22_p0, %s24_s15), %s447_s12 }
   0x7   : > { %p134_p3 = pnand %p362_p1, %p133_p2  ;;  %p26_p4 = scmp.ge.s32.totalorder %s605_s15, 2 }
   0x8   : > { %s363_s16 = sshll.u32 (!%p134_p3), %s435_s9, 4  ;;  %p164_p5 = scmp.lt.s32.totalorder (!%p134_p3), %s439_s10, 1 }
   0x9   : > { %s607_s15 = smov (%p26_p4, %s605_s15), 0  ;;  %137 = sbr.rel (%p134_p3) target bundleno = 42 (0x2a), region = 28 }
   0xa   : > { %p166_p6 = scmp.lt.s32.totalorder (!%p134_p3), %s363_s16, 31 }
   0xe   : > { %s609_s10 = smov (!%p164_p5, %s439_s10), 1  ;;  %s611_s16 = smov (!%p166_p6, %s363_s16), 31  ;;  %v411_v0 = vld [vmem:[%s596_s1] ss:$0 sm:$0xff]  ;;  %v509_v1 = vld [vmem:[%s596_s1 + $0x1] ss:$0 sm:$0xff] }
   0xf   : > { %s364_s17 = sshll.u32 %s609_s10, 5  ;;  %vm251_vm0 = vcmask 64512  }
  0x10   : > { %s169_s18 = sadd.s32 %s364_s17, %s611_s16 }
  0x11   : > { %s365_s21 = sshll.u32 %s169_s18, 3 }
  0x12   : > { %s504_s24 = scalar_lea.vmem %s595_s0, %s365_s21  ;;  %s525_s29 = scalar_lea.vmem %s597_s2, %s365_s21 }
  0x13   : > { %v185_v2 = vld [vmem:[%s504_s24] sm:$0xff]  ;;  %v186_v3 = vld [vmem:[%s504_s24 + $0x8] sm:$0xff]  ;;  %v187_v4 = vld [vmem:[%s504_s24 + $0x10] sm:$0xff] }
  0x14   : > { %v202_v5 = vmul.f32 %v411_v0, %v185_v2  ;;  %v203_v6 = vmul.f32 %v411_v0, %v186_v3  ;;  %v204_v7 = vmul.f32 %v411_v0, %v187_v4  ;;  %v188_v8 = vld [vmem:[%s504_s24 + $0x18] sm:$0xff]  ;;  %v189_v9 = vld [vmem:[%s504_s24 + $0x20] sm:$0xff]  ;;  %v190_v10 = vld [vmem:[%s504_s24 + $0x28] sm:$0xff] }
  0x15   : > { %v205_v11 = vmul.f32 %v411_v0, %v188_v8  ;;  %v206_v12 = vmul.f32 %v411_v0, %v189_v9  ;;  %v207_v13 = vmul.f32 %v411_v0, %v190_v10  ;;  %v191_v14 = vld [vmem:[%s504_s24 + $0x30] sm:$0xff]  ;;  %v192_v15 = vld [vmem:[%s504_s24 + $0x38] sm:$0xff]  ;;  %v193_v24 = vld [vmem:[%s504_s24 + $0x40] sm:$0xff] }
  0x16   : > { %v219_v16 = vadd.f32 %v509_v1, %v202_v5  ;;  %v220_v17 = vadd.f32 %v509_v1, %v203_v6  ;;  %v221_v18 = vadd.f32 %v509_v1, %v204_v7  ;;  %v208_v19 = vmul.f32 %v411_v0, %v191_v14  ;;  %v194_v25 = vld [vmem:[%s504_s24 + $0x48] sm:$0xff]  ;;  %v195_v26 = vld [vmem:[%s504_s24 + $0x50] sm:$0xff]  ;;  %v196_v31 = vld [vmem:[%s504_s24 + $0x58] sm:$0xff] }
  0x17   : > { %v222_v20 = vadd.f32 %v509_v1, %v205_v11  ;;  %v223_v21 = vadd.f32 %v509_v1, %v206_v12  ;;  %v224_v22 = vadd.f32 %v509_v1, %v207_v13  ;;  %v209_v23 = vmul.f32 %v411_v0, %v192_v15  ;;  %v197_v32 = vld [vmem:[%s504_s24 + $0x60] sm:$0xff]  ;;  %v198_v33 = vld [vmem:[%s504_s24 + $0x68] sm:$0xff]  ;;  %v199_v37 = vld [vmem:[%s504_s24 + $0x70] sm:$0xff] }
  0x18   : > { %v235_v27 = vmax.f32 %v219_v16, 0.0  ;;  %v236_v28 = vmax.f32 %v220_v17, 0.0  ;;  %v237_v29 = vmax.f32 %v221_v18, 0.0  ;;  %v225_v30 = vadd.f32 %v509_v1, %v208_v19  ;;  %v200_v42 = vld [vmem:[%s504_s24 + $0x78] sm:$0xff] }
  0x19   : > { %v238_v34 = vmax.f32 %v222_v20, 0.0  ;;  %v239_v35 = vmax.f32 %v223_v21, 0.0  ;;  %v226_v36 = vadd.f32 %v509_v1, %v209_v23  ;;  %v240_v38 = vmax.f32 %v224_v22, 0.0 }
  0x1a   : > { %252 = vst.msk [vmem:[%s525_s29] sm:$0xff] %vm251_vm0, %v235_v27  ;;  %v210_v39 = vmul.f32 %v411_v0, %v193_v24  ;;  %v211_v40 = vmul.f32 %v411_v0, %v194_v25  ;;  %v212_v41 = vmul.f32 %v411_v0, %v195_v26  ;;  %v241_v43 = vmax.f32 %v225_v30, 0.0 }
  0x1b   : > { %253 = vst.msk [vmem:[%s525_s29 + $0x8] sm:$0xff] %vm251_vm0, %v236_v28  ;;  %v213_v44 = vmul.f32 %v411_v0, %v196_v31  ;;  %v214_v45 = vmul.f32 %v411_v0, %v197_v32  ;;  %v215_v46 = vmul.f32 %v411_v0, %v198_v33  ;;  %v216_v50 = vmul.f32 %v411_v0, %v199_v37 }
  0x1c   : > { %254 = vst.msk [vmem:[%s525_s29 + $0x10] sm:$0xff] %vm251_vm0, %v237_v29  ;;  %v227_v47 = vadd.f32 %v509_v1, %v210_v39  ;;  %v228_v48 = vadd.f32 %v509_v1, %v211_v40  ;;  %v229_v49 = vadd.f32 %v509_v1, %v212_v41  ;;  %v242_v51 = vmax.f32 %v226_v36, 0.0 }
  0x1d   : > { %255 = vst.msk [vmem:[%s525_s29 + $0x18] sm:$0xff] %vm251_vm0, %v238_v34  ;;  %v230_v52 = vadd.f32 %v509_v1, %v213_v44  ;;  %v217_v53 = vmul.f32 %v411_v0, %v200_v42  ;;  %v231_v55 = vadd.f32 %v509_v1, %v214_v45  ;;  %v232_v57 = vadd.f32 %v509_v1, %v215_v46 }
  0x1e   : > { %256 = vst.msk [vmem:[%s525_s29 + $0x20] sm:$0xff] %vm251_vm0, %v239_v35  ;;  %v243_v54 = vmax.f32 %v227_v47, 0.0  ;;  %v244_v56 = vmax.f32 %v228_v48, 0.0  ;;  %v245_v58 = vmax.f32 %v229_v49, 0.0  ;;  %v233_v59 = vadd.f32 %v509_v1, %v216_v50 }
  0x1f   : > { %257 = vst.msk [vmem:[%s525_s29 + $0x28] sm:$0xff] %vm251_vm0, %v240_v38  ;;  %v246_v60 = vmax.f32 %v230_v52, 0.0  ;;  %v234_v61 = vadd.f32 %v509_v1, %v217_v53  ;;  %v247_v62 = vmax.f32 %v231_v55, 0.0  ;;  %v248_v63 = vmax.f32 %v232_v57, 0.0 }
  0x20   : > { %258 = vst.msk [vmem:[%s525_s29 + $0x30] sm:$0xff] %vm251_vm0, %v241_v43  ;;  %v249_v0 = vmax.f32 %v233_v59, 0.0 }
  0x21   : > { %259 = vst.msk [vmem:[%s525_s29 + $0x38] sm:$0xff] %vm251_vm0, %v242_v51  ;;  %v250_v2 = vmax.f32 %v234_v61, 0.0 }
  0x22   : > { %260 = vst.msk [vmem:[%s525_s29 + $0x40] sm:$0xff] %vm251_vm0, %v243_v54 }
  0x23   : > { %261 = vst.msk [vmem:[%s525_s29 + $0x48] sm:$0xff] %vm251_vm0, %v244_v56 }
  0x24   : > { %262 = vst.msk [vmem:[%s525_s29 + $0x50] sm:$0xff] %vm251_vm0, %v245_v58 }
  0x25   : > { %263 = vst.msk [vmem:[%s525_s29 + $0x58] sm:$0xff] %vm251_vm0, %v246_v60 }
  0x26   : > { %264 = vst.msk [vmem:[%s525_s29 + $0x60] sm:$0xff] %vm251_vm0, %v247_v62 }
  0x27   : > { %265 = vst.msk [vmem:[%s525_s29 + $0x68] sm:$0xff] %vm251_vm0, %v248_v63 }
  0x28   : > { %266 = vst.msk [vmem:[%s525_s29 + $0x70] sm:$0xff] %vm251_vm0, %v249_v0 }
  0x29   : > { %267 = vst.msk [vmem:[%s525_s29 + $0x78] sm:$0xff] %vm251_vm0, %v250_v2 }
  0x2a PF: > { %s12_s13 = sadd.s32 1, %s451_s13   ;;  %s598_s9 = smov %s443_s11 }
  0x2b   : > { %p9_p7 = scmp.ge.s32.totalorder %s12_s13, 6   ;;  %s599_s10 = smov %s447_s12 }
  0x2c   : > { %s600_s11 = smov %s603_s14  ;;  %s601_s12 = smov %s607_s15 }
  0x2d   :  { %11 = sbr.rel (!%p9_p7) target bundleno = 3 (0x3), region = 58 }

// kernel: double_conv.3
= control target key start
LH: loop header
LB: loop body
LE: loop exit
PB: predicated region body
PF: predicated region fallthrough
CT: control target
= control target key end

     0   :  { %s1892_s12 = smov 0   ;;  %s1894_s13 = smov 0   ;;  %s2686_s0 = inlined_call_operand.vmem [shape: bf16[2,256,4], index: 0, kind: input, shape index: {}]   ;;  %s2687_s1 = inlined_call_operand.vmem [shape: bf16[36,8], index: 1, kind: input, shape index: {}]   ;;  %s2688_s2 = inlined_call_operand.vmem [shape: f32[2,256,8], index: 2, kind: output, shape index: {0}]   ;;  %s2689_s3 = inlined_call_operand.vmem [shape: f32[2,2,2,8], index: 3, kind: output, shape index: {1}]  }
   0x1   :  { %s1896_s14 = smov 0   ;;  %s1898_s15 = smov 0  }
   0x2   :  { %s1900_s16 = smov 0  }
   0x3 LB: > { %s23_s17 = sadd.s32 1, %s1853_s14  ;;  %s26_s18 = sadd.s32 1, %s1857_s15  ;;  %s1861_s16 = sphi %s1900_s16, %s14_s16   ;;  %s1857_s15 = sphi %s1898_s15, %s2693_s15   ;;  %s1853_s14 = sphi %s1896_s14, %s2692_s14   ;;  %s1849_s13 = sphi %s1894_s13, %s2691_s13   ;;  %s1845_s12 = sphi %s1892_s12, %s2690_s12  }
   0x4   : > { %p24_p0 = scmp.ge.s32.totalorder %s23_s17, 2  ;;  %p1554_p1 = scmp.ge.s32.totalorder %s1861_s16, 1 }
   0x5   : > { %p156_p2 = scmp.lt.s32.totalorder %s1861_s16, 5 }
   0x6   : > { %s2695_s17 = smov (%p24_p0, %s23_s17), 0  ;;  %s2697_s18 = smov (!%p24_p0, %s26_s18), %s1857_s15 }
   0x7   : > { %p157_p3 = pnand %p1554_p1, %p156_p2  ;;  %p28_p4 = scmp.ge.s32.totalorder %s2697_s18, 2 }
   0x8   : > { %p192_p5 = scmp.lt.s32.totalorder (!%p157_p3), %s1849_s13, 1  ;;  %s1557_s19 = sshll.u32 (!%p157_p3), %s1845_s12, 4 }
   0x9   : > { %s2699_s18 = smov (%p28_p4, %s2697_s18), 0  ;;  %160 = sbr.rel (%p157_p3) target bundleno = 723 (0x2d3), region = 28 }
   0xa   : > { %p200_p6 = scmp.lt.s32.totalorder (!%p157_p3), %s1557_s19, 31  ;;  %p209_p7 = scmp.lt.s32.totalorder (!%p157_p3), %s1845_s12, 1 }
   0xb   : > { %p1562_p8 = scmp.ne.s32.totalorder (!%p157_p3), %s1845_s12, 0 }
   0xe   : > { %s2701_s13 = smov (!%p192_p5, %s1849_s13), 1  ;;  %s2703_s19 = smov (!%p200_p6, %s1557_s19), 31 }
   0xf   : > { %s1683_s20 = sshll.u32 %s2701_s13, 7  ;;  %s1558_s21 = sshll.u32 %s2701_s13, 5 }
  0x10   : > { %s1929_s24 = scalar_lea.vmem %s2686_s0, %s1683_s20  ;;  %s203_s25 = sadd.s32 %s1558_s21, %s2703_s19 }
  0x11   : > { %s1559_s26 = sshll.u32 %s203_s25, 3  ;;  %s1560_s30 = sshll.u32 %s2701_s13, 1 }
  0x12   : > { %s1934_s29 = scalar_lea.vmem %s2688_s2, %s1559_s26 }
  0x13   : > { %s210_s4 = scalar_select %p209_p7, %s1845_s12, 1 }
  0x14   : > { %219 = sbr.rel (%p1562_p8) target bundleno = 96 (0x60), region = 32 }
  0x15   : > { %s212_s5 = sadd.s32 %s1560_s30, %s210_s4 }
  0x16   : > { %s1561_s6 = sshll.u32 %s212_s5, 1 }
  0x17   : > { %s1940_s9 = scalar_lea.vmem %s2689_s3, %s1561_s6 }
  0x19   : > { %vm220_vm0 = vcmask 31744   ;;  %v1863_v0 = vmov 0.0   ;;  %vm223_vm1 = vcmask 25600   ;;  %vm230_vm2 = vcmask 24576   ;;  %v1687_v1 = vld [vmem:[%s1929_s24] sm:$0xff]   ;;  %v1750_v2 = vld [vmem:[%s1929_s24 + $0x8] sm:$0xff]  }
  0x1a   : > { %221 = vst.msk [vmem:[#allocation2] sm:$0xff] %vm220_vm0, %v1863_v0  ;;  %v1688_v3 = vunpack.c.l.bf16 %v1687_v1  ;;  %v1689_v4 = vunpack.c.h.bf16 %v1687_v1  ;;  %v1751_v5 = vld [vmem:[%s1929_s24 + $0x10] sm:$0xff]   ;;  %v1692_v6 = vunpack.c.l.bf16 %v1750_v2  ;;  %v1693_v7 = vunpack.c.h.bf16 %v1750_v2  ;;  %v1752_v8 = vld [vmem:[%s1929_s24 + $0x18] sm:$0xff]   ;;  %v1753_v11 = vld [vmem:[%s1929_s24 + $0x20] sm:$0xff]  }
  0x1b   : > { %222 = vst.msk [vmem:[#allocation2 + $0x8] sm:$0xff] %vm220_vm0, %v1863_v0  ;;  %v1696_v9 = vunpack.c.l.bf16 %v1751_v5  ;;  %v1697_v10 = vunpack.c.h.bf16 %v1751_v5  ;;  %v1700_v12 = vunpack.c.l.bf16 %v1752_v8  ;;  %v1701_v13 = vunpack.c.h.bf16 %v1752_v8  ;;  %v1754_v14 = vld [vmem:[%s1929_s24 + $0x28] sm:$0xff]   ;;  %v1755_v17 = vld [vmem:[%s1929_s24 + $0x30] sm:$0xff]   ;;  %v1756_v20 = vld [vmem:[%s1929_s24 + $0x38] sm:$0xff]  }
  0x1c   : > { %226 = vst.msk [vmem:[#allocation2 + $0x198] sm:$0xff] %vm220_vm0, %v1863_v0  ;;  %v1704_v15 = vunpack.c.l.bf16 %v1753_v11  ;;  %v1705_v16 = vunpack.c.h.bf16 %v1753_v11  ;;  %v1708_v18 = vunpack.c.l.bf16 %v1754_v14  ;;  %v1709_v19 = vunpack.c.h.bf16 %v1754_v14  ;;  %v1757_v23 = vld [vmem:[%s1929_s24 + $0x40] sm:$0xff]   ;;  %v1758_v26 = vld [vmem:[%s1929_s24 + $0x48] sm:$0xff]   ;;  %v1759_v29 = vld [vmem:[%s1929_s24 + $0x50] sm:$0xff]  }
  0x1d   : > { %227 = vst.msk [vmem:[#allocation2 + $0x1a0] sm:$0xff] %vm220_vm0, %v1863_v0  ;;  %v1712_v21 = vunpack.c.l.bf16 %v1755_v17  ;;  %v1713_v22 = vunpack.c.h.bf16 %v1755_v17  ;;  %v1716_v24 = vunpack.c.l.bf16 %v1756_v20  ;;  %v1717_v25 = vunpack.c.h.bf16 %v1756_v20  ;;  %v1760_v32 = vld [vmem:[%s1929_s24 + $0x58] sm:$0xff]   ;;  %v1761_v35 = vld [vmem:[%s1929_s24 + $0x60] sm:$0xff]   ;;  %v1762_v38 = vld [vmem:[%s1929_s24 + $0x68] sm:$0xff]  }
  0x1e   : > { %224 = vst.msk [vmem:[#allocation2 + $0x10] sm:$0x3] %vm223_vm1, %v1863_v0  ;;  %v1720_v27 = vunpack.c.l.bf16 %v1757_v23  ;;  %v1721_v28 = vunpack.c.h.bf16 %v1757_v23  ;;  %v1724_v30 = vunpack.c.l.bf16 %v1758_v26  ;;  %v1725_v31 = vunpack.c.h.bf16 %v1758_v26  ;;  %v1763_v41 = vld [vmem:[%s1929_s24 + $0x70] sm:$0xff]   ;;  %v1764_v44 = vld [vmem:[%s1929_s24 + $0x78] sm:$0xff]  }
  0x1f   : > { %228 = vst.msk [vmem:[#allocation2 + $0x1a8] sm:$0x3] %vm223_vm1, %v1863_v0  ;;  %v1728_v33 = vunpack.c.l.bf16 %v1759_v29  ;;  %v1729_v34 = vunpack.c.h.bf16 %v1759_v29  ;;  %v1732_v36 = vunpack.c.l.bf16 %v1760_v32  ;;  %v1733_v37 = vunpack.c.h.bf16 %v1760_v32 }
  0x20   : > { %231 = vst.msk [vmem:[#allocation2 + $0x18] sm:$0x1] %vm230_vm2, %v1863_v0  ;;  %v1736_v39 = vunpack.c.l.bf16 %v1761_v35  ;;  %v1737_v40 = vunpack.c.h.bf16 %v1761_v35  ;;  %v1740_v42 = vunpack.c.l.bf16 %v1762_v38  ;;  %v1741_v43 = vunpack.c.h.bf16 %v1762_v38 }
  0x21   : > { %232 = vst.msk [vmem:[#allocation2 + $0x30] sm:$0x1] %vm230_vm2, %v1863_v0  ;;  %v1744_v45 = vunpack.c.l.bf16 %v1763_v41  ;;  %v1745_v46 = vunpack.c.h.bf16 %v1763_v41  ;;  %v1748_v47 = vunpack.c.l.bf16 %v1764_v44  ;;  %v1749_v48 = vunpack.c.h.bf16 %v1764_v44 }
  0x22   : > { %233 = vst.msk [vmem:[#allocation2 + $0x48] sm:$0x1] %vm230_vm2, %v1863_v0 }
  0x23   : > { %234 = vst.msk [vmem:[#allocation2 + $0x60] sm:$0x1] %vm230_vm2, %v1863_v0 }
  0x24   : > { %235 = vst.msk [vmem:[#allocation2 + $0x78] sm:$0x1] %vm230_vm2, %v1863_v0 }
  0x25   : > { %236 = vst.msk [vmem:[#allocation2 + $0x90] sm:$0x1] %vm230_vm2, %v1863_v0 }
  0x26   : > { %237 = vst.msk [vmem:[#allocation2 + $0xa8] sm:$0x1] %vm230_vm2, %v1863_v0 }
  0x27   : > { %238 = vst.msk [vmem:[#allocation2 + $0xc0] sm:$0x1] %vm230_vm2, %v1863_v0 }
  0x28   : > { %239 = vst.msk [vmem:[#allocation2 + $0xd8] sm:$0x1] %vm230_vm2, %v1863_v0 }
  0x29   : > { %240 = vst.msk [vmem:[#allocation2 + $0xf0] sm:$0x1] %vm230_vm2, %v1863_v0 }
  0x2a   : > { %241 = vst.msk [vmem:[#allocation2 + $0x108] sm:$0x1] %vm230_vm2, %v1863_v0 }
  0x2b   : > { %242 = vst.msk [vmem:[#allocation2 + $0x120] sm:$0x1] %vm230_vm2, %v1863_v0 }
  0x2c   : > { %243 = vst.msk [vmem:[#allocation2 + $0x138] sm:$0x1] %vm230_vm2, %v1863_v0 }
  0x2d   : > { %244 = vst.msk [vmem:[#allocation2 + $0x150] sm:$0x1] %vm230_vm2, %v1863_v0 }
  0x2e   : > { %245 = vst.msk [vmem:[#allocation2 + $0x168] sm:$0x1] %vm230_vm2, %v1863_v0 }
  0x2f   : > { %246 = vst.msk [vmem:[#allocation2 + $0x180] sm:$0x1] %vm230_vm2, %v1863_v0 }
  0x30   : > { %247 = vst.msk [vmem:[#allocation2 + $0x29] sm:$0x1] %vm230_vm2, %v1863_v0 }
  0x31   : > { %248 = vst.msk [vmem:[#allocation2 + $0x41] sm:$0x1] %vm230_vm2, %v1863_v0 }
  0x32   : > { %249 = vst.msk [vmem:[#allocation2 + $0x59] sm:$0x1] %vm230_vm2, %v1863_v0 }
  0x33   : > { %250 = vst.msk [vmem:[#allocation2 + $0x71] sm:$0x1] %vm230_vm2, %v1863_v0 }
  0x34   : > { %251 = vst.msk [vmem:[#allocation2 + $0x89] sm:$0x1] %vm230_vm2, %v1863_v0 }
  0x35   : > { %252 = vst.msk [vmem:[#allocation2 + $0xa1] sm:$0x1] %vm230_vm2, %v1863_v0 }
  0x36   : > { %253 = vst.msk [vmem:[#allocation2 + $0xb9] sm:$0x1] %vm230_vm2, %v1863_v0 }
  0x37   : > { %254 = vst.msk [vmem:[#allocation2 + $0xd1] sm:$0x1] %vm230_vm2, %v1863_v0 }
  0x38   : > { %255 = vst.msk [vmem:[#allocation2 + $0xe9] sm:$0x1] %vm230_vm2, %v1863_v0 }
  0x39   : > { %256 = vst.msk [vmem:[#allocation2 + $0x101] sm:$0x1] %vm230_vm2, %v1863_v0 }
  0x3a   : > { %257 = vst.msk [vmem:[#allocation2 + $0x119] sm:$0x1] %vm230_vm2, %v1863_v0 }
  0x3b   : > { %258 = vst.msk [vmem:[#allocation2 + $0x131] sm:$0x1] %vm230_vm2, %v1863_v0 }
  0x3c   : > { %259 = vst.msk [vmem:[#allocation2 + $0x149] sm:$0x1] %vm230_vm2, %v1863_v0 }
  0x3d   : > { %260 = vst.msk [vmem:[#allocation2 + $0x161] sm:$0x1] %vm230_vm2, %v1863_v0 }
  0x3e   : > { %261 = vst.msk [vmem:[#allocation2 + $0x179] sm:$0x1] %vm230_vm2, %v1863_v0 }
  0x3f   : > { %262 = vst.msk [vmem:[#allocation2 + $0x191] sm:$0x1] %vm230_vm2, %v1863_v0 }
  0x40   : > { %327 = vst.msk [vmem:[#allocation2 + $0x19] sm:$0xff] %vm220_vm0, %v1688_v3 }
  0x41   : > { %328 = vst.msk [vmem:[#allocation2 + $0x21] sm:$0xff] %vm220_vm0, %v1689_v4 }
  0x42   : > { %329 = vst.msk [vmem:[#allocation2 + $0x31] sm:$0xff] %vm220_vm0, %v1692_v6 }
  0x43   : > { %330 = vst.msk [vmem:[#allocation2 + $0x39] sm:$0xff] %vm220_vm0, %v1693_v7 }
  0x44   : > { %331 = vst.msk [vmem:[#allocation2 + $0x49] sm:$0xff] %vm220_vm0, %v1696_v9 }
  0x45   : > { %332 = vst.msk [vmem:[#allocation2 + $0x51] sm:$0xff] %vm220_vm0, %v1697_v10 }
  0x46   : > { %333 = vst.msk [vmem:[#allocation2 + $0x61] sm:$0xff] %vm220_vm0, %v1700_v12 }
  0x47   : > { %334 = vst.msk [vmem:[#allocation2 + $0x69] sm:$0xff] %vm220_vm0, %v1701_v13 }
  0x48   : > { %335 = vst.msk [vmem:[#allocation2 + $0x79] sm:$0xff] %vm220_vm0, %v1704_v15 }
  0x49   : > { %336 = vst.msk [vmem:[#allocation2 + $0x81] sm:$0xff] %vm220_vm0, %v1705_v16 }
  0x4a   : > { %337 = vst.msk [vmem:[#allocation2 + $0x91] sm:$0xff] %vm220_vm0, %v1708_v18 }
  0x4b   : > { %338 = vst.msk [vmem:[#allocation2 + $0x99] sm:$0xff] %vm220_vm0, %v1709_v19 }
  0x4c   : > { %339 = vst.msk [vmem:[#allocation2 + $0xa9] sm:$0xff] %vm220_vm0, %v1712_v21 }
  0x4d   : > { %340 = vst.msk [vmem:[#allocation2 + $0xb1] sm:$0xff] %vm220_vm0, %v1713_v22 }
  0x4e   : > { %341 = vst.msk [vmem:[#allocation2 + $0xc1] sm:$0xff] %vm220_vm0, %v1716_v24 }
  0x4f   : > { %342 = vst.msk [vmem:[#allocation2 + $0xc9] sm:$0xff] %vm220_vm0, %v1717_v25 }
  0x50   : > { %343 = vst.msk [vmem:[#allocation2 + $0xd9] sm:$0xff] %vm220_vm0, %v1720_v27 }
  0x51   : > { %344 = vst.msk [vmem:[#allocation2 + $0xe1] sm:$0xff] %vm220_vm0, %v1721_v28 }
  0x52   : > { %345 = vst.msk [vmem:[#allocation2 + $0xf1] sm:$0xff] %vm220_vm0, %v1724_v30 }
  0x53   : > { %346 = vst.msk [vmem:[#allocation2 + $0xf9] sm:$0xff] %vm220_vm0, %v1725_v31 }
  0x54   : > { %347 = vst.msk [vmem:[#allocation2 + $0x109] sm:$0xff] %vm220_vm0, %v1728_v33 }
  0x55   : > { %348 = vst.msk [vmem:[#allocation2 + $0x111] sm:$0xff] %vm220_vm0, %v1729_v34 }
  0x56   : > { %349 = vst.msk [vmem:[#allocation2 + $0x121] sm:$0xff] %vm220_vm0, %v1732_v36 }
  0x57   : > { %350 = vst.msk [vmem:[#allocation2 + $0x129] sm:$0xff] %vm220_vm0, %v1733_v37 }
  0x58   : > { %351 = vst.msk [vmem:[#allocation2 + $0x139] sm:$0xff] %vm220_vm0, %v1736_v39 }
  0x59   : > { %352 = vst.msk [vmem:[#allocation2 + $0x141] sm:$0xff] %vm220_vm0, %v1737_v40 }
  0x5a   : > { %353 = vst.msk [vmem:[#allocation2 + $0x151] sm:$0xff] %vm220_vm0, %v1740_v42 }
  0x5b   : > { %354 = vst.msk [vmem:[#allocation2 + $0x159] sm:$0xff] %vm220_vm0, %v1741_v43 }
  0x5c   : > { %355 = vst.msk [vmem:[#allocation2 + $0x169] sm:$0xff] %vm220_vm0, %v1744_v45 }
  0x5d   : > { %356 = vst.msk [vmem:[#allocation2 + $0x171] sm:$0xff] %vm220_vm0, %v1745_v46 }
  0x5e   : > { %357 = vst.msk [vmem:[#allocation2 + $0x181] sm:$0xff] %vm220_vm0, %v1748_v47 }
  0x5f   : > { %358 = vst.msk [vmem:[#allocation2 + $0x189] sm:$0xff] %vm220_vm0, %v1749_v48 }
  0x60 PF: > { %s1564_s10 = smul.u32 192, %s1845_s12  ;;  %s1864_s13 = smov 4   ;;  %vm378_vm3 = vcmask 31744   ;;  %vm475_vm4 = vcmask 64544   ;;  %vm572_vm5 = vcmask 97344   ;;  %vm672_vm6 = vcmask 130144  }
  0x61   : > { %s1865_s12 = smov 8   ;;  %s1866_s19 = smov 12   ;;  %vm769_vm7 = vcmask 162944   ;;  %vm1246_vm8 = vcmask 1041408   ;;  %vm866_vm9 = vcmask 195744   ;;  %vm966_vm10 = vcmask 228544  }
  0x62   : > { %s2028_s11 = scalar_lea.vmem [#allocation2], %s1564_s10  ;;  %s1867_s20 = smov 16   ;;  %vm1063_vm11 = vcmask 261344   ;;  %vm1160_vm12 = vcmask 294144   ;;  %vm1221_vm13 = vcmask 293888   ;;  %vm1299_vm14 = vcmask 64512  }
  0x63   : > { %s1868_s21 = smov 20   ;;  %s1869_s22 = smov 24   ;;  %vm1337_vm15 = vcmask 57344  }
  0x64   : > { %s1870_s23 = smov 28   ;;  %s1871_s24 = smov 32  }
  0x66   : > { %v2031_v49 = vld [vmem:[%s2028_s11 + $0x19] sm:$0xff]  ;;  %v395_v50 = vld [vmem:[%s2028_s11 + $0x1] sm:$0xff]  ;;  %v2038_v51 = vld [vmem:[%s2028_s11 + $0x31] sm:$0xff] }
  0x67   : > { %431 = vrot.lane.b32.xlu1 %v2031_v49, %s1864_s13  ;;  %427 = vrot.lane.b32.xlu0 %v395_v50, %s1864_s13  ;;  %v2043_v52 = vld [vmem:[%s2028_s11 + $0x21] sm:$0xff]  ;;  %v396_v53 = vld [vmem:[%s2028_s11 + $0x9] sm:$0xff] }
  0x68   : > { %435 = vrot.lane.b32.xlu2 %v2038_v51, %s1864_s13  ;;  %v2047_v54 = vld [vmem:[%s2028_s11 + $0x39] sm:$0xff]  ;;  %v2055_v55 = vld [vmem:[%s2028_s11 + $0x51] sm:$0xff]  ;;  %v2058_v56 = vld [vmem:[%s2028_s11 + $0x49] sm:$0xff] }
  0x69   : > { %v2061_v57 = vld [vmem:[%s2028_s11 + $0x61] sm:$0xff]  ;;  %v2070_v58 = vld [vmem:[%s2028_s11 + $0x79] sm:$0xff]  ;;  %v2073_v59 = vld [vmem:[%s2028_s11 + $0x69] sm:$0xff] }
  0x6a   : > { %v2076_v60 = vld [vmem:[%s2028_s11 + $0x81] sm:$0xff]  ;;  %v2085_v61 = vld [vmem:[%s2028_s11 + $0x99] sm:$0xff]  ;;  %v2088_v62 = vld [vmem:[%s2028_s11 + $0x91] sm:$0xff] }
  0x6b   : > { %v2091_v63 = vld [vmem:[%s2028_s11 + $0xa9] sm:$0xff]  ;;  %v2101_v1 = vld [vmem:[%s2028_s11 + $0xb1] sm:$0xff]  ;;  %v2112_v4 = vld [vmem:[%s2028_s11 + $0x1a] sm:$0xff] }
  0x6c   : > { %v492_v0 = vld [vmem:[%s2028_s11 + $0x2] sm:$0xff]  ;;  %v493_v2 = vld [vmem:[%s2028_s11 + $0xa] sm:$0xff]  ;;  %v2115_v5 = vld [vmem:[%s2028_s11 + $0x32] sm:$0xff] }
  0x6d   : > { %v2109_v3 = vld [vmem:[%s2028_s11 + $0x22] sm:$0xff]  ;;  %v2124_v6 = vld [vmem:[%s2028_s11 + $0x4a] sm:$0xff]  ;;  %v2127_v7 = vld [vmem:[%s2028_s11 + $0x3a] sm:$0xff] }
  0x6e   : > { %v2130_v8 = vld [vmem:[%s2028_s11 + $0x52] sm:$0xff]  ;;  %v2139_v9 = vld [vmem:[%s2028_s11 + $0x6a] sm:$0xff]  ;;  %v2142_v10 = vld [vmem:[%s2028_s11 + $0x62] sm:$0xff] }
  0x6f   : > { %433 = vrot.lane.b32.xlu1 %v2043_v52, %s1864_s13  ;;  %429 = vrot.lane.b32.xlu0 %v396_v53, %s1864_s13  ;;  %v2145_v11 = vld [vmem:[%s2028_s11 + $0x7a] sm:$0xff]  ;;  %v2154_v12 = vld [vmem:[%s2028_s11 + $0x92] sm:$0xff] }
  0x70   : > { %437 = vrot.lane.b32.xlu2 %v2047_v54, %s1864_s13  ;;  %v2157_v13 = vld [vmem:[%s2028_s11 + $0x82] sm:$0xff]  ;;  %v2160_v14 = vld [vmem:[%s2028_s11 + $0x9a] sm:$0xff]  ;;  %v2169_v15 = vld [vmem:[%s2028_s11 + $0xb2] sm:$0xff] }
  0x71   : > { %v2172_v16 = vld [vmem:[%s2028_s11 + $0xaa] sm:$0xff]  ;;  %v1567_v17 = vld [vmem:[%s2028_s11 + $0x18] sm:$0xff]  ;;  %v362_v19 = vld [vmem:[%s2028_s11] sm:$0xff] }
  0x72   : > { %v2180_v18 = vld [vmem:[%s2028_s11 + $0x30] sm:$0xff]  ;;  %381 = vst.msk [vmem:[#allocation3 + $0x10] sm:$0xff] %vm378_vm3, %v1567_v17  ;;  %v2188_v20 = vld [vmem:[%s2028_s11 + $0x38] sm:$0xff]  ;;  %v1568_v21 = vld [vmem:[%s2028_s11 + $0x20] sm:$0xff] }
  0x73   : > { %383 = vst.msk [vmem:[#allocation3 + $0x20] sm:$0xff] %vm378_vm3, %v2180_v18  ;;  %v2195_v22 = vld [vmem:[%s2028_s11 + $0x60] sm:$0xff]  ;;  %v2199_v23 = vld [vmem:[%s2028_s11 + $0x50] sm:$0xff]  ;;  %v2204_v24 = vld [vmem:[%s2028_s11 + $0x48] sm:$0xff] }
  0x74   : > { %379 = vst.msk [vmem:[#allocation3] sm:$0xff] %vm378_vm3, %v362_v19  ;;  %v2212_v25 = vld [vmem:[%s2028_s11 + $0x78] sm:$0xff]  ;;  %v2217_v26 = vld [vmem:[%s2028_s11 + $0x68] sm:$0xff]  ;;  %v2234_v30 = vld [vmem:[%s2028_s11 + $0x80] sm:$0xff] }
  0x75   : > { %384 = vst.msk [vmem:[#allocation3 + $0x28] sm:$0xff] %vm378_vm3, %v2188_v20  ;;  %v363_v27 = vld [vmem:[%s2028_s11 + $0x8] sm:$0xff]  ;;  %v2227_v28 = vld [vmem:[%s2028_s11 + $0x98] sm:$0xff]  ;;  %v2237_v31 = vld [vmem:[%s2028_s11 + $0x90] sm:$0xff] }
  0x76   : > { %382 = vst.msk [vmem:[#allocation3 + $0x18] sm:$0xff] %vm378_vm3, %v1568_v21  ;;  %v2242_v32 = vld [vmem:[%s2028_s11 + $0xb0] sm:$0xff]  ;;  %v2256_v34 = vld [vmem:[%s2028_s11 + $0xa8] sm:$0xff]  ;;  %v2276_v39 = vld [vmem:[%s2028_s11 + $0xc0] sm:$0xff] }
  0x77   : > { %441 = vrot.lane.b32.xlu1 %v2055_v55, %s1864_s13  ;;  %439 = vrot.lane.b32.xlu0 %v2058_v56, %s1864_s13  ;;  %387 = vst.msk [vmem:[#allocation3 + $0x40] sm:$0xff] %vm378_vm3, %v2195_v22 }
  0x78   : > { %443 = vrot.lane.b32.xlu2 %v2061_v57, %s1864_s13  ;;  %386 = vst.msk [vmem:[#allocation3 + $0x38] sm:$0xff] %vm378_vm3, %v2199_v23 }
  0x79   : > { %385 = vst.msk [vmem:[#allocation3 + $0x30] sm:$0xff] %vm378_vm3, %v2204_v24 }
  0x7a   : > { %389 = vst.msk [vmem:[#allocation3 + $0x50] sm:$0xff] %vm378_vm3, %v2212_v25 }
  0x7b   : > { %388 = vst.msk [vmem:[#allocation3 + $0x48] sm:$0xff] %vm378_vm3, %v2217_v26 }
  0x7c   : > { %380 = vst.msk [vmem:[#allocation3 + $0x8] sm:$0xff] %vm378_vm3, %v363_v27 }
  0x7d   : > { %392 = vst.msk [vmem:[#allocation3 + $0x68] sm:$0xff] %vm378_vm3, %v2227_v28 }
  0x7e   : > { %390 = vst.msk [vmem:[#allocation3 + $0x58] sm:$0xff] %vm378_vm3, %v2234_v30 }
  0x7f   : > { %447 = vrot.lane.b32.xlu1 %v2070_v58, %s1864_s13  ;;  %445 = vrot.lane.b32.xlu0 %v2073_v59, %s1864_s13  ;;  %391 = vst.msk [vmem:[#allocation3 + $0x60] sm:$0xff] %vm378_vm3, %v2237_v31 }
  0x80   : > { %449 = vrot.lane.b32.xlu2 %v2076_v60, %s1864_s13  ;;  %394 = vst.msk [vmem:[#allocation3 + $0x78] sm:$0xff] %vm378_vm3, %v2242_v32 }
  0x81   : > { %393 = vst.msk [vmem:[#allocation3 + $0x70] sm:$0xff] %vm378_vm3, %v2256_v34 }
  0x87   : > { %453 = vrot.lane.b32.xlu1 %v2085_v61, %s1864_s13  ;;  %451 = vrot.lane.b32.xlu0 %v2088_v62, %s1864_s13 }
  0x88   : > { %455 = vrot.lane.b32.xlu2 %v2091_v63, %s1864_s13 }
  0x8f   : > { %524 = vrot.lane.b32.xlu1 %v492_v0, %s1865_s12  ;;  %457 = vrot.lane.b32.xlu0 %v2101_v1, %s1864_s13 }
  0x90   : > { %526 = vrot.lane.b32.xlu2 %v493_v2, %s1865_s12 }
  0x97   : > { %530 = vrot.lane.b32.xlu1 %v2109_v3, %s1865_s12  ;;  %528 = vrot.lane.b32.xlu0 %v2112_v4, %s1865_s12 }
  0x98   : > { %532 = vrot.lane.b32.xlu2 %v2115_v5, %s1865_s12 }
  0x9f   : > { %536 = vrot.lane.b32.xlu1 %v2124_v6, %s1865_s12  ;;  %534 = vrot.lane.b32.xlu0 %v2127_v7, %s1865_s12 }
  0xa0   : > { %538 = vrot.lane.b32.xlu2 %v2130_v8, %s1865_s12 }
  0xa7   : > { %542 = vrot.lane.b32.xlu1 %v2139_v9, %s1865_s12  ;;  %540 = vrot.lane.b32.xlu0 %v2142_v10, %s1865_s12 }
  0xa8   : > { %544 = vrot.lane.b32.xlu2 %v2145_v11, %s1865_s12 }
  0xaf   : > { %548 = vrot.lane.b32.xlu1 %v2154_v12, %s1865_s12  ;;  %546 = vrot.lane.b32.xlu0 %v2157_v13, %s1865_s12 }
  0xb0   : > { %550 = vrot.lane.b32.xlu2 %v2160_v14, %s1865_s12 }
  0xb7   : > { %554 = vrot.lane.b32.xlu1 %v2169_v15, %s1865_s12  ;;  %552 = vrot.lane.b32.xlu0 %v2172_v16, %s1865_s12 }
  0xb8   : > { %624 = vrot.lane.b32.xlu2 %v1567_v17, %s1866_s19 }
  0xbf   : > { %628 = vrot.lane.b32.xlu1 %v2180_v18, %s1866_s19  ;;  %626 = vrot.lane.b32.xlu0 %v1568_v21, %s1866_s19 }
  0xc0   : > { %630 = vrot.lane.b32.xlu2 %v2188_v20, %s1866_s19 }
  0xc2   : > { %v436_v29 = vpop.permute.xlu2 %435 }
  0xc3   : > { %480 = vst.msk [vmem:[#allocation3 + $0x20] sm:$0xff] %vm475_vm4, %v436_v29 }
  0xc7   : > { %634 = vrot.lane.b32.xlu1 %v2199_v23, %s1866_s19  ;;  %632 = vrot.lane.b32.xlu0 %v2204_v24, %s1866_s19 }
  0xc8   : > { %636 = vrot.lane.b32.xlu2 %v2195_v22, %s1866_s19 }
  0xca   : > { %v438_v33 = vpop.permute.xlu2 %437 }
  0xcb   : > { %481 = vst.msk [vmem:[#allocation3 + $0x28] sm:$0xff] %vm475_vm4, %v438_v33 }
  0xcf   : > { %640 = vrot.lane.b32.xlu1 %v2212_v25, %s1866_s19  ;;  %638 = vrot.lane.b32.xlu0 %v2217_v26, %s1866_s19 }
  0xd0   : > { %642 = vrot.lane.b32.xlu2 %v2234_v30, %s1866_s19 }
  0xd2   : > { %v444_v35 = vpop.permute.xlu2 %443 }
  0xd3   : > { %484 = vst.msk [vmem:[#allocation3 + $0x40] sm:$0xff] %vm475_vm4, %v444_v35 }
  0xd7   : > { %646 = vrot.lane.b32.xlu1 %v2227_v28, %s1866_s19  ;;  %644 = vrot.lane.b32.xlu0 %v2237_v31, %s1866_s19 }
  0xd8   : > { %648 = vrot.lane.b32.xlu2 %v2256_v34, %s1866_s19 }
  0xd9   : > { %v432_v36 = vpop.permute.xlu1 %431  ;;  %v428_v37 = vpop.permute.xlu0 %427 }
  0xda   : > { %478 = vst.msk [vmem:[#allocation3 + $0x10] sm:$0xff] %vm475_vm4, %v432_v36  ;;  %v450_v38 = vpop.permute.xlu2 %449 }
  0xdb   : > { %476 = vst.msk [vmem:[#allocation3] sm:$0xff] %vm475_vm4, %v428_v37 }
  0xdc   : > { %487 = vst.msk [vmem:[#allocation3 + $0x58] sm:$0xff] %vm475_vm4, %v450_v38 }
  0xdf   : > { %652 = vrot.lane.b32.xlu1 %v2276_v39, %s1866_s19  ;;  %650 = vrot.lane.b32.xlu0 %v2242_v32, %s1866_s19 }
  0xe0   : > { %721 = vrot.lane.b32.xlu2 %v2031_v49, %s1867_s20 }
  0xe1   : > { %v434_v40 = vpop.permute.xlu1 %433  ;;  %v430_v41 = vpop.permute.xlu0 %429 }
  0xe2   : > { %479 = vst.msk [vmem:[#allocation3 + $0x18] sm:$0xff] %vm475_vm4, %v434_v40  ;;  %v456_v42 = vpop.permute.xlu2 %455 }
  0xe3   : > { %477 = vst.msk [vmem:[#allocation3 + $0x8] sm:$0xff] %vm475_vm4, %v430_v41 }
  0xe4   : > { %490 = vst.msk [vmem:[#allocation3 + $0x70] sm:$0xff] %vm475_vm4, %v456_v42  ;;  %v1205_v42 = vld [vmem:[%s2687_s1 + $0x10] sm:$0x3] }
  0xe7   : > { %818 = vrot.lane.b32.xlu1 %v2112_v4, %s1868_s21  ;;  %723 = vrot.lane.b32.xlu0 %v2043_v52, %s1867_s20 }
  0xe8   : > { %820 = vrot.lane.b32.xlu2 %v2109_v3, %s1868_s21 }
  0xe9   : > { %v442_v43 = vpop.permute.xlu1 %441  ;;  %v440_v44 = vpop.permute.xlu0 %439 }
  0xea   : > { %483 = vst.msk [vmem:[#allocation3 + $0x38] sm:$0xff] %vm475_vm4, %v442_v43  ;;  %v527_v45 = vpop.permute.xlu2 %526  ;;  %v1215_v43 = vunpack.c.l.b16 %v1205_v42 }
  0xeb   : > { %482 = vst.msk [vmem:[#allocation3 + $0x30] sm:$0xff] %vm475_vm4, %v440_v44 }
  0xec   : > { %574 = vst.msk [vmem:[#allocation3 + $0x8] sm:$0xff] %vm572_vm5, %v527_v45  ;;  %v1218_v44 = vpack.c.b16 %v1215_v43, %v1215_v43 }
  0xef   : > { %920 = vrot.lane.b32.xlu1 %v2188_v20, %s1869_s22  ;;  %918 = vrot.lane.b32.xlu0 %v2180_v18, %s1869_s22 }
  0xf0   : > { %1015 = vrot.lane.b32.xlu2 %v2038_v51, %s1870_s23 }
  0xf1   : > { %v448_v46 = vpop.permute.xlu1 %447  ;;  %v446_v47 = vpop.permute.xlu0 %445 }
  0xf2   : > { %486 = vst.msk [vmem:[#allocation3 + $0x50] sm:$0xff] %vm475_vm4, %v448_v46  ;;  %v533_v48 = vpop.permute.xlu2 %532 }
  0xf3   : > { %485 = vst.msk [vmem:[#allocation3 + $0x48] sm:$0xff] %vm475_vm4, %v446_v47 }
  0xf4   : > { %577 = vst.msk [vmem:[#allocation3 + $0x20] sm:$0xff] %vm572_vm5, %v533_v48  ;;  %v1685_v48 = vld [vmem:[%s2687_s1 + $0x8] sm:$0xff] }
  0xf7   : > { %1112 = vrot.lane.b32.xlu1 %v2115_v5, %s1871_s24  ;;  %1017 = vrot.lane.b32.xlu0 %v2047_v54, %s1870_s23 }
  0xf8   : > { %1114 = vrot.lane.b32.xlu2 %v2127_v7, %s1871_s24 }
  0xf9   : > { %v454_v49 = vpop.permute.xlu1 %453  ;;  %v452_v50 = vpop.permute.xlu0 %451 }
  0xfa   : > { %489 = vst.msk [vmem:[#allocation3 + $0x68] sm:$0xff] %vm475_vm4, %v454_v49  ;;  %v539_v52 = vpop.permute.xlu2 %538 }
  0xfb   : > { %488 = vst.msk [vmem:[#allocation3 + $0x60] sm:$0xff] %vm475_vm4, %v452_v50  ;;  %v1684_v50 = vld [vmem:[%s2687_s1] sm:$0xff] }
  0xfc   : > { %580 = vst.msk [vmem:[#allocation3 + $0x38] sm:$0xff] %vm572_vm5, %v539_v52 }
  0xff   : > { %731 = vrot.lane.b32.xlu1 %v2055_v55, %s1867_s20  ;;  %729 = vrot.lane.b32.xlu0 %v2058_v56, %s1867_s20 }
 0x100   : > { %826 = vrot.lane.b32.xlu2 %v2124_v6, %s1868_s21 }
 0x101   : > { %v525_v53 = vpop.permute.xlu1 %524  ;;  %v458_v0 = vpop.permute.xlu0 %457 }
 0x102   : > { %573 = vst.msk [vmem:[#allocation3] sm:$0xff] %vm572_vm5, %v525_v53  ;;  %v545_v2 = vpop.permute.xlu2 %544 }
 0x103   : > { %491 = vst.msk [vmem:[#allocation3 + $0x78] sm:$0xff] %vm475_vm4, %v458_v0  ;;  %v2433_v0 = vld [vmem:[%s2028_s11 + $0xc9] sm:$0xff] }
 0x104   : > { %583 = vst.msk [vmem:[#allocation3 + $0x50] sm:$0xff] %vm572_vm5, %v545_v2  ;;  %v2439_v2 = vld [vmem:[%s2028_s11 + $0xc2] sm:$0xff] }
 0x107   : > { %737 = vrot.lane.b32.xlu1 %v2070_v58, %s1867_s20  ;;  %828 = vrot.lane.b32.xlu0 %v2130_v8, %s1868_s21 }
 0x108   : > { %739 = vrot.lane.b32.xlu2 %v2076_v60, %s1867_s20 }
 0x109   : > { %v531_v3 = vpop.permute.xlu1 %530  ;;  %v529_v4 = vpop.permute.xlu0 %528 }
 0x10a   : > { %576 = vst.msk [vmem:[#allocation3 + $0x18] sm:$0xff] %vm572_vm5, %v531_v3  ;;  %v551_v17 = vpop.permute.xlu2 %550 }
 0x10b   : > { %575 = vst.msk [vmem:[#allocation3 + $0x10] sm:$0xff] %vm572_vm5, %v529_v4 }
 0x10c   : > { %586 = vst.msk [vmem:[#allocation3 + $0x68] sm:$0xff] %vm572_vm5, %v551_v17  ;;  %v2450_v17 = vld [vmem:[%s2028_s11 + $0xca] sm:$0xff] }
 0x10f   : > { %928 = vrot.lane.b32.xlu1 %v2217_v26, %s1869_s22  ;;  %926 = vrot.lane.b32.xlu0 %v2195_v22, %s1869_s22 }
 0x110   : > { %834 = vrot.lane.b32.xlu2 %v2145_v11, %s1868_s21 }
 0x111   : > { %v537_v18 = vpop.permute.xlu1 %536  ;;  %v535_v19 = vpop.permute.xlu0 %534 }
 0x112   : > { %579 = vst.msk [vmem:[#allocation3 + $0x30] sm:$0xff] %vm572_vm5, %v537_v18  ;;  %v625_v20 = vpop.permute.xlu2 %624 }
 0x113   : > { %578 = vst.msk [vmem:[#allocation3 + $0x28] sm:$0xff] %vm572_vm5, %v535_v19 }
 0x114   : > { %673 = vst.msk [vmem:[#allocation3] sm:$0xff] %vm672_vm6, %v625_v20 }
 0x117   : > { %1023 = vrot.lane.b32.xlu1 %v2061_v57, %s1870_s23  ;;  %836 = vrot.lane.b32.xlu0 %v2157_v13, %s1868_s21 }
 0x118   : > { %1025 = vrot.lane.b32.xlu2 %v2073_v59, %s1870_s23 }
 0x119   : > { %v543_v21 = vpop.permute.xlu1 %542  ;;  %v541_v22 = vpop.permute.xlu0 %540 }
 0x11a   : > { %582 = vst.msk [vmem:[#allocation3 + $0x48] sm:$0xff] %vm572_vm5, %v543_v21  ;;  %v631_v26 = vpop.permute.xlu2 %630 }
 0x11b   : > { %581 = vst.msk [vmem:[#allocation3 + $0x40] sm:$0xff] %vm572_vm5, %v541_v22 }
 0x11c   : > { %676 = vst.msk [vmem:[#allocation3 + $0x18] sm:$0xff] %vm672_vm6, %v631_v26 }
 0x11f   : > { %936 = vrot.lane.b32.xlu1 %v2227_v28, %s1869_s22  ;;  %934 = vrot.lane.b32.xlu0 %v2237_v31, %s1869_s22 }
 0x120   : > { %1120 = vrot.lane.b32.xlu2 %v2142_v10, %s1871_s24 }
 0x121   : > { %v549_v27 = vpop.permute.xlu1 %548  ;;  %v547_v29 = vpop.permute.xlu0 %546 }
 0x122   : > { %585 = vst.msk [vmem:[#allocation3 + $0x60] sm:$0xff] %vm572_vm5, %v549_v27  ;;  %v637_v33 = vpop.permute.xlu2 %636 }
 0x123   : > { %584 = vst.msk [vmem:[#allocation3 + $0x58] sm:$0xff] %vm572_vm5, %v547_v29 }
 0x124   : > { %679 = vst.msk [vmem:[#allocation3 + $0x30] sm:$0xff] %vm672_vm6, %v637_v33 }
 0x127   : > { %1031 = vrot.lane.b32.xlu1 %v2088_v62, %s1870_s23  ;;  %1122 = vrot.lane.b32.xlu0 %v2139_v9, %s1871_s24 }
 0x128   : > { %1033 = vrot.lane.b32.xlu2 %v2085_v61, %s1870_s23 }
 0x129   : > { %v555_v28 = vpop.permute.xlu1 %554  ;;  %v553_v31 = vpop.permute.xlu0 %552 }
 0x12a   : > { %588 = vst.msk [vmem:[#allocation3 + $0x78] sm:$0xff] %vm572_vm5, %v555_v28  ;;  %v643_v35 = vpop.permute.xlu2 %642 }
 0x12b   : > { %587 = vst.msk [vmem:[#allocation3 + $0x70] sm:$0xff] %vm572_vm5, %v553_v31  ;;  %v1631_v31 = vld [vmem:[%s2028_s11 + $0xd8] sm:$0xff] }
 0x12c   : > { %682 = vst.msk [vmem:[#allocation3 + $0x48] sm:$0xff] %vm672_vm6, %v643_v35 }
 0x12f   : > { %1130 = vrot.lane.b32.xlu1 %v2160_v14, %s1871_s24  ;;  %1128 = vrot.lane.b32.xlu0 %v2154_v12, %s1871_s24 }
 0x130   : > { %725 = vrot.lane.b32.xlu2 %v2038_v51, %s1867_s20 }
 0x131   : > { %v629_v36 = vpop.permute.xlu1 %628  ;;  %v627_v37 = vpop.permute.xlu0 %626 }
 0x132   : > { %675 = vst.msk [vmem:[#allocation3 + $0x10] sm:$0xff] %vm672_vm6, %v629_v36  ;;  %v649_v38 = vpop.permute.xlu2 %648 }
 0x133   : > { %674 = vst.msk [vmem:[#allocation3 + $0x8] sm:$0xff] %vm672_vm6, %v627_v37 }
 0x134   : > { %685 = vst.msk [vmem:[#allocation3 + $0x60] sm:$0xff] %vm672_vm6, %v649_v38 }
 0x137   : > { %822 = vrot.lane.b32.xlu1 %v2115_v5, %s1868_s21  ;;  %727 = vrot.lane.b32.xlu0 %v2047_v54, %s1867_s20 }
 0x138   : > { %824 = vrot.lane.b32.xlu2 %v2127_v7, %s1868_s21 }
 0x139   : > { %v635_v40 = vpop.permute.xlu1 %634  ;;  %v633_v41 = vpop.permute.xlu0 %632 }
 0x13a   : > { %678 = vst.msk [vmem:[#allocation3 + $0x28] sm:$0xff] %vm672_vm6, %v635_v40  ;;  %v722_v51 = vpop.permute.xlu2 %721 }
 0x13b   : > { %677 = vst.msk [vmem:[#allocation3 + $0x20] sm:$0xff] %vm672_vm6, %v633_v41 }
 0x13c   : > { %770 = vst.msk [vmem:[#allocation3] sm:$0xff] %vm769_vm7, %v722_v51  ;;  %v1647_v51 = vld [vmem:[%s2028_s11 + $0xd9] sm:$0xff] }
 0x13f   : > { %747 = vrot.lane.b32.xlu1 %v2101_v1, %s1867_s20  ;;  %745 = vrot.lane.b32.xlu0 %v2091_v63, %s1867_s20 }
 0x140   : > { %922 = vrot.lane.b32.xlu2 %v2204_v24, %s1869_s22  ;;  %v1248_v24 = vsel %vm1246_vm8, %v1218_v44, 0  ;;  %v1664_v44 = vld [vmem:[%s2028_s11 + $0xe2] sm:$0xff] }
 0x141   : > { %v641_v54 = vpop.permute.xlu1 %640  ;;  %v639_v5 = vpop.permute.xlu0 %638  ;;  %1255 = vmatpush.bf16.msra.mxu0 %v1248_v24  ;;  %1765 = vmatpush.bf16.msra.mxu1 %v1248_v24 }
 0x142   : > { %681 = vst.msk [vmem:[#allocation3 + $0x40] sm:$0xff] %vm672_vm6, %v641_v54  ;;  %v821_v7 = vpop.permute.xlu2 %820  ;;  %1766 = vmatpush.bf16.msra.mxu2 %v1248_v24  ;;  %1767 = vmatpush.bf16.msra.mxu3 %v1248_v24  ;;  %v1632_v54 = vld [vmem:[%s2028_s11 + $0xe0] sm:$0xff] }
 0x143   : > { %680 = vst.msk [vmem:[#allocation3 + $0x38] sm:$0xff] %vm672_vm6, %v639_v5  ;;  %v1648_v5 = vld [vmem:[%s2028_s11 + $0xe1] sm:$0xff] }
 0x145   : > { %1256 = vmatpush.bf16.msra.mxu0 %v1685_v48  ;;  %1768 = vmatpush.bf16.msra.mxu1 %v1685_v48 }
 0x146   : > { %1769 = vmatpush.bf16.msra.mxu2 %v1685_v48  ;;  %1770 = vmatpush.bf16.msra.mxu3 %v1685_v48 }
 0x147   : > { %842 = vrot.lane.b32.xlu1 %v2172_v16, %s1868_s21  ;;  %924 = vrot.lane.b32.xlu0 %v2199_v23, %s1869_s22 }
 0x148   : > { %844 = vrot.lane.b32.xlu2 %v2169_v15, %s1868_s21 }
 0x149   : > { %v647_v45 = vpop.permute.xlu1 %646  ;;  %v645_v46 = vpop.permute.xlu0 %644  ;;  %1257 = vmatpush.bf16.msra.mxu0 %v1684_v50  ;;  %1771 = vmatpush.bf16.msra.mxu1 %v1684_v50 }
 0x14a   : > { %684 = vst.msk [vmem:[#allocation3 + $0x58] sm:$0xff] %vm672_vm6, %v647_v45  ;;  %v1016_v47 = vpop.permute.xlu2 %1015  ;;  %1772 = vmatpush.bf16.msra.mxu2 %v1684_v50  ;;  %1773 = vmatpush.bf16.msra.mxu3 %v1684_v50  ;;  %v1663_v45 = vld [vmem:[%s2028_s11 + $0xda] sm:$0xff] }
 0x14b   : > { %683 = vst.msk [vmem:[#allocation3 + $0x50] sm:$0xff] %vm672_vm6, %v645_v46 }
 0x14f   : > { %1021 = vrot.lane.b32.xlu1 %v2055_v55, %s1870_s23  ;;  %1019 = vrot.lane.b32.xlu0 %v2058_v56, %s1870_s23  ;;  %v2421_v56 = vld [vmem:[%s2028_s11 + $0xc8] sm:$0xff] }
 0x150   : > { %942 = vrot.lane.b32.xlu2 %v2276_v39, %s1869_s22 }
 0x151   : > { %v653_v23 = vpop.permute.xlu1 %652  ;;  %v651_v49 = vpop.permute.xlu0 %650 }
 0x152   : > { %687 = vst.msk [vmem:[#allocation3 + $0x70] sm:$0xff] %vm672_vm6, %v653_v23  ;;  %v1115_v55 = vpop.permute.xlu2 %1114 }
 0x153   : > { %686 = vst.msk [vmem:[#allocation3 + $0x68] sm:$0xff] %vm672_vm6, %v651_v49 }
 0x157   : > { %1116 = vrot.lane.b32.xlu1 %v2124_v6, %s1871_s24  ;;  %944 = vrot.lane.b32.xlu0 %v2421_v56, %s1869_s22  ;;  %v2436_v6 = vld [vmem:[%s2028_s11 + $0xc1] sm:$0xff] }
 0x158   : > { %1118 = vrot.lane.b32.xlu2 %v2130_v8, %s1871_s24 }
 0x159   : > { %v819_v39 = vpop.permute.xlu1 %818  ;;  %v724_v52 = vpop.permute.xlu0 %723 }
 0x15a   : > { %867 = vst.msk [vmem:[#allocation3] sm:$0xff] %vm866_vm9, %v819_v39  ;;  %v827_v53 = vpop.permute.xlu2 %826 }
 0x15b   : > { %771 = vst.msk [vmem:[#allocation3 + $0x8] sm:$0xff] %vm769_vm7, %v724_v52 }
 0x15c   : > { %868 = vst.msk [vmem:[#allocation3 + $0x8] sm:$0xff] %vm866_vm9, %v821_v7 }
 0x15f   : > { %1041 = vrot.lane.b32.xlu1 %v2433_v0, %s1870_s23  ;;  %1039 = vrot.lane.b32.xlu0 %v2436_v6, %s1870_s23 }
 0x160   : > { %1136 = vrot.lane.b32.xlu2 %v2439_v2, %s1871_s24 }
 0x161   : > { %v921_v8 = vpop.permute.xlu1 %920  ;;  %v919_v3 = vpop.permute.xlu0 %918 }
 0x162   : > { %968 = vst.msk [vmem:[#allocation3 + $0x8] sm:$0xff] %vm966_vm10, %v921_v8  ;;  %v740_v4 = vpop.permute.xlu2 %739 }
 0x163   : > { %967 = vst.msk [vmem:[#allocation3] sm:$0xff] %vm966_vm10, %v919_v3 }
 0x164   : > { %1064 = vst.msk [vmem:[#allocation3] sm:$0xff] %vm1063_vm11, %v1016_v47 }
 0x165   : > { %779 = vst.msk [vmem:[#allocation3 + $0x48] sm:$0xff] %vm769_vm7, %v740_v4 }
 0x167   : > { %733 = vrot.lane.b32.xlu1 %v2061_v57, %s1867_s20  ;;  %1138 = vrot.lane.b32.xlu0 %v2450_v17, %s1871_s24 }
 0x168   : > { %735 = vrot.lane.b32.xlu2 %v2073_v59, %s1867_s20 }
 0x169   : > { %v1113_v18 = vpop.permute.xlu1 %1112  ;;  %v1018_v19 = vpop.permute.xlu0 %1017 }
 0x16a   : > { %1161 = vst.msk [vmem:[#allocation3] sm:$0xff] %vm1160_vm12, %v1113_v18  ;;  %v835_v20 = vpop.permute.xlu2 %834 }
 0x16b   : > { %1065 = vst.msk [vmem:[#allocation3 + $0x8] sm:$0xff] %vm1063_vm11, %v1018_v19 }
 0x16c   : > { %1162 = vst.msk [vmem:[#allocation3 + $0x8] sm:$0xff] %vm1160_vm12, %v1115_v55 }
 0x16f   : > { %832 = vrot.lane.b32.xlu1 %v2139_v9, %s1868_s21  ;;  %830 = vrot.lane.b32.xlu0 %v2142_v10, %s1868_s21 }
 0x170   : > { %741 = vrot.lane.b32.xlu2 %v2088_v62, %s1867_s20 }
 0x171   : > { %v732_v57 = vpop.permute.xlu1 %731  ;;  %v730_v21 = vpop.permute.xlu0 %729  ;;  %v1177_v22 = vld [vmem:[#allocation3] sm:$0xff] }
 0x172   : > { %775 = vst.msk [vmem:[#allocation3 + $0x28] sm:$0xff] %vm769_vm7, %v732_v57  ;;  %v1026_v26 = vpop.permute.xlu2 %1025 }
 0x173   : > { %774 = vst.msk [vmem:[#allocation3 + $0x20] sm:$0xff] %vm769_vm7, %v730_v21  ;;  %v1178_v59 = vld [vmem:[#allocation3 + $0x8] sm:$0xff] }
 0x174   : > { %871 = vst.msk [vmem:[#allocation3 + $0x20] sm:$0xff] %vm866_vm9, %v827_v53  ;;  %v1193_v27 = vpack.c.bf16 %v1178_v59, %v1177_v22 }
 0x176   : > { %1673 = vmatmul.msk.bf16.vlgmr.msra.gmra.mxu0 %vm1221_vm13, %v1193_v27 }
 0x177   : > { %930 = vrot.lane.b32.xlu1 %v2212_v25, %s1869_s22  ;;  %743 = vrot.lane.b32.xlu0 %v2085_v61, %s1867_s20 }
 0x178   : > { %932 = vrot.lane.b32.xlu2 %v2234_v30, %s1869_s22 }
 0x179   : > { %v738_v9 = vpop.permute.xlu1 %737  ;;  %v829_v62 = vpop.permute.xlu0 %828 }
 0x17a   : > { %778 = vst.msk [vmem:[#allocation3 + $0x40] sm:$0xff] %vm769_vm7, %v738_v9  ;;  %v1121_v10 = vpop.permute.xlu2 %1120 }
 0x17b   : > { %872 = vst.msk [vmem:[#allocation3 + $0x28] sm:$0xff] %vm866_vm9, %v829_v62 }
 0x17c   : > { %875 = vst.msk [vmem:[#allocation3 + $0x40] sm:$0xff] %vm866_vm9, %v835_v20 }
 0x17f   : > { %840 = vrot.lane.b32.xlu1 %v2160_v14, %s1868_s21  ;;  %838 = vrot.lane.b32.xlu0 %v2154_v12, %s1868_s21 }
 0x180   : > { %1027 = vrot.lane.b32.xlu2 %v2070_v58, %s1870_s23 }
 0x181   : > { %v929_v25 = vpop.permute.xlu1 %928  ;;  %v927_v61 = vpop.permute.xlu0 %926 }
 0x182   : > { %972 = vst.msk [vmem:[#allocation3 + $0x28] sm:$0xff] %vm966_vm10, %v929_v25  ;;  %v1034_v30 = vpop.permute.xlu2 %1033 }
 0x183   : > { %971 = vst.msk [vmem:[#allocation3 + $0x20] sm:$0xff] %vm966_vm10, %v927_v61 }
 0x184   : > { %1069 = vst.msk [vmem:[#allocation3 + $0x28] sm:$0xff] %vm1063_vm11, %v1026_v26 }
 0x187   : > { %938 = vrot.lane.b32.xlu1 %v2256_v34, %s1869_s22  ;;  %1029 = vrot.lane.b32.xlu0 %v2076_v60, %s1870_s23 }
 0x188   : > { %940 = vrot.lane.b32.xlu2 %v2242_v32, %s1869_s22 }
 0x189   : > { %v1024_v14 = vpop.permute.xlu1 %1023  ;;  %v837_v12 = vpop.permute.xlu0 %836 }
 0x18a   : > { %1068 = vst.msk [vmem:[#allocation3 + $0x20] sm:$0xff] %vm1063_vm11, %v1024_v14  ;;  %v726_v58 = vpop.permute.xlu2 %725 }
 0x18b   : > { %876 = vst.msk [vmem:[#allocation3 + $0x48] sm:$0xff] %vm866_vm9, %v837_v12 }
 0x18c   : > { %1165 = vst.msk [vmem:[#allocation3 + $0x20] sm:$0xff] %vm1160_vm12, %v1121_v10 }
 0x18d   : > { %772 = vst.msk [vmem:[#allocation3 + $0x10] sm:$0xff] %vm769_vm7, %v726_v58 }
 0x18f   : > { %1126 = vrot.lane.b32.xlu1 %v2157_v13, %s1871_s24  ;;  %1124 = vrot.lane.b32.xlu0 %v2145_v11, %s1871_s24 }
 0x190   : > { %1035 = vrot.lane.b32.xlu2 %v2091_v63, %s1870_s23 }
 0x191   : > { %v937_v60 = vpop.permute.xlu1 %936  ;;  %v935_v34 = vpop.permute.xlu0 %934 }
 0x192   : > { %976 = vst.msk [vmem:[#allocation3 + $0x48] sm:$0xff] %vm966_vm10, %v937_v60  ;;  %v825_v32 = vpop.permute.xlu2 %824 }
 0x193   : > { %975 = vst.msk [vmem:[#allocation3 + $0x40] sm:$0xff] %vm966_vm10, %v935_v34 }
 0x194   : > { %1073 = vst.msk [vmem:[#allocation3 + $0x48] sm:$0xff] %vm1063_vm11, %v1034_v30 }
 0x197   : > { %1132 = vrot.lane.b32.xlu1 %v2172_v16, %s1871_s24  ;;  %1037 = vrot.lane.b32.xlu0 %v2101_v1, %s1870_s23  ;;  %v1181_v16 = vld [vmem:[#allocation3 + $0x20] sm:$0xff] }
 0x198   : > { %1134 = vrot.lane.b32.xlu2 %v2169_v15, %s1871_s24 }
 0x199   : > { %v1032_v13 = vpop.permute.xlu1 %1031  ;;  %v1123_v11 = vpop.permute.xlu0 %1122 }
 0x19a   : > { %1072 = vst.msk [vmem:[#allocation3 + $0x40] sm:$0xff] %vm1063_vm11, %v1032_v13  ;;  %v923_v63 = vpop.permute.xlu2 %922 }
 0x19b   : > { %1166 = vst.msk [vmem:[#allocation3 + $0x28] sm:$0xff] %vm1160_vm12, %v1123_v11 }
 0x19f   : > { %749 = vrot.lane.b32.xlu1 %v2436_v6, %s1867_s20  ;;  %654 = vrot.lane.b32.xlu0 %v2421_v56, %s1866_s19 }
 0x1a0   : > { %751 = vrot.lane.b32.xlu2 %v2433_v0, %s1867_s20 }
 0x1a1   : > { %v1131_v29 = vpop.permute.xlu1 %1130  ;;  %v1129_v1 = vpop.permute.xlu0 %1128 }
 0x1a2   : > { %1170 = vst.msk [vmem:[#allocation3 + $0x48] sm:$0xff] %vm1160_vm12, %v1131_v29  ;;  %v1182_v15 = vld [vmem:[#allocation3 + $0x28] sm:$0xff]  ;;  %v845_v28 = vpop.permute.xlu2 %844 }
 0x1a3   : > { %1169 = vst.msk [vmem:[#allocation3 + $0x40] sm:$0xff] %vm1160_vm12, %v1129_v1  ;;  %v1195_v33 = vpack.c.bf16 %v1182_v15, %v1181_v16 }
 0x1a5   : > { %1675 = vmatmul.msk.bf16.vlgmr.msra.gmra.mxu1 %vm1221_vm13, %v1195_v33 }
 0x1a7   : > { %848 = vrot.lane.b32.xlu1 %v2450_v17, %s1868_s21  ;;  %846 = vrot.lane.b32.xlu0 %v2439_v2, %s1868_s21 }
 0x1a8   : > { %946 = vrot.lane.b32.xlu2 %v1631_v31, %s1869_s22 }
 0x1a9   : > { %v823_v35 = vpop.permute.xlu1 %822  ;;  %v728_v36 = vpop.permute.xlu0 %727  ;;  %v1186_v37 = vld [vmem:[#allocation3 + $0x48] sm:$0xff] }
 0x1aa   : > { %869 = vst.msk [vmem:[#allocation3 + $0x10] sm:$0xff] %vm866_vm9, %v823_v35  ;;  %v1185_v38 = vld [vmem:[#allocation3 + $0x40] sm:$0xff]  ;;  %v943_v41 = vpop.permute.xlu2 %942 }
 0x1ab   : > { %773 = vst.msk [vmem:[#allocation3 + $0x18] sm:$0xff] %vm769_vm7, %v728_v36  ;;  %v1197_v40 = vpack.c.bf16 %v1186_v37, %v1185_v38 }
 0x1ac   : > { %870 = vst.msk [vmem:[#allocation3 + $0x18] sm:$0xff] %vm866_vm9, %v825_v32 }
 0x1ad   : > { %1677 = vmatmul.msk.bf16.vlgmr.msra.gmra.mxu2 %vm1221_vm13, %v1197_v40  ;;  %969 = vst.msk [vmem:[#allocation3 + $0x10] sm:$0xff] %vm966_vm10, %v923_v63 }
 0x1af   : > { %1043 = vrot.lane.b32.xlu1 %v1647_v51, %s1870_s23  ;;  %948 = vrot.lane.b32.xlu0 %v1632_v54, %s1869_s22 }
 0x1b0   : > { %1045 = vrot.lane.b32.xlu2 %v1648_v5, %s1870_s23 }
 0x1b1   : > { %v748_v7 = vpop.permute.xlu1 %747  ;;  %v746_v42 = vpop.permute.xlu0 %745 }
 0x1b2   : > { %783 = vst.msk [vmem:[#allocation3 + $0x68] sm:$0xff] %vm769_vm7, %v748_v7  ;;  %v1119_v43 = vpop.permute.xlu2 %1118 }
 0x1b3   : > { %782 = vst.msk [vmem:[#allocation3 + $0x60] sm:$0xff] %vm769_vm7, %v746_v42 }
 0x1b4   : > { %880 = vst.msk [vmem:[#allocation3 + $0x68] sm:$0xff] %vm866_vm9, %v845_v28 }
 0x1b7   : > { %1142 = vrot.lane.b32.xlu1 %v1664_v44, %s1871_s24  ;;  %1140 = vrot.lane.b32.xlu0 %v1663_v45, %s1871_s24 }
 0x1b9   : > { %v843_v46 = vpop.permute.xlu1 %842  ;;  %v925_v24 = vpop.permute.xlu0 %924 }
 0x1ba   : > { %879 = vst.msk [vmem:[#allocation3 + $0x60] sm:$0xff] %vm866_vm9, %v843_v46  ;;  %v1137_v47 = vpop.permute.xlu2 %1136 }
 0x1bb   : > { %970 = vst.msk [vmem:[#allocation3 + $0x18] sm:$0xff] %vm966_vm10, %v925_v24 }
 0x1bc   : > { %979 = vst.msk [vmem:[#allocation3 + $0x60] sm:$0xff] %vm966_vm10, %v943_v41 }
 0x1c1   : > { %v1022_v48 = vpop.permute.xlu1 %1021  ;;  %v1020_v23 = vpop.permute.xlu0 %1019 }
 0x1c2   : > { %1067 = vst.msk [vmem:[#allocation3 + $0x18] sm:$0xff] %vm1063_vm11, %v1022_v48  ;;  %v736_v49 = vpop.permute.xlu2 %735 }
 0x1c3   : > { %1066 = vst.msk [vmem:[#allocation3 + $0x10] sm:$0xff] %vm1063_vm11, %v1020_v23 }
 0x1c4   : > { %1164 = vst.msk [vmem:[#allocation3 + $0x18] sm:$0xff] %vm1160_vm12, %v1119_v43 }
 0x1c5   : > { %777 = vst.msk [vmem:[#allocation3 + $0x38] sm:$0xff] %vm769_vm7, %v736_v49 }
 0x1c9   : > { %v1117_v50 = vpop.permute.xlu1 %1116  ;;  %v945_v55 = vpop.permute.xlu0 %944 }
 0x1ca   : > { %1163 = vst.msk [vmem:[#allocation3 + $0x10] sm:$0xff] %vm1160_vm12, %v1117_v50  ;;  %v742_v56 = vpop.permute.xlu2 %741 }
 0x1cb   : > { %980 = vst.msk [vmem:[#allocation3 + $0x68] sm:$0xff] %vm966_vm10, %v945_v55  ;;  %v1180_v39 = vld [vmem:[#allocation3 + $0x18] sm:$0xff] }
 0x1cc   : > { %780 = vst.msk [vmem:[#allocation3 + $0x50] sm:$0xff] %vm769_vm7, %v742_v56 }
 0x1d1   : > { %v1042_v52 = vpop.permute.xlu1 %1041  ;;  %v1040_v53 = vpop.permute.xlu0 %1039  ;;  %v1179_v0 = vld [vmem:[#allocation3 + $0x10] sm:$0xff] }
 0x1d2   : > { %1077 = vst.msk [vmem:[#allocation3 + $0x68] sm:$0xff] %vm1063_vm11, %v1042_v52  ;;  %v1194_v6 = vpack.c.bf16 %v1180_v39, %v1179_v0  ;;  %v933_v3 = vpop.permute.xlu2 %932 }
 0x1d3   : > { %1076 = vst.msk [vmem:[#allocation3 + $0x60] sm:$0xff] %vm1063_vm11, %v1040_v53 }
 0x1d4   : > { %1173 = vst.msk [vmem:[#allocation3 + $0x60] sm:$0xff] %vm1160_vm12, %v1137_v47  ;;  %1674 = vmatmul.msk.bf16.gmra.mxu0 %vm1221_vm13, %v1194_v6 }
 0x1d9   : > { %v734_v2 = vpop.permute.xlu1 %733  ;;  %v1139_v8 = vpop.permute.xlu0 %1138 }
 0x1da   : > { %776 = vst.msk [vmem:[#allocation3 + $0x30] sm:$0xff] %vm769_vm7, %v734_v2  ;;  %v1028_v57 = vpop.permute.xlu2 %1027 }
 0x1db   : > { %1174 = vst.msk [vmem:[#allocation3 + $0x68] sm:$0xff] %vm1160_vm12, %v1139_v8  ;;  %v1189_v4 = vld [vmem:[#allocation3 + $0x60] sm:$0xff] }
 0x1e1   : > { %v833_v17 = vpop.permute.xlu1 %832  ;;  %v831_v18 = vpop.permute.xlu0 %830 }
 0x1e2   : > { %874 = vst.msk [vmem:[#allocation3 + $0x38] sm:$0xff] %vm866_vm9, %v833_v17  ;;  %v1190_v19 = vld [vmem:[#allocation3 + $0x68] sm:$0xff]  ;;  %v941_v27 = vpop.permute.xlu2 %940 }
 0x1e3   : > { %873 = vst.msk [vmem:[#allocation3 + $0x30] sm:$0xff] %vm866_vm9, %v831_v18  ;;  %v1199_v20 = vpack.c.bf16 %v1190_v19, %v1189_v4 }
 0x1e4   : > { %974 = vst.msk [vmem:[#allocation3 + $0x38] sm:$0xff] %vm966_vm10, %v933_v3 }
 0x1e5   : > { %1679 = vmatmul.msk.bf16.vlgmr.msra.gmra.mxu3 %vm1221_vm13, %v1199_v20 }
 0x1e9   : > { %v931_v21 = vpop.permute.xlu1 %930  ;;  %v744_v22 = vpop.permute.xlu0 %743 }
 0x1ea   : > { %973 = vst.msk [vmem:[#allocation3 + $0x30] sm:$0xff] %vm966_vm10, %v931_v21  ;;  %v1036_v61 = vpop.permute.xlu2 %1035 }
 0x1eb   : > { %781 = vst.msk [vmem:[#allocation3 + $0x58] sm:$0xff] %vm769_vm7, %v744_v22 }
 0x1ec   : > { %1070 = vst.msk [vmem:[#allocation3 + $0x30] sm:$0xff] %vm1063_vm11, %v1028_v57 }
 0x1f1   : > { %v841_v59 = vpop.permute.xlu1 %840  ;;  %v839_v26 = vpop.permute.xlu0 %838 }
 0x1f2   : > { %878 = vst.msk [vmem:[#allocation3 + $0x58] sm:$0xff] %vm866_vm9, %v841_v59  ;;  %v1135_v12 = vpop.permute.xlu2 %1134 }
 0x1f3   : > { %877 = vst.msk [vmem:[#allocation3 + $0x50] sm:$0xff] %vm866_vm9, %v839_v26  ;;  %v2576_v9 = vpop.f32.mrf.mxu0 }
 0x1f4   : > { %1393 = vst.msk [vmem:[%s1934_s29] sm:$0xff] %vm1299_vm14, %v2576_v9  ;;  %v1339_v45 = vmul.f32 %v2576_v9, %v2576_v9  ;;  %v1300_v24 = vsel %vm1299_vm14, %v2576_v9, 0.0 }
 0x1f5   : > { %978 = vst.msk [vmem:[#allocation3 + $0x58] sm:$0xff] %vm966_vm10, %v941_v27 }
 0x1f6   : > { %v1355_v49 = vsel %vm1299_vm14, %v1339_v45, 0.0 }
 0x1f9   : > { %v939_v62 = vpop.permute.xlu1 %938  ;;  %v1030_v10 = vpop.permute.xlu0 %1029 }
 0x1fa   : > { %977 = vst.msk [vmem:[#allocation3 + $0x50] sm:$0xff] %vm966_vm10, %v939_v62  ;;  %v752_v11 = vpop.permute.xlu2 %751 }
 0x1fb   : > { %1071 = vst.msk [vmem:[#allocation3 + $0x38] sm:$0xff] %vm1063_vm11, %v1030_v10  ;;  %v1261_v25 = vpop.f32.mrf.mxu0 }
 0x1fc   : > { %1394 = vst.msk [vmem:[%s1934_s29 + $0x8] sm:$0xff] %vm1299_vm14, %v1261_v25  ;;  %v1340_v44 = vmul.f32 %v1261_v25, %v1261_v25  ;;  %v1301_v46 = vsel %vm1299_vm14, %v1261_v25, 0.0 }
 0x1fd   : > { %1074 = vst.msk [vmem:[#allocation3 + $0x50] sm:$0xff] %vm1063_vm11, %v1036_v61  ;;  %v1302_v48 = vadd.f32 %v1301_v46, %v1300_v24 }
 0x1fe   : > { %v1356_v47 = vsel %vm1299_vm14, %v1340_v44, 0.0 }
 0x1ff   : > { %v1357_v56 = vadd.f32 %v1356_v47, %v1355_v49 }
 0x201   : > { %v1127_v30 = vpop.permute.xlu1 %1126  ;;  %v1125_v14 = vpop.permute.xlu0 %1124 }
 0x202   : > { %1168 = vst.msk [vmem:[#allocation3 + $0x38] sm:$0xff] %vm1160_vm12, %v1127_v30  ;;  %v947_v33 = vpop.permute.xlu2 %946 }
 0x203   : > { %1167 = vst.msk [vmem:[#allocation3 + $0x30] sm:$0xff] %vm1160_vm12, %v1125_v14 }
 0x209   : > { %v1133_v58 = vpop.permute.xlu1 %1132  ;;  %v1038_v60 = vpop.permute.xlu0 %1037  ;;  %v1184_v34 = vld [vmem:[#allocation3 + $0x38] sm:$0xff] }
 0x20a   : > { %1171 = vst.msk [vmem:[#allocation3 + $0x50] sm:$0xff] %vm1160_vm12, %v1133_v58  ;;  %v1183_v32 = vld [vmem:[#allocation3 + $0x30] sm:$0xff]  ;;  %v1046_v38 = vpop.permute.xlu2 %1045 }
 0x20b   : > { %1075 = vst.msk [vmem:[#allocation3 + $0x58] sm:$0xff] %vm1063_vm11, %v1038_v60  ;;  %v1196_v13 = vpack.c.bf16 %v1184_v34, %v1183_v32 }
 0x20c   : > { %1172 = vst.msk [vmem:[#allocation3 + $0x58] sm:$0xff] %vm1160_vm12, %v1135_v12 }
 0x20d   : > { %1676 = vmatmul.msk.bf16.gmra.mxu1 %vm1221_vm13, %v1196_v13 }
 0x211   : > { %v750_v63 = vpop.permute.xlu1 %749  ;;  %v655_v16 = vpop.permute.xlu0 %654  ;;  %v1187_v29 = vld [vmem:[#allocation3 + $0x50] sm:$0xff] }
 0x212   : > { %784 = vst.msk [vmem:[#allocation3 + $0x70] sm:$0xff] %vm769_vm7, %v750_v63 }
 0x213   : > { %688 = vst.msk [vmem:[#allocation3 + $0x78] sm:$0xff] %vm672_vm6, %v655_v16  ;;  %v1188_v1 = vld [vmem:[#allocation3 + $0x58] sm:$0xff] }
 0x214   : > { %v1198_v15 = vpack.c.bf16 %v1188_v1, %v1187_v29  ;;  %785 = vst.msk [vmem:[#allocation3 + $0x78] sm:$0xff] %vm769_vm7, %v752_v11 }
 0x216   : > { %1678 = vmatmul.msk.bf16.gmra.mxu2 %vm1221_vm13, %v1198_v15 }
 0x219   : > { %v849_v28 = vpop.permute.xlu1 %848  ;;  %v847_v31 = vpop.permute.xlu0 %846 }
 0x21a   : > { %882 = vst.msk [vmem:[#allocation3 + $0x78] sm:$0xff] %vm866_vm9, %v849_v28 }
 0x21b   : > { %881 = vst.msk [vmem:[#allocation3 + $0x70] sm:$0xff] %vm866_vm9, %v847_v31 }
 0x21c   : > { %981 = vst.msk [vmem:[#allocation3 + $0x70] sm:$0xff] %vm966_vm10, %v947_v33 }
 0x221   : > { %v1044_v35 = vpop.permute.xlu1 %1043  ;;  %v949_v36 = vpop.permute.xlu0 %948 }
 0x222   : > { %1078 = vst.msk [vmem:[#allocation3 + $0x70] sm:$0xff] %vm1063_vm11, %v1044_v35  ;;  %v1269_v37 = vpop.f32.mrf.mxu1 }
 0x223   : > { %982 = vst.msk [vmem:[#allocation3 + $0x78] sm:$0xff] %vm966_vm10, %v949_v36  ;;  %v1343_v6 = vmul.f32 %v1269_v37, %v1269_v37  ;;  %v1307_v4 = vsel %vm1299_vm14, %v1269_v37, 0.0 }
 0x224   : > { %1397 = vst.msk [vmem:[%s1934_s29 + $0x20] sm:$0xff] %vm1299_vm14, %v1269_v37 }
 0x225   : > { %1079 = vst.msk [vmem:[#allocation3 + $0x78] sm:$0xff] %vm1063_vm11, %v1046_v38  ;;  %v1362_v20 = vsel %vm1299_vm14, %v1343_v6, 0.0 }
 0x229   : > { %v1143_v40 = vpop.permute.xlu1 %1142  ;;  %v1141_v41 = vpop.permute.xlu0 %1140 }
 0x22a   : > { %1176 = vst.msk [vmem:[#allocation3 + $0x78] sm:$0xff] %vm1160_vm12, %v1143_v40  ;;  %v1271_v51 = vpop.f32.mrf.mxu1 }
 0x22b   : > { %1175 = vst.msk [vmem:[#allocation3 + $0x70] sm:$0xff] %vm1160_vm12, %v1141_v41  ;;  %v1344_v26 = vmul.f32 %v1271_v51, %v1271_v51  ;;  %v1309_v9 = vsel %vm1299_vm14, %v1271_v51, 0.0 }
 0x22c   : > { %1398 = vst.msk [vmem:[%s1934_s29 + $0x28] sm:$0xff] %vm1299_vm14, %v1271_v51 }
 0x22d   : > { %v1364_v25 = vsel %vm1299_vm14, %v1344_v26, 0.0 }
 0x230   : > { %v1279_v54 = vpop.f32.mrf.mxu2 }
 0x231   : > { %1401 = vst.msk [vmem:[%s1934_s29 + $0x40] sm:$0xff] %vm1299_vm14, %v1279_v54  ;;  %v1192_v5 = vld [vmem:[#allocation3 + $0x78] sm:$0xff]  ;;  %v1347_v58 = vmul.f32 %v1279_v54, %v1279_v54  ;;  %v1315_v11 = vsel %vm1299_vm14, %v1279_v54, 0.0 }
 0x232   : > { %v1191_v7 = vld [vmem:[#allocation3 + $0x70] sm:$0xff] }
 0x233   : > { %v1200_v42 = vpack.c.bf16 %v1192_v5, %v1191_v7  ;;  %v1370_v1 = vsel %vm1299_vm14, %v1347_v58, 0.0 }
 0x235   : > { %1680 = vmatmul.msk.bf16.gmra.mxu3 %vm1221_vm13, %v1200_v42 }
 0x238   : > { %v1281_v43 = vpop.f32.mrf.mxu2 }
 0x239   : > { %1402 = vst.msk [vmem:[%s1934_s29 + $0x48] sm:$0xff] %vm1299_vm14, %v1281_v43  ;;  %v1348_v28 = vmul.f32 %v1281_v43, %v1281_v43  ;;  %v1317_v31 = vsel %vm1299_vm14, %v1281_v43, 0.0 }
 0x23b   : > { %v1372_v37 = vsel %vm1299_vm14, %v1348_v28, 0.0 }
 0x251   : > { %v1264_v23 = vpop.f32.mrf.mxu0 }
 0x252   : > { %v1303_v50 = vsel %vm1299_vm14, %v1264_v23, 0.0  ;;  %v1341_v55 = vmul.f32 %v1264_v23, %v1264_v23  ;;  %1395 = vst.msk [vmem:[%s1934_s29 + $0x10] sm:$0xff] %vm1299_vm14, %v1264_v23 }
 0x253   : > { %v1304_v39 = vadd.f32 %v1303_v50, %v1302_v48 }
 0x254   : > { %v1358_v52 = vsel %vm1299_vm14, %v1341_v55, 0.0 }
 0x255   : > { %v1359_v53 = vadd.f32 %v1358_v52, %v1357_v56 }
 0x259   : > { %v1266_v0 = vpop.f32.mrf.mxu0 }
 0x25a   : > { %v1305_v2 = vsel %vm1299_vm14, %v1266_v0, 0.0  ;;  %v1342_v8 = vmul.f32 %v1266_v0, %v1266_v0  ;;  %1396 = vst.msk [vmem:[%s1934_s29 + $0x18] sm:$0xff] %vm1299_vm14, %v1266_v0 }
 0x25b   : > { %v1306_v3 = vadd.f32 %v1305_v2, %v1304_v39 }
 0x25c   : > { %v1360_v17 = vsel %vm1299_vm14, %v1342_v8, 0.0 }
 0x25d   : > { %v1308_v18 = vadd.f32 %v1307_v4, %v1306_v3  ;;  %v1361_v19 = vadd.f32 %v1360_v17, %v1359_v53 }
 0x25f   : > { %v1363_v57 = vadd.f32 %v1362_v20, %v1361_v19  ;;  %v1310_v10 = vadd.f32 %v1309_v9, %v1308_v18 }
 0x261   : > { %v1365_v14 = vadd.f32 %v1364_v25, %v1363_v57 }
 0x268   : > { %v1289_v21 = vpop.f32.mrf.mxu3 }
 0x269   : > { %1405 = vst.msk [vmem:[%s1934_s29 + $0x60] sm:$0xff] %vm1299_vm14, %v1289_v21  ;;  %v1351_v5 = vmul.f32 %v1289_v21, %v1289_v21  ;;  %v1323_v45 = vsel %vm1299_vm14, %v1289_v21, 0.0 }
 0x26b   : > { %v1378_v48 = vsel %vm1299_vm14, %v1351_v5, 0.0 }
 0x270   : > { %v1291_v22 = vpop.f32.mrf.mxu3 }
 0x271   : > { %1406 = vst.msk [vmem:[%s1934_s29 + $0x68] sm:$0xff] %vm1299_vm14, %v1291_v22  ;;  %v1352_v50 = vmul.f32 %v1291_v22, %v1291_v22  ;;  %v1325_v56 = vsel %vm1299_vm14, %v1291_v22, 0.0 }
 0x273   : > { %v1380_v53 = vsel %vm1299_vm14, %v1352_v50, 0.0 }
 0x28a   : > { %v1274_v59 = vpop.f32.mrf.mxu1 }
 0x28b   : > { %1399 = vst.msk [vmem:[%s1934_s29 + $0x30] sm:$0xff] %vm1299_vm14, %v1274_v59  ;;  %v1345_v27 = vmul.f32 %v1274_v59, %v1274_v59  ;;  %v1311_v62 = vsel %vm1299_vm14, %v1274_v59, 0.0 }
 0x28c   : > { %v1312_v30 = vadd.f32 %v1311_v62, %v1310_v10 }
 0x28d   : > { %v1366_v61 = vsel %vm1299_vm14, %v1345_v27, 0.0 }
 0x28e   : > { %v1367_v32 = vadd.f32 %v1366_v61, %v1365_v14 }
 0x292   : > { %v1276_v12 = vpop.f32.mrf.mxu1 }
 0x293   : > { %v1313_v60 = vsel %vm1299_vm14, %v1276_v12, 0.0  ;;  %v1346_v34 = vmul.f32 %v1276_v12, %v1276_v12  ;;  %1400 = vst.msk [vmem:[%s1934_s29 + $0x38] sm:$0xff] %vm1299_vm14, %v1276_v12 }
 0x294   : > { %v1314_v13 = vadd.f32 %v1313_v60, %v1312_v30 }
 0x295   : > { %v1368_v63 = vsel %vm1299_vm14, %v1346_v34, 0.0 }
 0x296   : > { %v1316_v16 = vadd.f32 %v1315_v11, %v1314_v13  ;;  %v1369_v29 = vadd.f32 %v1368_v63, %v1367_v32 }
 0x298   : > { %v1371_v15 = vadd.f32 %v1370_v1, %v1369_v29  ;;  %v1318_v36 = vadd.f32 %v1317_v31, %v1316_v16 }
 0x299   : > { %v1284_v33 = vpop.f32.mrf.mxu2 }
 0x29a   : > { %1403 = vst.msk [vmem:[%s1934_s29 + $0x50] sm:$0xff] %vm1299_vm14, %v1284_v33  ;;  %v1349_v35 = vmul.f32 %v1284_v33, %v1284_v33  ;;  %v1319_v38 = vsel %vm1299_vm14, %v1284_v33, 0.0  ;;  %v1373_v40 = vadd.f32 %v1372_v37, %v1371_v15 }
 0x29b   : > { %v1320_v51 = vadd.f32 %v1319_v38, %v1318_v36 }
 0x29c   : > { %v1374_v41 = vsel %vm1299_vm14, %v1349_v35, 0.0 }
 0x29d   : > { %v1375_v44 = vadd.f32 %v1374_v41, %v1373_v40 }
 0x2a1   : > { %v1286_v54 = vpop.f32.mrf.mxu2 }
 0x2a2   : > { %v1321_v7 = vsel %vm1299_vm14, %v1286_v54, 0.0  ;;  %v1350_v42 = vmul.f32 %v1286_v54, %v1286_v54  ;;  %1404 = vst.msk [vmem:[%s1934_s29 + $0x58] sm:$0xff] %vm1299_vm14, %v1286_v54 }
 0x2a3   : > { %v1322_v43 = vadd.f32 %v1321_v7, %v1320_v51 }
 0x2a4   : > { %v1376_v46 = vsel %vm1299_vm14, %v1350_v42, 0.0 }
 0x2a5   : > { %v1324_v24 = vadd.f32 %v1323_v45, %v1322_v43  ;;  %v1377_v47 = vadd.f32 %v1376_v46, %v1375_v44 }
 0x2a7   : > { %v1379_v23 = vadd.f32 %v1378_v48, %v1377_v47  ;;  %v1326_v52 = vadd.f32 %v1325_v56, %v1324_v24 }
 0x2a9   : > { %v1381_v2 = vadd.f32 %v1380_v53, %v1379_v23 }
 0x2b8   : > { %v1294_v49 = vpop.f32.mrf.mxu3 }
 0x2b9   : > { %1407 = vst.msk [vmem:[%s1934_s29 + $0x70] sm:$0xff] %vm1299_vm14, %v1294_v49  ;;  %v1353_v55 = vmul.f32 %v1294_v49, %v1294_v49  ;;  %v1327_v39 = vsel %vm1299_vm14, %v1294_v49, 0.0 }
 0x2ba   : > { %v1328_v6 = vadd.f32 %v1327_v39, %v1326_v52 }
 0x2bb   : > { %v1382_v0 = vsel %vm1299_vm14, %v1353_v55, 0.0 }
 0x2bc   : > { %v1383_v17 = vadd.f32 %v1382_v0, %v1381_v2 }
 0x2c0   : > { %v1296_v8 = vpop.f32.mrf.mxu3 }
 0x2c1   : > { %v1329_v3 = vsel %vm1299_vm14, %v1296_v8, 0.0  ;;  %v1354_v4 = vmul.f32 %v1296_v8, %v1296_v8  ;;  %1408 = vst.msk [vmem:[%s1934_s29 + $0x78] sm:$0xff] %vm1299_vm14, %v1296_v8 }
 0x2c2   : > { %v1330_v18 = vadd.f32 %v1329_v3, %v1328_v6 }
 0x2c3   : > { %v1384_v19 = vsel %vm1299_vm14, %v1354_v4, 0.0 }
 0x2c4   : > { %v1331_v20 = vrot.slane %v1330_v18, 4  ;;  %v1385_v57 = vadd.f32 %v1384_v19, %v1383_v17 }
 0x2c6   : > { %v1332_v21 = vadd.f32 %v1331_v20, %v1330_v18  ;;  %v1386_v22 = vrot.slane %v1385_v57, 4 }
 0x2c8   : > { %v1333_v59 = vrot.slane %v1332_v21, 2  ;;  %v1387_v26 = vadd.f32 %v1386_v22, %v1385_v57 }
 0x2ca   : > { %v1334_v27 = vadd.f32 %v1333_v59, %v1332_v21  ;;  %v1388_v9 = vrot.slane %v1387_v26, 2 }
 0x2cc   : > { %v1335_v62 = vrot.slane %v1334_v27, 1  ;;  %v1389_v10 = vadd.f32 %v1388_v9, %v1387_v26 }
 0x2ce   : > { %v1336_v25 = vadd.f32 %v1335_v62, %v1334_v27  ;;  %v1390_v61 = vrot.slane %v1389_v10, 1 }
 0x2d0   : > { %1338 = vst.msk [vmem:[%s1940_s9] sm:$0x1] %vm1337_vm15, %v1336_v25  ;;  %v1391_v30 = vadd.f32 %v1390_v61, %v1389_v10 }
 0x2d2   : > { %1392 = vst.msk [vmem:[%s1940_s9 + $0x1] sm:$0x1] %vm1337_vm15, %v1391_v30 }
 0x2d3 PF: > { %s14_s16 = sadd.s32 1, %s1861_s16   ;;  %s2690_s12 = smov %s1853_s14 }
 0x2d4   : > { %p11_p9 = scmp.ge.s32.totalorder %s14_s16, 6   ;;  %s2691_s13 = smov %s1857_s15 }
 0x2d5   : > { %s2692_s14 = smov %s2695_s17  ;;  %s2693_s15 = smov %s2699_s18 }
 0x2d6   :  { %13 = sbr.rel (!%p11_p9) target bundleno = 3 (0x3), region = 79 }

// kernel: double_conv.4
= control target key start
LH: loop header
LB: loop body
LE: loop exit
PB: predicated region body
PF: predicated region fallthrough
CT: control target
= control target key end

     0   :  { %s1946_s15 = smov 0   ;;  %s1948_s16 = smov 0   ;;  %s2874_s0 = inlined_call_operand.vmem [shape: f32[2,256,8], index: 0, kind: input, shape index: {}]   ;;  %s2875_s1 = inlined_call_operand.vmem [shape: f32[2,8], index: 1, kind: input, shape index: {}]   ;;  %s2876_s2 = inlined_call_operand.vmem [shape: bf16[72,8], index: 2, kind: input, shape index: {}]   ;;  %s2877_s3 = inlined_call_operand.vmem [shape: f32[2,256,8], index: 3, kind: output, shape index: {0}]   ;;  %s2878_s4 = inlined_call_operand.vmem [shape: f32[2,2,2,8], index: 4, kind: output, shape index: {1}]  }
   0x1   :  { %s1950_s17 = smov 0   ;;  %s1952_s18 = smov 0  }
   0x2   :  { %s1954_s19 = smov 0  }
   0x3 LB: > { %s24_s20 = sadd.s32 1, %s1902_s17  ;;  %s27_s21 = sadd.s32 1, %s1906_s18  ;;  %s1910_s19 = sphi %s1954_s19, %s15_s19   ;;  %s1906_s18 = sphi %s1952_s18, %s2882_s18   ;;  %s1902_s17 = sphi %s1950_s17, %s2881_s17   ;;  %s1898_s16 = sphi %s1948_s16, %s2880_s16   ;;  %s1894_s15 = sphi %s1946_s15, %s2879_s15  }
   0x4   : > { %p25_p0 = scmp.ge.s32.totalorder %s24_s20, 2  ;;  %p1664_p1 = scmp.ge.s32.totalorder %s1910_s19, 1 }
   0x5   : > { %p181_p2 = scmp.lt.s32.totalorder %s1910_s19, 5 }
   0x6   : > { %s2884_s20 = smov (%p25_p0, %s24_s20), 0  ;;  %s2886_s21 = smov (!%p25_p0, %s27_s21), %s1906_s18 }
   0x7   : > { %p182_p3 = pnand %p1664_p1, %p181_p2  ;;  %p29_p4 = scmp.ge.s32.totalorder %s2886_s21, 2 }
   0x8   : > { %p219_p5 = scmp.lt.s32.totalorder (!%p182_p3), %s1898_s16, 1  ;;  %s1667_s22 = sshll.u32 (!%p182_p3), %s1894_s15, 4 }
   0x9   : > { %s2888_s21 = smov (%p29_p4, %s2886_s21), 0  ;;  %185 = sbr.rel (%p182_p3) target bundleno = 723 (0x2d3), region = 32 }
   0xa   : > { %p227_p6 = scmp.lt.s32.totalorder (!%p182_p3), %s1667_s22, 31  ;;  %p236_p7 = scmp.lt.s32.totalorder (!%p182_p3), %s1894_s15, 1 }
   0xb   : > { %p1672_p8 = scmp.ne.s32.totalorder (!%p182_p3), %s1894_s15, 0 }
   0xe   : > { %s2890_s16 = smov (!%p219_p5, %s1898_s16), 1  ;;  %s2892_s22 = smov (!%p227_p6, %s1667_s22), 31 }
   0xf   : > { %s1801_s23 = sshll.u32 %s2890_s16, 8  ;;  %s1668_s24 = sshll.u32 %s2890_s16, 5 }
  0x10   : > { %s1983_s27 = scalar_lea.vmem %s2874_s0, %s1801_s23  ;;  %s230_s28 = sadd.s32 %s1668_s24, %s2892_s22 }
  0x11   : > { %s1669_s29 = sshll.u32 %s230_s28, 3  ;;  %s1670_s7 = sshll.u32 %s2890_s16, 1 }
  0x12   : > { %s1988_s6 = scalar_lea.vmem %s2877_s3, %s1669_s29 }
  0x13   : > { %s237_s8 = scalar_select %p236_p7, %s1894_s15, 1 }
  0x14   : > { %246 = sbr.rel (%p1672_p8) target bundleno = 96 (0x60), region = 36 }
  0x15   : > { %s239_s9 = sadd.s32 %s1670_s7, %s237_s8 }
  0x16   : > { %s1671_s10 = sshll.u32 %s239_s9, 1 }
  0x17   : > { %s1994_s13 = scalar_lea.vmem %s2878_s4, %s1671_s10 }
  0x19   : > { %vm247_vm0 = vcmask 64512   ;;  %v1912_v0 = vmov 0.0   ;;  %vm250_vm1 = vcmask 58368   ;;  %vm257_vm2 = vcmask 57344   ;;  %v2044_v1 = vld [vmem:[%s2875_s1] ss:$0 sm:$0xff] }
  0x1a   : > { %248 = vst.msk [vmem:[#allocation2] sm:$0xff] %vm247_vm0, %v1912_v0  ;;  %v290_v2 = vld [vmem:[%s1983_s27] sm:$0xff]  ;;  %v291_v3 = vld [vmem:[%s1983_s27 + $0x8] sm:$0xff]  ;;  %v292_v4 = vld [vmem:[%s1983_s27 + $0x10] sm:$0xff] }
  0x1b   : > { %249 = vst.msk [vmem:[#allocation2 + $0x8] sm:$0xff] %vm247_vm0, %v1912_v0  ;;  %v325_v5 = vmul.f32 %v2044_v1, %v290_v2  ;;  %v2061_v6 = vld [vmem:[%s2875_s1 + $0x1] ss:$0 sm:$0xff]  ;;  %v293_v7 = vld [vmem:[%s1983_s27 + $0x18] sm:$0xff]  ;;  %v326_v8 = vmul.f32 %v2044_v1, %v291_v3  ;;  %v327_v10 = vmul.f32 %v2044_v1, %v292_v4  ;;  %v295_v11 = vld [vmem:[%s1983_s27 + $0x28] sm:$0xff] }
  0x1c   : > { %253 = vst.msk [vmem:[#allocation2 + $0x198] sm:$0xff] %vm247_vm0, %v1912_v0  ;;  %v294_v9 = vld [vmem:[%s1983_s27 + $0x20] sm:$0xff]  ;;  %v328_v12 = vmul.f32 %v2044_v1, %v293_v7  ;;  %v296_v13 = vld [vmem:[%s1983_s27 + $0x30] sm:$0xff]  ;;  %v297_v16 = vld [vmem:[%s1983_s27 + $0x38] sm:$0xff]  ;;  %v330_v18 = vmul.f32 %v2044_v1, %v295_v11 }
  0x1d   : > { %254 = vst.msk [vmem:[#allocation2 + $0x1a0] sm:$0xff] %vm247_vm0, %v1912_v0  ;;  %v358_v14 = vadd.f32 %v2061_v6, %v325_v5  ;;  %v329_v15 = vmul.f32 %v2044_v1, %v294_v9  ;;  %v359_v17 = vadd.f32 %v2061_v6, %v326_v8  ;;  %v298_v19 = vld [vmem:[%s1983_s27 + $0x40] sm:$0xff]  ;;  %v360_v20 = vadd.f32 %v2061_v6, %v327_v10  ;;  %v299_v22 = vld [vmem:[%s1983_s27 + $0x48] sm:$0xff]  ;;  %v300_v25 = vld [vmem:[%s1983_s27 + $0x50] sm:$0xff] }
  0x1e   : > { %251 = vst.msk [vmem:[#allocation2 + $0x10] sm:$0x3] %vm250_vm1, %v1912_v0  ;;  %v331_v21 = vmul.f32 %v2044_v1, %v296_v13  ;;  %v361_v23 = vadd.f32 %v2061_v6, %v328_v12  ;;  %v332_v24 = vmul.f32 %v2044_v1, %v297_v16  ;;  %v333_v28 = vmul.f32 %v2044_v1, %v298_v19  ;;  %v301_v29 = vld [vmem:[%s1983_s27 + $0x58] sm:$0xff]  ;;  %v302_v33 = vld [vmem:[%s1983_s27 + $0x60] sm:$0xff]  ;;  %v303_v37 = vld [vmem:[%s1983_s27 + $0x68] sm:$0xff] }
  0x1f   : > { %255 = vst.msk [vmem:[#allocation2 + $0x1a8] sm:$0x3] %vm250_vm1, %v1912_v0  ;;  %v390_v26 = vmax.f32 %v358_v14, 0.0  ;;  %v362_v27 = vadd.f32 %v2061_v6, %v329_v15  ;;  %v391_v30 = vmax.f32 %v359_v17, 0.0  ;;  %v363_v31 = vadd.f32 %v2061_v6, %v330_v18  ;;  %v304_v41 = vld [vmem:[%s1983_s27 + $0x70] sm:$0xff]  ;;  %v305_v45 = vld [vmem:[%s1983_s27 + $0x78] sm:$0xff] }
  0x20   : > { %258 = vst.msk [vmem:[#allocation2 + $0x18] sm:$0x1] %vm257_vm2, %v1912_v0  ;;  %v334_v32 = vmul.f32 %v2044_v1, %v299_v22  ;;  %v392_v34 = vmax.f32 %v360_v20, 0.0  ;;  %v364_v35 = vadd.f32 %v2061_v6, %v331_v21  ;;  %v335_v36 = vmul.f32 %v2044_v1, %v300_v25  ;;  %v306_v49 = vld [vmem:[%s1983_s27 + $0x80] sm:$0xff]  ;;  %v307_v53 = vld [vmem:[%s1983_s27 + $0x88] sm:$0xff]  ;;  %v308_v57 = vld [vmem:[%s1983_s27 + $0x90] sm:$0xff] }
  0x21   : > { %259 = vst.msk [vmem:[#allocation2 + $0x30] sm:$0x1] %vm257_vm2, %v1912_v0  ;;  %v393_v38 = vmax.f32 %v361_v23, 0.0  ;;  %v365_v39 = vadd.f32 %v2061_v6, %v332_v24  ;;  %v336_v40 = vmul.f32 %v2044_v1, %v301_v29  ;;  %v394_v42 = vmax.f32 %v362_v27, 0.0  ;;  %v309_v61 = vld [vmem:[%s1983_s27 + $0x98] sm:$0xff]  ;;  %v310_v2 = vld [vmem:[%s1983_s27 + $0xa0] sm:$0xff] }
  0x22   : > { %260 = vst.msk [vmem:[#allocation2 + $0x48] sm:$0x1] %vm257_vm2, %v1912_v0  ;;  %v366_v43 = vadd.f32 %v2061_v6, %v333_v28  ;;  %v337_v44 = vmul.f32 %v2044_v1, %v302_v33  ;;  %v395_v46 = vmax.f32 %v363_v31, 0.0  ;;  %v367_v47 = vadd.f32 %v2061_v6, %v334_v32  ;;  %v311_v7 = vld [vmem:[%s1983_s27 + $0xa8] sm:$0xff]  ;;  %v312_v11 = vld [vmem:[%s1983_s27 + $0xb0] sm:$0xff]  ;;  %v313_v15 = vld [vmem:[%s1983_s27 + $0xb8] sm:$0xff] }
  0x23   : > { %261 = vst.msk [vmem:[#allocation2 + $0x60] sm:$0x1] %vm257_vm2, %v1912_v0  ;;  %v338_v48 = vmul.f32 %v2044_v1, %v303_v37  ;;  %v396_v50 = vmax.f32 %v364_v35, 0.0  ;;  %v368_v51 = vadd.f32 %v2061_v6, %v335_v36  ;;  %v339_v52 = vmul.f32 %v2044_v1, %v304_v41  ;;  %v314_v19 = vld [vmem:[%s1983_s27 + $0xc0] sm:$0xff]  ;;  %v315_v23 = vld [vmem:[%s1983_s27 + $0xc8] sm:$0xff]  ;;  %v316_v27 = vld [vmem:[%s1983_s27 + $0xd0] sm:$0xff] }
  0x24   : > { %262 = vst.msk [vmem:[#allocation2 + $0x78] sm:$0x1] %vm257_vm2, %v1912_v0  ;;  %v397_v54 = vmax.f32 %v365_v39, 0.0  ;;  %v369_v55 = vadd.f32 %v2061_v6, %v336_v40  ;;  %v340_v56 = vmul.f32 %v2044_v1, %v305_v45  ;;  %v398_v58 = vmax.f32 %v366_v43, 0.0  ;;  %v317_v31 = vld [vmem:[%s1983_s27 + $0xd8] sm:$0xff]  ;;  %v318_v35 = vld [vmem:[%s1983_s27 + $0xe0] sm:$0xff] }
  0x25   : > { %263 = vst.msk [vmem:[#allocation2 + $0x90] sm:$0x1] %vm257_vm2, %v1912_v0  ;;  %v370_v59 = vadd.f32 %v2061_v6, %v337_v44  ;;  %v341_v60 = vmul.f32 %v2044_v1, %v306_v49  ;;  %v399_v62 = vmax.f32 %v367_v47, 0.0  ;;  %v371_v63 = vadd.f32 %v2061_v6, %v338_v48  ;;  %v319_v39 = vld [vmem:[%s1983_s27 + $0xe8] sm:$0xff]  ;;  %v320_v43 = vld [vmem:[%s1983_s27 + $0xf0] sm:$0xff]  ;;  %v321_v47 = vld [vmem:[%s1983_s27 + $0xf8] sm:$0xff] }
  0x26   : > { %264 = vst.msk [vmem:[#allocation2 + $0xa8] sm:$0x1] %vm257_vm2, %v1912_v0  ;;  %v400_v3 = vmax.f32 %v368_v51, 0.0  ;;  %v372_v4 = vadd.f32 %v2061_v6, %v339_v52  ;;  %v343_v5 = vmul.f32 %v2044_v1, %v308_v57  ;;  %v401_v8 = vmax.f32 %v369_v55, 0.0 }
  0x27   : > { %265 = vst.msk [vmem:[#allocation2 + $0xc0] sm:$0x1] %vm257_vm2, %v1912_v0  ;;  %v373_v9 = vadd.f32 %v2061_v6, %v340_v56  ;;  %v344_v10 = vmul.f32 %v2044_v1, %v309_v61  ;;  %v402_v12 = vmax.f32 %v370_v59, 0.0  ;;  %v374_v13 = vadd.f32 %v2061_v6, %v341_v60 }
  0x28   : > { %266 = vst.msk [vmem:[#allocation2 + $0xd8] sm:$0x1] %vm257_vm2, %v1912_v0  ;;  %v345_v14 = vmul.f32 %v2044_v1, %v310_v2  ;;  %v403_v16 = vmax.f32 %v371_v63, 0.0  ;;  %v346_v18 = vmul.f32 %v2044_v1, %v311_v7  ;;  %v404_v20 = vmax.f32 %v372_v4, 0.0 }
  0x29   : > { %267 = vst.msk [vmem:[#allocation2 + $0xf0] sm:$0x1] %vm257_vm2, %v1912_v0  ;;  %v376_v21 = vadd.f32 %v2061_v6, %v343_v5  ;;  %v347_v22 = vmul.f32 %v2044_v1, %v312_v11  ;;  %v405_v24 = vmax.f32 %v373_v9, 0.0  ;;  %v377_v25 = vadd.f32 %v2061_v6, %v344_v10 }
  0x2a   : > { %268 = vst.msk [vmem:[#allocation2 + $0x108] sm:$0x1] %vm257_vm2, %v1912_v0  ;;  %v406_v28 = vmax.f32 %v374_v13, 0.0  ;;  %v378_v29 = vadd.f32 %v2061_v6, %v345_v14  ;;  %v379_v33 = vadd.f32 %v2061_v6, %v346_v18  ;;  %v356_v56 = vmul.f32 %v2044_v1, %v321_v47 }
  0x2b   : > { %269 = vst.msk [vmem:[#allocation2 + $0x120] sm:$0x1] %vm257_vm2, %v1912_v0  ;;  %v408_v36 = vmax.f32 %v376_v21, 0.0  ;;  %v380_v37 = vadd.f32 %v2061_v6, %v347_v22  ;;  %v409_v40 = vmax.f32 %v377_v25, 0.0 }
  0x2c   : > { %270 = vst.msk [vmem:[#allocation2 + $0x138] sm:$0x1] %vm257_vm2, %v1912_v0  ;;  %v410_v44 = vmax.f32 %v378_v29, 0.0  ;;  %v411_v48 = vmax.f32 %v379_v33, 0.0 }
  0x2d   : > { %271 = vst.msk [vmem:[#allocation2 + $0x150] sm:$0x1] %vm257_vm2, %v1912_v0  ;;  %v412_v51 = vmax.f32 %v380_v37, 0.0 }
  0x2e   : > { %272 = vst.msk [vmem:[#allocation2 + $0x168] sm:$0x1] %vm257_vm2, %v1912_v0 }
  0x2f   : > { %273 = vst.msk [vmem:[#allocation2 + $0x180] sm:$0x1] %vm257_vm2, %v1912_v0 }
  0x30   : > { %274 = vst.msk [vmem:[#allocation2 + $0x29] sm:$0x1] %vm257_vm2, %v1912_v0 }
  0x31   : > { %275 = vst.msk [vmem:[#allocation2 + $0x41] sm:$0x1] %vm257_vm2, %v1912_v0 }
  0x32   : > { %276 = vst.msk [vmem:[#allocation2 + $0x59] sm:$0x1] %vm257_vm2, %v1912_v0 }
  0x33   : > { %277 = vst.msk [vmem:[#allocation2 + $0x71] sm:$0x1] %vm257_vm2, %v1912_v0 }
  0x34   : > { %278 = vst.msk [vmem:[#allocation2 + $0x89] sm:$0x1] %vm257_vm2, %v1912_v0 }
  0x35   : > { %279 = vst.msk [vmem:[#allocation2 + $0xa1] sm:$0x1] %vm257_vm2, %v1912_v0 }
  0x36   : > { %280 = vst.msk [vmem:[#allocation2 + $0xb9] sm:$0x1] %vm257_vm2, %v1912_v0 }
  0x37   : > { %281 = vst.msk [vmem:[#allocation2 + $0xd1] sm:$0x1] %vm257_vm2, %v1912_v0 }
  0x38   : > { %282 = vst.msk [vmem:[#allocation2 + $0xe9] sm:$0x1] %vm257_vm2, %v1912_v0 }
  0x39   : > { %283 = vst.msk [vmem:[#allocation2 + $0x101] sm:$0x1] %vm257_vm2, %v1912_v0 }
  0x3a   : > { %284 = vst.msk [vmem:[#allocation2 + $0x119] sm:$0x1] %vm257_vm2, %v1912_v0 }
  0x3b   : > { %285 = vst.msk [vmem:[#allocation2 + $0x131] sm:$0x1] %vm257_vm2, %v1912_v0 }
  0x3c   : > { %286 = vst.msk [vmem:[#allocation2 + $0x149] sm:$0x1] %vm257_vm2, %v1912_v0 }
  0x3d   : > { %287 = vst.msk [vmem:[#allocation2 + $0x161] sm:$0x1] %vm257_vm2, %v1912_v0 }
  0x3e   : > { %288 = vst.msk [vmem:[#allocation2 + $0x179] sm:$0x1] %vm257_vm2, %v1912_v0 }
  0x3f   : > { %289 = vst.msk [vmem:[#allocation2 + $0x191] sm:$0x1] %vm257_vm2, %v1912_v0  ;;  %v342_v0 = vmul.f32 %v2044_v1, %v307_v53  ;;  %v355_v53 = vmul.f32 %v2044_v1, %v320_v43 }
  0x40   : > { %422 = vst.msk [vmem:[#allocation2 + $0x19] sm:$0xff] %vm247_vm0, %v390_v26  ;;  %v348_v26 = vmul.f32 %v2044_v1, %v313_v15 }
  0x41   : > { %423 = vst.msk [vmem:[#allocation2 + $0x21] sm:$0xff] %vm247_vm0, %v391_v30  ;;  %v375_v17 = vadd.f32 %v2061_v6, %v342_v0  ;;  %v349_v30 = vmul.f32 %v2044_v1, %v314_v19 }
  0x42   : > { %424 = vst.msk [vmem:[#allocation2 + $0x31] sm:$0xff] %vm247_vm0, %v392_v34  ;;  %v350_v34 = vmul.f32 %v2044_v1, %v315_v23  ;;  %v381_v41 = vadd.f32 %v2061_v6, %v348_v26 }
  0x43   : > { %425 = vst.msk [vmem:[#allocation2 + $0x39] sm:$0xff] %vm247_vm0, %v393_v38  ;;  %v407_v32 = vmax.f32 %v375_v17, 0.0  ;;  %v351_v38 = vmul.f32 %v2044_v1, %v316_v27  ;;  %v382_v45 = vadd.f32 %v2061_v6, %v349_v30 }
  0x44   : > { %426 = vst.msk [vmem:[#allocation2 + $0x49] sm:$0xff] %vm247_vm0, %v394_v42  ;;  %v352_v42 = vmul.f32 %v2044_v1, %v317_v31  ;;  %v383_v49 = vadd.f32 %v2061_v6, %v350_v34 }
  0x45   : > { %427 = vst.msk [vmem:[#allocation2 + $0x51] sm:$0xff] %vm247_vm0, %v395_v46  ;;  %v353_v46 = vmul.f32 %v2044_v1, %v318_v35  ;;  %v384_v52 = vadd.f32 %v2061_v6, %v351_v38  ;;  %v414_v57 = vmax.f32 %v382_v45, 0.0 }
  0x46   : > { %428 = vst.msk [vmem:[#allocation2 + $0x61] sm:$0xff] %vm247_vm0, %v396_v50  ;;  %v354_v50 = vmul.f32 %v2044_v1, %v319_v39  ;;  %v385_v55 = vadd.f32 %v2061_v6, %v352_v42  ;;  %v415_v59 = vmax.f32 %v383_v49, 0.0  ;;  %v389_v1 = vadd.f32 %v2061_v6, %v356_v56 }
  0x47   : > { %429 = vst.msk [vmem:[#allocation2 + $0x69] sm:$0xff] %vm247_vm0, %v397_v54  ;;  %v413_v54 = vmax.f32 %v381_v41, 0.0  ;;  %v416_v61 = vmax.f32 %v384_v52, 0.0 }
  0x48   : > { %430 = vst.msk [vmem:[#allocation2 + $0x79] sm:$0xff] %vm247_vm0, %v398_v58  ;;  %v386_v58 = vadd.f32 %v2061_v6, %v353_v46  ;;  %v387_v60 = vadd.f32 %v2061_v6, %v354_v50  ;;  %v417_v63 = vmax.f32 %v385_v55, 0.0  ;;  %v421_v4 = vmax.f32 %v389_v1, 0.0 }
  0x49   : > { %431 = vst.msk [vmem:[#allocation2 + $0x81] sm:$0xff] %vm247_vm0, %v399_v62  ;;  %v388_v62 = vadd.f32 %v2061_v6, %v355_v53 }
  0x4a   : > { %432 = vst.msk [vmem:[#allocation2 + $0x91] sm:$0xff] %vm247_vm0, %v400_v3  ;;  %v418_v0 = vmax.f32 %v386_v58, 0.0  ;;  %v419_v2 = vmax.f32 %v387_v60, 0.0 }
  0x4b   : > { %433 = vst.msk [vmem:[#allocation2 + $0x99] sm:$0xff] %vm247_vm0, %v401_v8  ;;  %v420_v3 = vmax.f32 %v388_v62, 0.0 }
  0x4c   : > { %434 = vst.msk [vmem:[#allocation2 + $0xa9] sm:$0xff] %vm247_vm0, %v402_v12 }
  0x4d   : > { %435 = vst.msk [vmem:[#allocation2 + $0xb1] sm:$0xff] %vm247_vm0, %v403_v16 }
  0x4e   : > { %436 = vst.msk [vmem:[#allocation2 + $0xc1] sm:$0xff] %vm247_vm0, %v404_v20 }
  0x4f   : > { %437 = vst.msk [vmem:[#allocation2 + $0xc9] sm:$0xff] %vm247_vm0, %v405_v24 }
  0x50   : > { %438 = vst.msk [vmem:[#allocation2 + $0xd9] sm:$0xff] %vm247_vm0, %v406_v28 }
  0x51   : > { %439 = vst.msk [vmem:[#allocation2 + $0xe1] sm:$0xff] %vm247_vm0, %v407_v32 }
  0x52   : > { %440 = vst.msk [vmem:[#allocation2 + $0xf1] sm:$0xff] %vm247_vm0, %v408_v36 }
  0x53   : > { %441 = vst.msk [vmem:[#allocation2 + $0xf9] sm:$0xff] %vm247_vm0, %v409_v40 }
  0x54   : > { %442 = vst.msk [vmem:[#allocation2 + $0x109] sm:$0xff] %vm247_vm0, %v410_v44 }
  0x55   : > { %443 = vst.msk [vmem:[#allocation2 + $0x111] sm:$0xff] %vm247_vm0, %v411_v48 }
  0x56   : > { %444 = vst.msk [vmem:[#allocation2 + $0x121] sm:$0xff] %vm247_vm0, %v412_v51 }
  0x57   : > { %445 = vst.msk [vmem:[#allocation2 + $0x129] sm:$0xff] %vm247_vm0, %v413_v54 }
  0x58   : > { %446 = vst.msk [vmem:[#allocation2 + $0x139] sm:$0xff] %vm247_vm0, %v414_v57 }
  0x59   : > { %447 = vst.msk [vmem:[#allocation2 + $0x141] sm:$0xff] %vm247_vm0, %v415_v59 }
  0x5a   : > { %448 = vst.msk [vmem:[#allocation2 + $0x151] sm:$0xff] %vm247_vm0, %v416_v61 }
  0x5b   : > { %449 = vst.msk [vmem:[#allocation2 + $0x159] sm:$0xff] %vm247_vm0, %v417_v63 }
  0x5c   : > { %450 = vst.msk [vmem:[#allocation2 + $0x169] sm:$0xff] %vm247_vm0, %v418_v0 }
  0x5d   : > { %451 = vst.msk [vmem:[#allocation2 + $0x171] sm:$0xff] %vm247_vm0, %v419_v2 }
  0x5e   : > { %452 = vst.msk [vmem:[#allocation2 + $0x181] sm:$0xff] %vm247_vm0, %v420_v3 }
  0x5f   : > { %453 = vst.msk [vmem:[#allocation2 + $0x189] sm:$0xff] %vm247_vm0, %v421_v4 }
  0x60 PF: > { %s1674_s24 = smul.u32 192, %s1894_s15  ;;  %s1913_s26 = smov 8   ;;  %vm473_vm3 = vcmask 64512   ;;  %vm570_vm4 = vcmask 130112   ;;  %vm667_vm5 = vcmask 195712   ;;  %vm767_vm6 = vcmask 261312  }
  0x61   : > { %s1914_s15 = smov 16   ;;  %s1915_s27 = smov 24   ;;  %vm864_vm7 = vcmask 326912   ;;  %vm1357_vm8 = vcmask 1043456   ;;  %vm961_vm9 = vcmask 392512   ;;  %vm1061_vm10 = vcmask 458112  }
  0x62   : > { %s2210_s25 = scalar_lea.vmem [#allocation2], %s1674_s24  ;;  %s1916_s28 = smov 32   ;;  %vm1158_vm11 = vcmask 523712   ;;  %vm1255_vm12 = vcmask 589312   ;;  %vm1332_vm13 = vcmask 588800   ;;  %vm1447_vm14 = vcmask 57344  }
  0x63   : > { %s1917_s29 = smov 40   ;;  %s1918_s30 = smov 48  }
  0x64   : > { %s1919_s5 = smov 56   ;;  %s1920_s7 = smov 64  }
  0x66   : > { %v2213_v6 = vld [vmem:[%s2210_s25 + $0x19] sm:$0xff]  ;;  %v490_v5 = vld [vmem:[%s2210_s25 + $0x1] sm:$0xff]  ;;  %v2220_v7 = vld [vmem:[%s2210_s25 + $0x31] sm:$0xff] }
  0x67   : > { %526 = vrot.lane.b32.xlu1 %v2213_v6, %s1913_s26  ;;  %522 = vrot.lane.b32.xlu0 %v490_v5, %s1913_s26  ;;  %v2225_v8 = vld [vmem:[%s2210_s25 + $0x21] sm:$0xff]  ;;  %v491_v9 = vld [vmem:[%s2210_s25 + $0x9] sm:$0xff] }
  0x68   : > { %530 = vrot.lane.b32.xlu2 %v2220_v7, %s1913_s26  ;;  %v2229_v10 = vld [vmem:[%s2210_s25 + $0x39] sm:$0xff]  ;;  %v2237_v11 = vld [vmem:[%s2210_s25 + $0x51] sm:$0xff]  ;;  %v2240_v12 = vld [vmem:[%s2210_s25 + $0x49] sm:$0xff] }
  0x69   : > { %v2243_v13 = vld [vmem:[%s2210_s25 + $0x61] sm:$0xff]  ;;  %v2252_v14 = vld [vmem:[%s2210_s25 + $0x79] sm:$0xff]  ;;  %v2255_v15 = vld [vmem:[%s2210_s25 + $0x69] sm:$0xff] }
  0x6a   : > { %v2258_v16 = vld [vmem:[%s2210_s25 + $0x81] sm:$0xff]  ;;  %v2267_v17 = vld [vmem:[%s2210_s25 + $0x99] sm:$0xff]  ;;  %v2270_v18 = vld [vmem:[%s2210_s25 + $0x91] sm:$0xff] }
  0x6b   : > { %v2273_v19 = vld [vmem:[%s2210_s25 + $0xa9] sm:$0xff]  ;;  %v2283_v21 = vld [vmem:[%s2210_s25 + $0xb1] sm:$0xff]  ;;  %v2294_v24 = vld [vmem:[%s2210_s25 + $0x1a] sm:$0xff] }
  0x6c   : > { %v587_v20 = vld [vmem:[%s2210_s25 + $0x2] sm:$0xff]  ;;  %v588_v22 = vld [vmem:[%s2210_s25 + $0xa] sm:$0xff]  ;;  %v2297_v25 = vld [vmem:[%s2210_s25 + $0x32] sm:$0xff] }
  0x6d   : > { %v2291_v23 = vld [vmem:[%s2210_s25 + $0x22] sm:$0xff]  ;;  %v2306_v26 = vld [vmem:[%s2210_s25 + $0x4a] sm:$0xff]  ;;  %v2309_v27 = vld [vmem:[%s2210_s25 + $0x3a] sm:$0xff] }
  0x6e   : > { %v2312_v28 = vld [vmem:[%s2210_s25 + $0x52] sm:$0xff]  ;;  %v2321_v29 = vld [vmem:[%s2210_s25 + $0x6a] sm:$0xff]  ;;  %v2324_v30 = vld [vmem:[%s2210_s25 + $0x62] sm:$0xff] }
  0x6f   : > { %528 = vrot.lane.b32.xlu1 %v2225_v8, %s1913_s26  ;;  %524 = vrot.lane.b32.xlu0 %v491_v9, %s1913_s26  ;;  %v2327_v31 = vld [vmem:[%s2210_s25 + $0x7a] sm:$0xff]  ;;  %v2336_v32 = vld [vmem:[%s2210_s25 + $0x92] sm:$0xff] }
  0x70   : > { %532 = vrot.lane.b32.xlu2 %v2229_v10, %s1913_s26  ;;  %v2339_v33 = vld [vmem:[%s2210_s25 + $0x82] sm:$0xff]  ;;  %v2342_v34 = vld [vmem:[%s2210_s25 + $0x9a] sm:$0xff]  ;;  %v2351_v35 = vld [vmem:[%s2210_s25 + $0xb2] sm:$0xff] }
  0x71   : > { %v2354_v36 = vld [vmem:[%s2210_s25 + $0xaa] sm:$0xff]  ;;  %v1677_v37 = vld [vmem:[%s2210_s25 + $0x18] sm:$0xff]  ;;  %v457_v39 = vld [vmem:[%s2210_s25] sm:$0xff] }
  0x72   : > { %v2362_v38 = vld [vmem:[%s2210_s25 + $0x30] sm:$0xff]  ;;  %476 = vst.msk [vmem:[#allocation3 + $0x10] sm:$0xff] %vm473_vm3, %v1677_v37  ;;  %v2370_v40 = vld [vmem:[%s2210_s25 + $0x38] sm:$0xff]  ;;  %v1678_v41 = vld [vmem:[%s2210_s25 + $0x20] sm:$0xff] }
  0x73   : > { %478 = vst.msk [vmem:[#allocation3 + $0x20] sm:$0xff] %vm473_vm3, %v2362_v38  ;;  %v2377_v42 = vld [vmem:[%s2210_s25 + $0x60] sm:$0xff]  ;;  %v2381_v43 = vld [vmem:[%s2210_s25 + $0x50] sm:$0xff]  ;;  %v2386_v44 = vld [vmem:[%s2210_s25 + $0x48] sm:$0xff] }
  0x74   : > { %474 = vst.msk [vmem:[#allocation3] sm:$0xff] %vm473_vm3, %v457_v39  ;;  %v2394_v45 = vld [vmem:[%s2210_s25 + $0x78] sm:$0xff]  ;;  %v2399_v46 = vld [vmem:[%s2210_s25 + $0x68] sm:$0xff]  ;;  %v2416_v50 = vld [vmem:[%s2210_s25 + $0x80] sm:$0xff] }
  0x75   : > { %479 = vst.msk [vmem:[#allocation3 + $0x28] sm:$0xff] %vm473_vm3, %v2370_v40  ;;  %v458_v47 = vld [vmem:[%s2210_s25 + $0x8] sm:$0xff]  ;;  %v2409_v48 = vld [vmem:[%s2210_s25 + $0x98] sm:$0xff]  ;;  %v2419_v51 = vld [vmem:[%s2210_s25 + $0x90] sm:$0xff] }
  0x76   : > { %477 = vst.msk [vmem:[#allocation3 + $0x18] sm:$0xff] %vm473_vm3, %v1678_v41  ;;  %v2424_v52 = vld [vmem:[%s2210_s25 + $0xb0] sm:$0xff]  ;;  %v2438_v54 = vld [vmem:[%s2210_s25 + $0xa8] sm:$0xff]  ;;  %v2458_v59 = vld [vmem:[%s2210_s25 + $0xc0] sm:$0xff] }
  0x77   : > { %536 = vrot.lane.b32.xlu1 %v2237_v11, %s1913_s26  ;;  %534 = vrot.lane.b32.xlu0 %v2240_v12, %s1913_s26  ;;  %482 = vst.msk [vmem:[#allocation3 + $0x40] sm:$0xff] %vm473_vm3, %v2377_v42 }
  0x78   : > { %538 = vrot.lane.b32.xlu2 %v2243_v13, %s1913_s26  ;;  %481 = vst.msk [vmem:[#allocation3 + $0x38] sm:$0xff] %vm473_vm3, %v2381_v43 }
  0x79   : > { %480 = vst.msk [vmem:[#allocation3 + $0x30] sm:$0xff] %vm473_vm3, %v2386_v44 }
  0x7a   : > { %484 = vst.msk [vmem:[#allocation3 + $0x50] sm:$0xff] %vm473_vm3, %v2394_v45 }
  0x7b   : > { %483 = vst.msk [vmem:[#allocation3 + $0x48] sm:$0xff] %vm473_vm3, %v2399_v46 }
  0x7c   : > { %475 = vst.msk [vmem:[#allocation3 + $0x8] sm:$0xff] %vm473_vm3, %v458_v47 }
  0x7d   : > { %487 = vst.msk [vmem:[#allocation3 + $0x68] sm:$0xff] %vm473_vm3, %v2409_v48 }
  0x7e   : > { %485 = vst.msk [vmem:[#allocation3 + $0x58] sm:$0xff] %vm473_vm3, %v2416_v50 }
  0x7f   : > { %542 = vrot.lane.b32.xlu1 %v2252_v14, %s1913_s26  ;;  %540 = vrot.lane.b32.xlu0 %v2255_v15, %s1913_s26  ;;  %486 = vst.msk [vmem:[#allocation3 + $0x60] sm:$0xff] %vm473_vm3, %v2419_v51 }
  0x80   : > { %544 = vrot.lane.b32.xlu2 %v2258_v16, %s1913_s26  ;;  %489 = vst.msk [vmem:[#allocation3 + $0x78] sm:$0xff] %vm473_vm3, %v2424_v52 }
  0x81   : > { %488 = vst.msk [vmem:[#allocation3 + $0x70] sm:$0xff] %vm473_vm3, %v2438_v54 }
  0x87   : > { %548 = vrot.lane.b32.xlu1 %v2267_v17, %s1913_s26  ;;  %546 = vrot.lane.b32.xlu0 %v2270_v18, %s1913_s26 }
  0x88   : > { %550 = vrot.lane.b32.xlu2 %v2273_v19, %s1913_s26 }
  0x8f   : > { %619 = vrot.lane.b32.xlu1 %v587_v20, %s1914_s15  ;;  %552 = vrot.lane.b32.xlu0 %v2283_v21, %s1913_s26 }
  0x90   : > { %621 = vrot.lane.b32.xlu2 %v588_v22, %s1914_s15 }
  0x97   : > { %625 = vrot.lane.b32.xlu1 %v2291_v23, %s1914_s15  ;;  %623 = vrot.lane.b32.xlu0 %v2294_v24, %s1914_s15 }
  0x98   : > { %627 = vrot.lane.b32.xlu2 %v2297_v25, %s1914_s15 }
  0x9f   : > { %631 = vrot.lane.b32.xlu1 %v2306_v26, %s1914_s15  ;;  %629 = vrot.lane.b32.xlu0 %v2309_v27, %s1914_s15 }
  0xa0   : > { %633 = vrot.lane.b32.xlu2 %v2312_v28, %s1914_s15 }
  0xa7   : > { %637 = vrot.lane.b32.xlu1 %v2321_v29, %s1914_s15  ;;  %635 = vrot.lane.b32.xlu0 %v2324_v30, %s1914_s15 }
  0xa8   : > { %639 = vrot.lane.b32.xlu2 %v2327_v31, %s1914_s15 }
  0xaf   : > { %643 = vrot.lane.b32.xlu1 %v2336_v32, %s1914_s15  ;;  %641 = vrot.lane.b32.xlu0 %v2339_v33, %s1914_s15 }
  0xb0   : > { %645 = vrot.lane.b32.xlu2 %v2342_v34, %s1914_s15 }
  0xb7   : > { %649 = vrot.lane.b32.xlu1 %v2351_v35, %s1914_s15  ;;  %647 = vrot.lane.b32.xlu0 %v2354_v36, %s1914_s15 }
  0xb8   : > { %719 = vrot.lane.b32.xlu2 %v1677_v37, %s1915_s27 }
  0xbf   : > { %723 = vrot.lane.b32.xlu1 %v2362_v38, %s1915_s27  ;;  %721 = vrot.lane.b32.xlu0 %v1678_v41, %s1915_s27 }
  0xc0   : > { %725 = vrot.lane.b32.xlu2 %v2370_v40, %s1915_s27 }
  0xc2   : > { %v531_v49 = vpop.permute.xlu2 %530 }
  0xc3   : > { %575 = vst.msk [vmem:[#allocation3 + $0x20] sm:$0xff] %vm570_vm4, %v531_v49 }
  0xc7   : > { %729 = vrot.lane.b32.xlu1 %v2381_v43, %s1915_s27  ;;  %727 = vrot.lane.b32.xlu0 %v2386_v44, %s1915_s27 }
  0xc8   : > { %731 = vrot.lane.b32.xlu2 %v2377_v42, %s1915_s27 }
  0xca   : > { %v533_v53 = vpop.permute.xlu2 %532 }
  0xcb   : > { %576 = vst.msk [vmem:[#allocation3 + $0x28] sm:$0xff] %vm570_vm4, %v533_v53 }
  0xcf   : > { %735 = vrot.lane.b32.xlu1 %v2394_v45, %s1915_s27  ;;  %733 = vrot.lane.b32.xlu0 %v2399_v46, %s1915_s27 }
  0xd0   : > { %737 = vrot.lane.b32.xlu2 %v2416_v50, %s1915_s27 }
  0xd2   : > { %v539_v55 = vpop.permute.xlu2 %538 }
  0xd3   : > { %579 = vst.msk [vmem:[#allocation3 + $0x40] sm:$0xff] %vm570_vm4, %v539_v55 }
  0xd7   : > { %741 = vrot.lane.b32.xlu1 %v2409_v48, %s1915_s27  ;;  %739 = vrot.lane.b32.xlu0 %v2419_v51, %s1915_s27 }
  0xd8   : > { %743 = vrot.lane.b32.xlu2 %v2438_v54, %s1915_s27 }
  0xd9   : > { %v527_v56 = vpop.permute.xlu1 %526  ;;  %v523_v57 = vpop.permute.xlu0 %522 }
  0xda   : > { %573 = vst.msk [vmem:[#allocation3 + $0x10] sm:$0xff] %vm570_vm4, %v527_v56  ;;  %v545_v58 = vpop.permute.xlu2 %544 }
  0xdb   : > { %571 = vst.msk [vmem:[#allocation3] sm:$0xff] %vm570_vm4, %v523_v57 }
  0xdc   : > { %582 = vst.msk [vmem:[#allocation3 + $0x58] sm:$0xff] %vm570_vm4, %v545_v58 }
  0xdf   : > { %747 = vrot.lane.b32.xlu1 %v2458_v59, %s1915_s27  ;;  %745 = vrot.lane.b32.xlu0 %v2424_v52, %s1915_s27 }
  0xe0   : > { %816 = vrot.lane.b32.xlu2 %v2213_v6, %s1916_s28 }
  0xe1   : > { %v529_v60 = vpop.permute.xlu1 %528  ;;  %v525_v61 = vpop.permute.xlu0 %524 }
  0xe2   : > { %574 = vst.msk [vmem:[#allocation3 + $0x18] sm:$0xff] %vm570_vm4, %v529_v60  ;;  %v551_v62 = vpop.permute.xlu2 %550 }
  0xe3   : > { %572 = vst.msk [vmem:[#allocation3 + $0x8] sm:$0xff] %vm570_vm4, %v525_v61 }
  0xe4   : > { %585 = vst.msk [vmem:[#allocation3 + $0x70] sm:$0xff] %vm570_vm4, %v551_v62 }
  0xe7   : > { %913 = vrot.lane.b32.xlu1 %v2294_v24, %s1917_s29  ;;  %818 = vrot.lane.b32.xlu0 %v2225_v8, %s1916_s28 }
  0xe8   : > { %915 = vrot.lane.b32.xlu2 %v2291_v23, %s1917_s29 }
  0xe9   : > { %v537_v63 = vpop.permute.xlu1 %536  ;;  %v535_v1 = vpop.permute.xlu0 %534 }
  0xea   : > { %578 = vst.msk [vmem:[#allocation3 + $0x38] sm:$0xff] %vm570_vm4, %v537_v63  ;;  %v622_v0 = vpop.permute.xlu2 %621 }
  0xeb   : > { %577 = vst.msk [vmem:[#allocation3 + $0x30] sm:$0xff] %vm570_vm4, %v535_v1 }
  0xec   : > { %669 = vst.msk [vmem:[#allocation3 + $0x8] sm:$0xff] %vm667_vm5, %v622_v0 }
  0xef   : > { %1015 = vrot.lane.b32.xlu1 %v2370_v40, %s1918_s30  ;;  %1013 = vrot.lane.b32.xlu0 %v2362_v38, %s1918_s30 }
  0xf0   : > { %1110 = vrot.lane.b32.xlu2 %v2220_v7, %s1919_s5 }
  0xf1   : > { %v543_v2 = vpop.permute.xlu1 %542  ;;  %v541_v3 = vpop.permute.xlu0 %540 }
  0xf2   : > { %581 = vst.msk [vmem:[#allocation3 + $0x50] sm:$0xff] %vm570_vm4, %v543_v2  ;;  %v628_v4 = vpop.permute.xlu2 %627  ;;  %v1805_v2 = vld [vmem:[%s2876_s2 + $0x18] sm:$0xff] }
  0xf3   : > { %580 = vst.msk [vmem:[#allocation3 + $0x48] sm:$0xff] %vm570_vm4, %v541_v3 }
  0xf4   : > { %672 = vst.msk [vmem:[#allocation3 + $0x20] sm:$0xff] %vm667_vm5, %v628_v4  ;;  %v1804_v4 = vld [vmem:[%s2876_s2 + $0x10] sm:$0xff] }
  0xf7   : > { %1207 = vrot.lane.b32.xlu1 %v2297_v25, %s1920_s7  ;;  %1112 = vrot.lane.b32.xlu0 %v2229_v10, %s1919_s5 }
  0xf8   : > { %1209 = vrot.lane.b32.xlu2 %v2309_v27, %s1920_s7 }
  0xf9   : > { %v549_v6 = vpop.permute.xlu1 %548  ;;  %v547_v5 = vpop.permute.xlu0 %546 }
  0xfa   : > { %584 = vst.msk [vmem:[#allocation3 + $0x68] sm:$0xff] %vm570_vm4, %v549_v6  ;;  %v634_v8 = vpop.permute.xlu2 %633 }
  0xfb   : > { %583 = vst.msk [vmem:[#allocation3 + $0x60] sm:$0xff] %vm570_vm4, %v547_v5 }
  0xfc   : > { %675 = vst.msk [vmem:[#allocation3 + $0x38] sm:$0xff] %vm667_vm5, %v634_v8 }
  0xff   : > { %826 = vrot.lane.b32.xlu1 %v2237_v11, %s1916_s28  ;;  %824 = vrot.lane.b32.xlu0 %v2240_v12, %s1916_s28 }
 0x100   : > { %921 = vrot.lane.b32.xlu2 %v2306_v26, %s1917_s29 }
 0x101   : > { %v620_v9 = vpop.permute.xlu1 %619  ;;  %v553_v20 = vpop.permute.xlu0 %552 }
 0x102   : > { %668 = vst.msk [vmem:[#allocation3] sm:$0xff] %vm667_vm5, %v620_v9  ;;  %v640_v22 = vpop.permute.xlu2 %639  ;;  %v1802_v9 = vld [vmem:[%s2876_s2] sm:$0xff] }
 0x103   : > { %586 = vst.msk [vmem:[#allocation3 + $0x78] sm:$0xff] %vm570_vm4, %v553_v20 }
 0x104   : > { %678 = vst.msk [vmem:[#allocation3 + $0x50] sm:$0xff] %vm667_vm5, %v640_v22 }
 0x107   : > { %832 = vrot.lane.b32.xlu1 %v2252_v14, %s1916_s28  ;;  %923 = vrot.lane.b32.xlu0 %v2312_v28, %s1917_s29 }
 0x108   : > { %834 = vrot.lane.b32.xlu2 %v2258_v16, %s1916_s28 }
 0x109   : > { %v626_v23 = vpop.permute.xlu1 %625  ;;  %v624_v24 = vpop.permute.xlu0 %623 }
 0x10a   : > { %671 = vst.msk [vmem:[#allocation3 + $0x18] sm:$0xff] %vm667_vm5, %v626_v23  ;;  %v646_v37 = vpop.permute.xlu2 %645  ;;  %v2621_v23 = vld [vmem:[%s2210_s25 + $0xc9] sm:$0xff] }
 0x10b   : > { %670 = vst.msk [vmem:[#allocation3 + $0x10] sm:$0xff] %vm667_vm5, %v624_v24  ;;  %v2627_v24 = vld [vmem:[%s2210_s25 + $0xc2] sm:$0xff] }
 0x10c   : > { %681 = vst.msk [vmem:[#allocation3 + $0x68] sm:$0xff] %vm667_vm5, %v646_v37 }
 0x10f   : > { %1023 = vrot.lane.b32.xlu1 %v2399_v46, %s1918_s30  ;;  %1021 = vrot.lane.b32.xlu0 %v2377_v42, %s1918_s30 }
 0x110   : > { %929 = vrot.lane.b32.xlu2 %v2327_v31, %s1917_s29 }
 0x111   : > { %v632_v38 = vpop.permute.xlu1 %631  ;;  %v630_v39 = vpop.permute.xlu0 %629 }
 0x112   : > { %674 = vst.msk [vmem:[#allocation3 + $0x30] sm:$0xff] %vm667_vm5, %v632_v38  ;;  %v720_v40 = vpop.permute.xlu2 %719 }
 0x113   : > { %673 = vst.msk [vmem:[#allocation3 + $0x28] sm:$0xff] %vm667_vm5, %v630_v39  ;;  %v2638_v39 = vld [vmem:[%s2210_s25 + $0xca] sm:$0xff] }
 0x114   : > { %768 = vst.msk [vmem:[#allocation3] sm:$0xff] %vm767_vm6, %v720_v40 }
 0x117   : > { %1118 = vrot.lane.b32.xlu1 %v2243_v13, %s1919_s5  ;;  %931 = vrot.lane.b32.xlu0 %v2339_v33, %s1917_s29 }
 0x118   : > { %1120 = vrot.lane.b32.xlu2 %v2255_v15, %s1919_s5 }
 0x119   : > { %v638_v41 = vpop.permute.xlu1 %637  ;;  %v636_v42 = vpop.permute.xlu0 %635 }
 0x11a   : > { %677 = vst.msk [vmem:[#allocation3 + $0x48] sm:$0xff] %vm667_vm5, %v638_v41  ;;  %v726_v46 = vpop.permute.xlu2 %725 }
 0x11b   : > { %676 = vst.msk [vmem:[#allocation3 + $0x40] sm:$0xff] %vm667_vm5, %v636_v42 }
 0x11c   : > { %771 = vst.msk [vmem:[#allocation3 + $0x18] sm:$0xff] %vm767_vm6, %v726_v46 }
 0x11f   : > { %1031 = vrot.lane.b32.xlu1 %v2409_v48, %s1918_s30  ;;  %1029 = vrot.lane.b32.xlu0 %v2419_v51, %s1918_s30 }
 0x120   : > { %1215 = vrot.lane.b32.xlu2 %v2324_v30, %s1920_s7 }
 0x121   : > { %v644_v47 = vpop.permute.xlu1 %643  ;;  %v642_v49 = vpop.permute.xlu0 %641 }
 0x122   : > { %680 = vst.msk [vmem:[#allocation3 + $0x60] sm:$0xff] %vm667_vm5, %v644_v47  ;;  %v732_v53 = vpop.permute.xlu2 %731 }
 0x123   : > { %679 = vst.msk [vmem:[#allocation3 + $0x58] sm:$0xff] %vm667_vm5, %v642_v49 }
 0x124   : > { %774 = vst.msk [vmem:[#allocation3 + $0x30] sm:$0xff] %vm767_vm6, %v732_v53 }
 0x127   : > { %1126 = vrot.lane.b32.xlu1 %v2270_v18, %s1919_s5  ;;  %1217 = vrot.lane.b32.xlu0 %v2321_v29, %s1920_s7 }
 0x128   : > { %1128 = vrot.lane.b32.xlu2 %v2267_v17, %s1919_s5 }
 0x129   : > { %v650_v48 = vpop.permute.xlu1 %649  ;;  %v648_v51 = vpop.permute.xlu0 %647 }
 0x12a   : > { %683 = vst.msk [vmem:[#allocation3 + $0x78] sm:$0xff] %vm667_vm5, %v650_v48  ;;  %v738_v55 = vpop.permute.xlu2 %737 }
 0x12b   : > { %682 = vst.msk [vmem:[#allocation3 + $0x70] sm:$0xff] %vm667_vm5, %v648_v51 }
 0x12c   : > { %777 = vst.msk [vmem:[#allocation3 + $0x48] sm:$0xff] %vm767_vm6, %v738_v55 }
 0x12f   : > { %1225 = vrot.lane.b32.xlu1 %v2342_v34, %s1920_s7  ;;  %1223 = vrot.lane.b32.xlu0 %v2336_v32, %s1920_s7 }
 0x130   : > { %820 = vrot.lane.b32.xlu2 %v2220_v7, %s1916_s28 }
 0x131   : > { %v724_v56 = vpop.permute.xlu1 %723  ;;  %v722_v57 = vpop.permute.xlu0 %721 }
 0x132   : > { %770 = vst.msk [vmem:[#allocation3 + $0x10] sm:$0xff] %vm767_vm6, %v724_v56  ;;  %v744_v58 = vpop.permute.xlu2 %743  ;;  %v1741_v56 = vld [vmem:[%s2210_s25 + $0xd8] sm:$0xff] }
 0x133   : > { %769 = vst.msk [vmem:[#allocation3 + $0x8] sm:$0xff] %vm767_vm6, %v722_v57 }
 0x134   : > { %780 = vst.msk [vmem:[#allocation3 + $0x60] sm:$0xff] %vm767_vm6, %v744_v58 }
 0x137   : > { %917 = vrot.lane.b32.xlu1 %v2297_v25, %s1917_s29  ;;  %822 = vrot.lane.b32.xlu0 %v2229_v10, %s1916_s28  ;;  %v1304_v25 = vld [vmem:[%s2876_s2 + $0x20] sm:$0xf] }
 0x138   : > { %919 = vrot.lane.b32.xlu2 %v2309_v27, %s1917_s29  ;;  %v1322_v62 = vunpack.c.l.b16 %v1304_v25 }
 0x139   : > { %v730_v60 = vpop.permute.xlu1 %729  ;;  %v728_v61 = vpop.permute.xlu0 %727 }
 0x13a   : > { %773 = vst.msk [vmem:[#allocation3 + $0x28] sm:$0xff] %vm767_vm6, %v730_v60  ;;  %v817_v7 = vpop.permute.xlu2 %816  ;;  %v1327_v10 = vpack.c.b16 %v1322_v62, %v1322_v62  ;;  %v1757_v62 = vld [vmem:[%s2210_s25 + $0xd9] sm:$0xff] }
 0x13b   : > { %772 = vst.msk [vmem:[#allocation3 + $0x20] sm:$0xff] %vm767_vm6, %v728_v61 }
 0x13c   : > { %865 = vst.msk [vmem:[#allocation3] sm:$0xff] %vm864_vm7, %v817_v7  ;;  %v1359_v1 = vsel %vm1357_vm8, %v1327_v10, 0  ;;  %v1742_v10 = vld [vmem:[%s2210_s25 + $0xe0] sm:$0xff] }
 0x13d   : > { %1364 = vmatpush.bf16.msra.mxu0 %v1359_v1  ;;  %1806 = vmatpush.bf16.msra.mxu1 %v1359_v1 }
 0x13e   : > { %1807 = vmatpush.bf16.msra.mxu2 %v1359_v1  ;;  %1808 = vmatpush.bf16.msra.mxu3 %v1359_v1 }
 0x13f   : > { %842 = vrot.lane.b32.xlu1 %v2283_v21, %s1916_s28  ;;  %840 = vrot.lane.b32.xlu0 %v2273_v19, %s1916_s28 }
 0x140   : > { %1017 = vrot.lane.b32.xlu2 %v2386_v44, %s1918_s30 }
 0x141   : > { %v736_v27 = vpop.permute.xlu1 %735  ;;  %v734_v63 = vpop.permute.xlu0 %733  ;;  %1365 = vmatpush.bf16.msra.mxu0 %v1805_v2  ;;  %1809 = vmatpush.bf16.msra.mxu1 %v1805_v2 }
 0x142   : > { %776 = vst.msk [vmem:[#allocation3 + $0x40] sm:$0xff] %vm767_vm6, %v736_v27  ;;  %v916_v0 = vpop.permute.xlu2 %915  ;;  %1810 = vmatpush.bf16.msra.mxu2 %v1805_v2  ;;  %1811 = vmatpush.bf16.msra.mxu3 %v1805_v2  ;;  %v1758_v27 = vld [vmem:[%s2210_s25 + $0xe1] sm:$0xff] }
 0x143   : > { %775 = vst.msk [vmem:[#allocation3 + $0x38] sm:$0xff] %vm767_vm6, %v734_v63  ;;  %v1774_v2 = vld [vmem:[%s2210_s25 + $0xe2] sm:$0xff] }
 0x145   : > { %1366 = vmatpush.bf16.msra.mxu0 %v1804_v4  ;;  %1812 = vmatpush.bf16.msra.mxu1 %v1804_v4 }
 0x146   : > { %1813 = vmatpush.bf16.msra.mxu2 %v1804_v4  ;;  %1814 = vmatpush.bf16.msra.mxu3 %v1804_v4 }
 0x147   : > { %937 = vrot.lane.b32.xlu1 %v2354_v36, %s1917_s29  ;;  %1019 = vrot.lane.b32.xlu0 %v2381_v43, %s1918_s30  ;;  %v1803_v43 = vld [vmem:[%s2876_s2 + $0x8] sm:$0xff] }
 0x148   : > { %939 = vrot.lane.b32.xlu2 %v2351_v35, %s1917_s29 }
 0x149   : > { %v742_v44 = vpop.permute.xlu1 %741  ;;  %v740_v3 = vpop.permute.xlu0 %739  ;;  %1367 = vmatpush.bf16.msra.mxu0 %v1803_v43  ;;  %1815 = vmatpush.bf16.msra.mxu1 %v1803_v43 }
 0x14a   : > { %779 = vst.msk [vmem:[#allocation3 + $0x58] sm:$0xff] %vm767_vm6, %v742_v44  ;;  %v1111_v6 = vpop.permute.xlu2 %1110  ;;  %1816 = vmatpush.bf16.msra.mxu2 %v1803_v43  ;;  %1817 = vmatpush.bf16.msra.mxu3 %v1803_v43  ;;  %v1773_v44 = vld [vmem:[%s2210_s25 + $0xda] sm:$0xff] }
 0x14b   : > { %778 = vst.msk [vmem:[#allocation3 + $0x50] sm:$0xff] %vm767_vm6, %v740_v3 }
 0x14d   : > { %1368 = vmatpush.bf16.msra.mxu0 %v1802_v9  ;;  %1818 = vmatpush.bf16.msra.mxu1 %v1802_v9 }
 0x14e   : > { %1819 = vmatpush.bf16.msra.mxu2 %v1802_v9  ;;  %1820 = vmatpush.bf16.msra.mxu3 %v1802_v9 }
 0x14f   : > { %1116 = vrot.lane.b32.xlu1 %v2237_v11, %s1919_s5  ;;  %1114 = vrot.lane.b32.xlu0 %v2240_v12, %s1919_s5  ;;  %v2609_v12 = vld [vmem:[%s2210_s25 + $0xc8] sm:$0xff] }
 0x150   : > { %1037 = vrot.lane.b32.xlu2 %v2458_v59, %s1918_s30 }
 0x151   : > { %v748_v5 = vpop.permute.xlu1 %747  ;;  %v746_v8 = vpop.permute.xlu0 %745 }
 0x152   : > { %782 = vst.msk [vmem:[#allocation3 + $0x70] sm:$0xff] %vm767_vm6, %v748_v5  ;;  %v1210_v11 = vpop.permute.xlu2 %1209 }
 0x153   : > { %781 = vst.msk [vmem:[#allocation3 + $0x68] sm:$0xff] %vm767_vm6, %v746_v8 }
 0x157   : > { %1211 = vrot.lane.b32.xlu1 %v2306_v26, %s1920_s7  ;;  %1039 = vrot.lane.b32.xlu0 %v2609_v12, %s1918_s30  ;;  %v2624_v26 = vld [vmem:[%s2210_s25 + $0xc1] sm:$0xff] }
 0x158   : > { %1213 = vrot.lane.b32.xlu2 %v2312_v28, %s1920_s7 }
 0x159   : > { %v914_v59 = vpop.permute.xlu1 %913  ;;  %v819_v20 = vpop.permute.xlu0 %818 }
 0x15a   : > { %962 = vst.msk [vmem:[#allocation3] sm:$0xff] %vm961_vm9, %v914_v59  ;;  %v922_v22 = vpop.permute.xlu2 %921 }
 0x15b   : > { %866 = vst.msk [vmem:[#allocation3 + $0x8] sm:$0xff] %vm864_vm7, %v819_v20 }
 0x15c   : > { %963 = vst.msk [vmem:[#allocation3 + $0x8] sm:$0xff] %vm961_vm9, %v916_v0 }
 0x15f   : > { %1136 = vrot.lane.b32.xlu1 %v2621_v23, %s1919_s5  ;;  %1134 = vrot.lane.b32.xlu0 %v2624_v26, %s1919_s5 }
 0x160   : > { %1231 = vrot.lane.b32.xlu2 %v2627_v24, %s1920_s7 }
 0x161   : > { %v1016_v28 = vpop.permute.xlu1 %1015  ;;  %v1014_v37 = vpop.permute.xlu0 %1013 }
 0x162   : > { %1063 = vst.msk [vmem:[#allocation3 + $0x8] sm:$0xff] %vm1061_vm10, %v1016_v28  ;;  %v835_v38 = vpop.permute.xlu2 %834 }
 0x163   : > { %1062 = vst.msk [vmem:[#allocation3] sm:$0xff] %vm1061_vm10, %v1014_v37 }
 0x164   : > { %1159 = vst.msk [vmem:[#allocation3] sm:$0xff] %vm1158_vm11, %v1111_v6 }
 0x165   : > { %874 = vst.msk [vmem:[#allocation3 + $0x48] sm:$0xff] %vm864_vm7, %v835_v38 }
 0x167   : > { %828 = vrot.lane.b32.xlu1 %v2243_v13, %s1916_s28  ;;  %1233 = vrot.lane.b32.xlu0 %v2638_v39, %s1920_s7 }
 0x168   : > { %830 = vrot.lane.b32.xlu2 %v2255_v15, %s1916_s28 }
 0x169   : > { %v1208_v40 = vpop.permute.xlu1 %1207  ;;  %v1113_v41 = vpop.permute.xlu0 %1112 }
 0x16a   : > { %1256 = vst.msk [vmem:[#allocation3] sm:$0xff] %vm1255_vm12, %v1208_v40  ;;  %v930_v42 = vpop.permute.xlu2 %929 }
 0x16b   : > { %1160 = vst.msk [vmem:[#allocation3 + $0x8] sm:$0xff] %vm1158_vm11, %v1113_v41 }
 0x16c   : > { %1257 = vst.msk [vmem:[#allocation3 + $0x8] sm:$0xff] %vm1255_vm12, %v1210_v11 }
 0x16f   : > { %927 = vrot.lane.b32.xlu1 %v2321_v29, %s1917_s29  ;;  %925 = vrot.lane.b32.xlu0 %v2324_v30, %s1917_s29 }
 0x170   : > { %836 = vrot.lane.b32.xlu2 %v2270_v18, %s1916_s28 }
 0x171   : > { %v827_v13 = vpop.permute.xlu1 %826  ;;  %v825_v46 = vpop.permute.xlu0 %824  ;;  %v1272_v47 = vld [vmem:[#allocation3] sm:$0xff] }
 0x172   : > { %870 = vst.msk [vmem:[#allocation3 + $0x28] sm:$0xff] %vm864_vm7, %v827_v13  ;;  %v1121_v49 = vpop.permute.xlu2 %1120 }
 0x173   : > { %869 = vst.msk [vmem:[#allocation3 + $0x20] sm:$0xff] %vm864_vm7, %v825_v46  ;;  %v1273_v15 = vld [vmem:[#allocation3 + $0x8] sm:$0xff] }
 0x174   : > { %966 = vst.msk [vmem:[#allocation3 + $0x20] sm:$0xff] %vm961_vm9, %v922_v22  ;;  %v1288_v53 = vpack.c.bf16 %v1273_v15, %v1272_v47 }
 0x176   : > { %1791 = vmatmul.msk.bf16.vlgmr.msra.gmra.mxu0 %vm1332_vm13, %v1288_v53 }
 0x177   : > { %1025 = vrot.lane.b32.xlu1 %v2394_v45, %s1918_s30  ;;  %838 = vrot.lane.b32.xlu0 %v2267_v17, %s1916_s28 }
 0x178   : > { %1027 = vrot.lane.b32.xlu2 %v2416_v50, %s1918_s30 }
 0x179   : > { %v833_v29 = vpop.permute.xlu1 %832  ;;  %v924_v18 = vpop.permute.xlu0 %923 }
 0x17a   : > { %873 = vst.msk [vmem:[#allocation3 + $0x40] sm:$0xff] %vm864_vm7, %v833_v29  ;;  %v1216_v30 = vpop.permute.xlu2 %1215 }
 0x17b   : > { %967 = vst.msk [vmem:[#allocation3 + $0x28] sm:$0xff] %vm961_vm9, %v924_v18 }
 0x17c   : > { %970 = vst.msk [vmem:[#allocation3 + $0x40] sm:$0xff] %vm961_vm9, %v930_v42 }
 0x17f   : > { %935 = vrot.lane.b32.xlu1 %v2342_v34, %s1917_s29  ;;  %933 = vrot.lane.b32.xlu0 %v2336_v32, %s1917_s29 }
 0x180   : > { %1122 = vrot.lane.b32.xlu2 %v2252_v14, %s1919_s5 }
 0x181   : > { %v1024_v45 = vpop.permute.xlu1 %1023  ;;  %v1022_v17 = vpop.permute.xlu0 %1021 }
 0x182   : > { %1067 = vst.msk [vmem:[#allocation3 + $0x28] sm:$0xff] %vm1061_vm10, %v1024_v45  ;;  %v1129_v50 = vpop.permute.xlu2 %1128 }
 0x183   : > { %1066 = vst.msk [vmem:[#allocation3 + $0x20] sm:$0xff] %vm1061_vm10, %v1022_v17 }
 0x184   : > { %1164 = vst.msk [vmem:[#allocation3 + $0x28] sm:$0xff] %vm1158_vm11, %v1121_v49 }
 0x187   : > { %1033 = vrot.lane.b32.xlu1 %v2438_v54, %s1918_s30  ;;  %1124 = vrot.lane.b32.xlu0 %v2258_v16, %s1919_s5 }
 0x188   : > { %1035 = vrot.lane.b32.xlu2 %v2424_v52, %s1918_s30 }
 0x189   : > { %v1119_v34 = vpop.permute.xlu1 %1118  ;;  %v932_v32 = vpop.permute.xlu0 %931 }
 0x18a   : > { %1163 = vst.msk [vmem:[#allocation3 + $0x20] sm:$0xff] %vm1158_vm11, %v1119_v34  ;;  %v821_v14 = vpop.permute.xlu2 %820 }
 0x18b   : > { %971 = vst.msk [vmem:[#allocation3 + $0x48] sm:$0xff] %vm961_vm9, %v932_v32 }
 0x18c   : > { %1260 = vst.msk [vmem:[#allocation3 + $0x20] sm:$0xff] %vm1255_vm12, %v1216_v30 }
 0x18d   : > { %867 = vst.msk [vmem:[#allocation3 + $0x10] sm:$0xff] %vm864_vm7, %v821_v14 }
 0x18f   : > { %1221 = vrot.lane.b32.xlu1 %v2339_v33, %s1920_s7  ;;  %1219 = vrot.lane.b32.xlu0 %v2327_v31, %s1920_s7 }
 0x190   : > { %1130 = vrot.lane.b32.xlu2 %v2273_v19, %s1919_s5 }
 0x191   : > { %v1032_v16 = vpop.permute.xlu1 %1031  ;;  %v1030_v54 = vpop.permute.xlu0 %1029 }
 0x192   : > { %1071 = vst.msk [vmem:[#allocation3 + $0x48] sm:$0xff] %vm1061_vm10, %v1032_v16  ;;  %v920_v52 = vpop.permute.xlu2 %919 }
 0x193   : > { %1070 = vst.msk [vmem:[#allocation3 + $0x40] sm:$0xff] %vm1061_vm10, %v1030_v54 }
 0x194   : > { %1168 = vst.msk [vmem:[#allocation3 + $0x48] sm:$0xff] %vm1158_vm11, %v1129_v50 }
 0x197   : > { %1227 = vrot.lane.b32.xlu1 %v2354_v36, %s1920_s7  ;;  %1132 = vrot.lane.b32.xlu0 %v2283_v21, %s1919_s5  ;;  %v1276_v36 = vld [vmem:[#allocation3 + $0x20] sm:$0xff] }
 0x198   : > { %1229 = vrot.lane.b32.xlu2 %v2351_v35, %s1920_s7 }
 0x199   : > { %v1127_v33 = vpop.permute.xlu1 %1126  ;;  %v1218_v31 = vpop.permute.xlu0 %1217 }
 0x19a   : > { %1167 = vst.msk [vmem:[#allocation3 + $0x40] sm:$0xff] %vm1158_vm11, %v1127_v33  ;;  %v1018_v19 = vpop.permute.xlu2 %1017 }
 0x19b   : > { %1261 = vst.msk [vmem:[#allocation3 + $0x28] sm:$0xff] %vm1255_vm12, %v1218_v31 }
 0x19f   : > { %844 = vrot.lane.b32.xlu1 %v2624_v26, %s1916_s28  ;;  %749 = vrot.lane.b32.xlu0 %v2609_v12, %s1915_s27 }
 0x1a0   : > { %846 = vrot.lane.b32.xlu2 %v2621_v23, %s1916_s28 }
 0x1a1   : > { %v1226_v48 = vpop.permute.xlu1 %1225  ;;  %v1224_v21 = vpop.permute.xlu0 %1223 }
 0x1a2   : > { %1265 = vst.msk [vmem:[#allocation3 + $0x48] sm:$0xff] %vm1255_vm12, %v1226_v48  ;;  %v1277_v35 = vld [vmem:[#allocation3 + $0x28] sm:$0xff]  ;;  %v940_v55 = vpop.permute.xlu2 %939 }
 0x1a3   : > { %1264 = vst.msk [vmem:[#allocation3 + $0x40] sm:$0xff] %vm1255_vm12, %v1224_v21  ;;  %v1290_v51 = vpack.c.bf16 %v1277_v35, %v1276_v36 }
 0x1a5   : > { %1793 = vmatmul.msk.bf16.vlgmr.msra.gmra.mxu1 %vm1332_vm13, %v1290_v51 }
 0x1a7   : > { %943 = vrot.lane.b32.xlu1 %v2638_v39, %s1917_s29  ;;  %941 = vrot.lane.b32.xlu0 %v2627_v24, %s1917_s29 }
 0x1a8   : > { %1041 = vrot.lane.b32.xlu2 %v1741_v56, %s1918_s30 }
 0x1a9   : > { %v918_v57 = vpop.permute.xlu1 %917  ;;  %v823_v58 = vpop.permute.xlu0 %822  ;;  %v1281_v60 = vld [vmem:[#allocation3 + $0x48] sm:$0xff] }
 0x1aa   : > { %964 = vst.msk [vmem:[#allocation3 + $0x10] sm:$0xff] %vm961_vm9, %v918_v57  ;;  %v1280_v61 = vld [vmem:[#allocation3 + $0x40] sm:$0xff]  ;;  %v1038_v25 = vpop.permute.xlu2 %1037 }
 0x1ab   : > { %868 = vst.msk [vmem:[#allocation3 + $0x18] sm:$0xff] %vm864_vm7, %v823_v58  ;;  %v1292_v7 = vpack.c.bf16 %v1281_v60, %v1280_v61 }
 0x1ac   : > { %965 = vst.msk [vmem:[#allocation3 + $0x18] sm:$0xff] %vm961_vm9, %v920_v52 }
 0x1ad   : > { %1795 = vmatmul.msk.bf16.vlgmr.msra.gmra.mxu2 %vm1332_vm13, %v1292_v7  ;;  %1064 = vst.msk [vmem:[#allocation3 + $0x10] sm:$0xff] %vm1061_vm10, %v1018_v19 }
 0x1af   : > { %1138 = vrot.lane.b32.xlu1 %v1757_v62, %s1919_s5  ;;  %1043 = vrot.lane.b32.xlu0 %v1742_v10, %s1918_s30 }
 0x1b0   : > { %1140 = vrot.lane.b32.xlu2 %v1758_v27, %s1919_s5 }
 0x1b1   : > { %v843_v63 = vpop.permute.xlu1 %842  ;;  %v841_v1 = vpop.permute.xlu0 %840 }
 0x1b2   : > { %878 = vst.msk [vmem:[#allocation3 + $0x68] sm:$0xff] %vm864_vm7, %v843_v63  ;;  %v1214_v0 = vpop.permute.xlu2 %1213 }
 0x1b3   : > { %877 = vst.msk [vmem:[#allocation3 + $0x60] sm:$0xff] %vm864_vm7, %v841_v1 }
 0x1b4   : > { %975 = vst.msk [vmem:[#allocation3 + $0x68] sm:$0xff] %vm961_vm9, %v940_v55 }
 0x1b7   : > { %1237 = vrot.lane.b32.xlu1 %v1774_v2, %s1920_s7  ;;  %1235 = vrot.lane.b32.xlu0 %v1773_v44, %s1920_s7 }
 0x1b9   : > { %v938_v3 = vpop.permute.xlu1 %937  ;;  %v1020_v4 = vpop.permute.xlu0 %1019 }
 0x1ba   : > { %974 = vst.msk [vmem:[#allocation3 + $0x60] sm:$0xff] %vm961_vm9, %v938_v3  ;;  %v1232_v6 = vpop.permute.xlu2 %1231 }
 0x1bb   : > { %1065 = vst.msk [vmem:[#allocation3 + $0x18] sm:$0xff] %vm1061_vm10, %v1020_v4 }
 0x1bc   : > { %1074 = vst.msk [vmem:[#allocation3 + $0x60] sm:$0xff] %vm1061_vm10, %v1038_v25 }
 0x1c1   : > { %v1117_v43 = vpop.permute.xlu1 %1116  ;;  %v1115_v5 = vpop.permute.xlu0 %1114 }
 0x1c2   : > { %1162 = vst.msk [vmem:[#allocation3 + $0x18] sm:$0xff] %vm1158_vm11, %v1117_v43  ;;  %v831_v8 = vpop.permute.xlu2 %830 }
 0x1c3   : > { %1161 = vst.msk [vmem:[#allocation3 + $0x10] sm:$0xff] %vm1158_vm11, %v1115_v5 }
 0x1c4   : > { %1259 = vst.msk [vmem:[#allocation3 + $0x18] sm:$0xff] %vm1255_vm12, %v1214_v0 }
 0x1c5   : > { %872 = vst.msk [vmem:[#allocation3 + $0x38] sm:$0xff] %vm864_vm7, %v831_v8 }
 0x1c9   : > { %v1212_v9 = vpop.permute.xlu1 %1211  ;;  %v1040_v11 = vpop.permute.xlu0 %1039 }
 0x1ca   : > { %1258 = vst.msk [vmem:[#allocation3 + $0x10] sm:$0xff] %vm1255_vm12, %v1212_v9  ;;  %v837_v12 = vpop.permute.xlu2 %836 }
 0x1cb   : > { %1075 = vst.msk [vmem:[#allocation3 + $0x68] sm:$0xff] %vm1061_vm10, %v1040_v11  ;;  %v1275_v59 = vld [vmem:[#allocation3 + $0x18] sm:$0xff] }
 0x1cc   : > { %875 = vst.msk [vmem:[#allocation3 + $0x50] sm:$0xff] %vm864_vm7, %v837_v12 }
 0x1d1   : > { %v1137_v20 = vpop.permute.xlu1 %1136  ;;  %v1135_v22 = vpop.permute.xlu0 %1134  ;;  %v1274_v23 = vld [vmem:[#allocation3 + $0x10] sm:$0xff] }
 0x1d2   : > { %1172 = vst.msk [vmem:[#allocation3 + $0x68] sm:$0xff] %vm1158_vm11, %v1137_v20  ;;  %v1289_v26 = vpack.c.bf16 %v1275_v59, %v1274_v23  ;;  %v1028_v37 = vpop.permute.xlu2 %1027 }
 0x1d3   : > { %1171 = vst.msk [vmem:[#allocation3 + $0x60] sm:$0xff] %vm1158_vm11, %v1135_v22 }
 0x1d4   : > { %1268 = vst.msk [vmem:[#allocation3 + $0x60] sm:$0xff] %vm1255_vm12, %v1232_v6  ;;  %1792 = vmatmul.msk.bf16.gmra.mxu0 %vm1332_vm13, %v1289_v26 }
 0x1d9   : > { %v829_v24 = vpop.permute.xlu1 %828  ;;  %v1234_v28 = vpop.permute.xlu0 %1233 }
 0x1da   : > { %871 = vst.msk [vmem:[#allocation3 + $0x30] sm:$0xff] %vm864_vm7, %v829_v24  ;;  %v1123_v13 = vpop.permute.xlu2 %1122 }
 0x1db   : > { %1269 = vst.msk [vmem:[#allocation3 + $0x68] sm:$0xff] %vm1255_vm12, %v1234_v28  ;;  %v1284_v38 = vld [vmem:[#allocation3 + $0x60] sm:$0xff] }
 0x1e1   : > { %v928_v39 = vpop.permute.xlu1 %927  ;;  %v926_v40 = vpop.permute.xlu0 %925 }
 0x1e2   : > { %969 = vst.msk [vmem:[#allocation3 + $0x38] sm:$0xff] %vm961_vm9, %v928_v39  ;;  %v1285_v41 = vld [vmem:[#allocation3 + $0x68] sm:$0xff]  ;;  %v1036_v53 = vpop.permute.xlu2 %1035 }
 0x1e3   : > { %968 = vst.msk [vmem:[#allocation3 + $0x30] sm:$0xff] %vm961_vm9, %v926_v40  ;;  %v1294_v42 = vpack.c.bf16 %v1285_v41, %v1284_v38 }
 0x1e4   : > { %1069 = vst.msk [vmem:[#allocation3 + $0x38] sm:$0xff] %vm1061_vm10, %v1028_v37 }
 0x1e5   : > { %1797 = vmatmul.msk.bf16.vlgmr.msra.gmra.mxu3 %vm1332_vm13, %v1294_v42 }
 0x1e9   : > { %v1026_v46 = vpop.permute.xlu1 %1025  ;;  %v839_v47 = vpop.permute.xlu0 %838 }
 0x1ea   : > { %1068 = vst.msk [vmem:[#allocation3 + $0x30] sm:$0xff] %vm1061_vm10, %v1026_v46  ;;  %v1131_v17 = vpop.permute.xlu2 %1130 }
 0x1eb   : > { %876 = vst.msk [vmem:[#allocation3 + $0x58] sm:$0xff] %vm864_vm7, %v839_v47 }
 0x1ec   : > { %1165 = vst.msk [vmem:[#allocation3 + $0x30] sm:$0xff] %vm1158_vm11, %v1123_v13 }
 0x1f1   : > { %v936_v15 = vpop.permute.xlu1 %935  ;;  %v934_v49 = vpop.permute.xlu0 %933 }
 0x1f2   : > { %973 = vst.msk [vmem:[#allocation3 + $0x58] sm:$0xff] %vm961_vm9, %v936_v15  ;;  %v1230_v32 = vpop.permute.xlu2 %1229 }
 0x1f3   : > { %972 = vst.msk [vmem:[#allocation3 + $0x50] sm:$0xff] %vm961_vm9, %v934_v49  ;;  %v2764_v29 = vpop.f32.mrf.mxu0 }
 0x1f4   : > { %1503 = vst.msk [vmem:[%s1988_s6] sm:$0xff] %vm473_vm3, %v2764_v29  ;;  %v1449_v44 = vmul.f32 %v2764_v29, %v2764_v29  ;;  %v1410_v4 = vsel %vm473_vm3, %v2764_v29, 0.0 }
 0x1f5   : > { %1073 = vst.msk [vmem:[#allocation3 + $0x58] sm:$0xff] %vm1061_vm10, %v1036_v53 }
 0x1f6   : > { %v1465_v8 = vsel %vm473_vm3, %v1449_v44, 0.0 }
 0x1f9   : > { %v1034_v18 = vpop.permute.xlu1 %1033  ;;  %v1125_v30 = vpop.permute.xlu0 %1124 }
 0x1fa   : > { %1072 = vst.msk [vmem:[#allocation3 + $0x50] sm:$0xff] %vm1061_vm10, %v1034_v18  ;;  %v847_v31 = vpop.permute.xlu2 %846 }
 0x1fb   : > { %1166 = vst.msk [vmem:[#allocation3 + $0x38] sm:$0xff] %vm1158_vm11, %v1125_v30  ;;  %v1372_v45 = vpop.f32.mrf.mxu0 }
 0x1fc   : > { %1504 = vst.msk [vmem:[%s1988_s6 + $0x8] sm:$0xff] %vm473_vm3, %v1372_v45  ;;  %v1450_v2 = vmul.f32 %v1372_v45, %v1372_v45  ;;  %v1411_v3 = vsel %vm473_vm3, %v1372_v45, 0.0 }
 0x1fd   : > { %1169 = vst.msk [vmem:[#allocation3 + $0x50] sm:$0xff] %vm1158_vm11, %v1131_v17  ;;  %v1412_v43 = vadd.f32 %v1411_v3, %v1410_v4 }
 0x1fe   : > { %v1466_v6 = vsel %vm473_vm3, %v1450_v2, 0.0 }
 0x1ff   : > { %v1467_v12 = vadd.f32 %v1466_v6, %v1465_v8 }
 0x201   : > { %v1222_v50 = vpop.permute.xlu1 %1221  ;;  %v1220_v34 = vpop.permute.xlu0 %1219 }
 0x202   : > { %1263 = vst.msk [vmem:[#allocation3 + $0x38] sm:$0xff] %vm1255_vm12, %v1222_v50  ;;  %v1042_v51 = vpop.permute.xlu2 %1041 }
 0x203   : > { %1262 = vst.msk [vmem:[#allocation3 + $0x30] sm:$0xff] %vm1255_vm12, %v1220_v34 }
 0x209   : > { %v1228_v14 = vpop.permute.xlu1 %1227  ;;  %v1133_v16 = vpop.permute.xlu0 %1132  ;;  %v1279_v54 = vld [vmem:[#allocation3 + $0x38] sm:$0xff] }
 0x20a   : > { %1266 = vst.msk [vmem:[#allocation3 + $0x50] sm:$0xff] %vm1255_vm12, %v1228_v14  ;;  %v1278_v52 = vld [vmem:[#allocation3 + $0x30] sm:$0xff]  ;;  %v1141_v61 = vpop.permute.xlu2 %1140 }
 0x20b   : > { %1170 = vst.msk [vmem:[#allocation3 + $0x58] sm:$0xff] %vm1158_vm11, %v1133_v16  ;;  %v1291_v33 = vpack.c.bf16 %v1279_v54, %v1278_v52 }
 0x20c   : > { %1267 = vst.msk [vmem:[#allocation3 + $0x58] sm:$0xff] %vm1255_vm12, %v1230_v32 }
 0x20d   : > { %1794 = vmatmul.msk.bf16.gmra.mxu1 %vm1332_vm13, %v1291_v33 }
 0x211   : > { %v845_v19 = vpop.permute.xlu1 %844  ;;  %v750_v36 = vpop.permute.xlu0 %749  ;;  %v1282_v48 = vld [vmem:[#allocation3 + $0x50] sm:$0xff] }
 0x212   : > { %879 = vst.msk [vmem:[#allocation3 + $0x70] sm:$0xff] %vm864_vm7, %v845_v19 }
 0x213   : > { %783 = vst.msk [vmem:[#allocation3 + $0x78] sm:$0xff] %vm767_vm6, %v750_v36  ;;  %v1283_v21 = vld [vmem:[#allocation3 + $0x58] sm:$0xff] }
 0x214   : > { %v1293_v35 = vpack.c.bf16 %v1283_v21, %v1282_v48  ;;  %880 = vst.msk [vmem:[#allocation3 + $0x78] sm:$0xff] %vm864_vm7, %v847_v31 }
 0x216   : > { %1796 = vmatmul.msk.bf16.gmra.mxu2 %vm1332_vm13, %v1293_v35 }
 0x219   : > { %v944_v55 = vpop.permute.xlu1 %943  ;;  %v942_v56 = vpop.permute.xlu0 %941 }
 0x21a   : > { %977 = vst.msk [vmem:[#allocation3 + $0x78] sm:$0xff] %vm961_vm9, %v944_v55 }
 0x21b   : > { %976 = vst.msk [vmem:[#allocation3 + $0x70] sm:$0xff] %vm961_vm9, %v942_v56 }
 0x21c   : > { %1076 = vst.msk [vmem:[#allocation3 + $0x70] sm:$0xff] %vm1061_vm10, %v1042_v51 }
 0x221   : > { %v1139_v57 = vpop.permute.xlu1 %1138  ;;  %v1044_v58 = vpop.permute.xlu0 %1043 }
 0x222   : > { %1173 = vst.msk [vmem:[#allocation3 + $0x70] sm:$0xff] %vm1158_vm11, %v1139_v57  ;;  %v1380_v60 = vpop.f32.mrf.mxu1 }
 0x223   : > { %1077 = vst.msk [vmem:[#allocation3 + $0x78] sm:$0xff] %vm1061_vm10, %v1044_v58  ;;  %v1453_v26 = vmul.f32 %v1380_v60, %v1380_v60  ;;  %v1417_v38 = vsel %vm473_vm3, %v1380_v60, 0.0 }
 0x224   : > { %1507 = vst.msk [vmem:[%s1988_s6 + $0x20] sm:$0xff] %vm473_vm3, %v1380_v60 }
 0x225   : > { %1174 = vst.msk [vmem:[#allocation3 + $0x78] sm:$0xff] %vm1158_vm11, %v1141_v61  ;;  %v1472_v42 = vsel %vm473_vm3, %v1453_v26, 0.0 }
 0x229   : > { %v1238_v7 = vpop.permute.xlu1 %1237  ;;  %v1236_v25 = vpop.permute.xlu0 %1235 }
 0x22a   : > { %1271 = vst.msk [vmem:[#allocation3 + $0x78] sm:$0xff] %vm1255_vm12, %v1238_v7  ;;  %v1382_v62 = vpop.f32.mrf.mxu1 }
 0x22b   : > { %1270 = vst.msk [vmem:[#allocation3 + $0x70] sm:$0xff] %vm1255_vm12, %v1236_v25  ;;  %v1454_v49 = vmul.f32 %v1382_v62, %v1382_v62  ;;  %v1419_v29 = vsel %vm473_vm3, %v1382_v62, 0.0 }
 0x22c   : > { %1508 = vst.msk [vmem:[%s1988_s6 + $0x28] sm:$0xff] %vm473_vm3, %v1382_v62 }
 0x22d   : > { %v1474_v45 = vsel %vm473_vm3, %v1454_v49, 0.0 }
 0x230   : > { %v1390_v10 = vpop.f32.mrf.mxu2 }
 0x231   : > { %1511 = vst.msk [vmem:[%s1988_s6 + $0x40] sm:$0xff] %vm473_vm3, %v1390_v10  ;;  %v1287_v27 = vld [vmem:[#allocation3 + $0x78] sm:$0xff]  ;;  %v1457_v14 = vmul.f32 %v1390_v10, %v1390_v10  ;;  %v1425_v31 = vsel %vm473_vm3, %v1390_v10, 0.0 }
 0x232   : > { %v1286_v63 = vld [vmem:[#allocation3 + $0x70] sm:$0xff] }
 0x233   : > { %v1295_v1 = vpack.c.bf16 %v1287_v27, %v1286_v63  ;;  %v1480_v21 = vsel %vm473_vm3, %v1457_v14, 0.0 }
 0x235   : > { %1798 = vmatmul.msk.bf16.gmra.mxu3 %vm1332_vm13, %v1295_v1 }
 0x238   : > { %v1392_v0 = vpop.f32.mrf.mxu2 }
 0x239   : > { %1512 = vst.msk [vmem:[%s1988_s6 + $0x48] sm:$0xff] %vm473_vm3, %v1392_v0  ;;  %v1458_v55 = vmul.f32 %v1392_v0, %v1392_v0  ;;  %v1427_v56 = vsel %vm473_vm3, %v1392_v0, 0.0 }
 0x23b   : > { %v1482_v60 = vsel %vm473_vm3, %v1458_v55, 0.0 }
 0x251   : > { %v1375_v5 = vpop.f32.mrf.mxu0 }
 0x252   : > { %v1413_v9 = vsel %vm473_vm3, %v1375_v5, 0.0  ;;  %v1451_v11 = vmul.f32 %v1375_v5, %v1375_v5  ;;  %1505 = vst.msk [vmem:[%s1988_s6 + $0x10] sm:$0xff] %vm473_vm3, %v1375_v5 }
 0x253   : > { %v1414_v59 = vadd.f32 %v1413_v9, %v1412_v43 }
 0x254   : > { %v1468_v20 = vsel %vm473_vm3, %v1451_v11, 0.0 }
 0x255   : > { %v1469_v22 = vadd.f32 %v1468_v20, %v1467_v12 }
 0x259   : > { %v1377_v23 = vpop.f32.mrf.mxu0 }
 0x25a   : > { %v1415_v24 = vsel %vm473_vm3, %v1377_v23, 0.0  ;;  %v1452_v28 = vmul.f32 %v1377_v23, %v1377_v23  ;;  %1506 = vst.msk [vmem:[%s1988_s6 + $0x18] sm:$0xff] %vm473_vm3, %v1377_v23 }
 0x25b   : > { %v1416_v37 = vadd.f32 %v1415_v24, %v1414_v59 }
 0x25c   : > { %v1470_v39 = vsel %vm473_vm3, %v1452_v28, 0.0 }
 0x25d   : > { %v1418_v40 = vadd.f32 %v1417_v38, %v1416_v37  ;;  %v1471_v41 = vadd.f32 %v1470_v39, %v1469_v22 }
 0x25f   : > { %v1473_v13 = vadd.f32 %v1472_v42, %v1471_v41  ;;  %v1420_v30 = vadd.f32 %v1419_v29, %v1418_v40 }
 0x261   : > { %v1475_v34 = vadd.f32 %v1474_v45, %v1473_v13 }
 0x268   : > { %v1400_v46 = vpop.f32.mrf.mxu3 }
 0x269   : > { %1515 = vst.msk [vmem:[%s1988_s6 + $0x60] sm:$0xff] %vm473_vm3, %v1400_v46  ;;  %v1461_v27 = vmul.f32 %v1400_v46, %v1400_v46  ;;  %v1433_v44 = vsel %vm473_vm3, %v1400_v46, 0.0 }
 0x26b   : > { %v1488_v43 = vsel %vm473_vm3, %v1461_v27, 0.0 }
 0x270   : > { %v1402_v47 = vpop.f32.mrf.mxu3 }
 0x271   : > { %1516 = vst.msk [vmem:[%s1988_s6 + $0x68] sm:$0xff] %vm473_vm3, %v1402_v47  ;;  %v1462_v9 = vmul.f32 %v1402_v47, %v1402_v47  ;;  %v1435_v12 = vsel %vm473_vm3, %v1402_v47, 0.0 }
 0x273   : > { %v1490_v22 = vsel %vm473_vm3, %v1462_v9, 0.0 }
 0x28a   : > { %v1385_v15 = vpop.f32.mrf.mxu1 }
 0x28b   : > { %1509 = vst.msk [vmem:[%s1988_s6 + $0x30] sm:$0xff] %vm473_vm3, %v1385_v15  ;;  %v1455_v53 = vmul.f32 %v1385_v15, %v1385_v15  ;;  %v1421_v18 = vsel %vm473_vm3, %v1385_v15, 0.0 }
 0x28c   : > { %v1422_v50 = vadd.f32 %v1421_v18, %v1420_v30 }
 0x28d   : > { %v1476_v17 = vsel %vm473_vm3, %v1455_v53, 0.0 }
 0x28e   : > { %v1477_v52 = vadd.f32 %v1476_v17, %v1475_v34 }
 0x292   : > { %v1387_v32 = vpop.f32.mrf.mxu1 }
 0x293   : > { %v1423_v16 = vsel %vm473_vm3, %v1387_v32, 0.0  ;;  %v1456_v54 = vmul.f32 %v1387_v32, %v1387_v32  ;;  %1510 = vst.msk [vmem:[%s1988_s6 + $0x38] sm:$0xff] %vm473_vm3, %v1387_v32 }
 0x294   : > { %v1424_v33 = vadd.f32 %v1423_v16, %v1422_v50 }
 0x295   : > { %v1478_v19 = vsel %vm473_vm3, %v1456_v54, 0.0 }
 0x296   : > { %v1426_v36 = vadd.f32 %v1425_v31, %v1424_v33  ;;  %v1479_v48 = vadd.f32 %v1478_v19, %v1477_v52 }
 0x298   : > { %v1481_v35 = vadd.f32 %v1480_v21, %v1479_v48  ;;  %v1428_v58 = vadd.f32 %v1427_v56, %v1426_v36 }
 0x299   : > { %v1395_v51 = vpop.f32.mrf.mxu2 }
 0x29a   : > { %1513 = vst.msk [vmem:[%s1988_s6 + $0x50] sm:$0xff] %vm473_vm3, %v1395_v51  ;;  %v1459_v57 = vmul.f32 %v1395_v51, %v1395_v51  ;;  %v1429_v61 = vsel %vm473_vm3, %v1395_v51, 0.0  ;;  %v1483_v7 = vadd.f32 %v1482_v60, %v1481_v35 }
 0x29b   : > { %v1430_v62 = vadd.f32 %v1429_v61, %v1428_v58 }
 0x29c   : > { %v1484_v25 = vsel %vm473_vm3, %v1459_v57, 0.0 }
 0x29d   : > { %v1485_v2 = vadd.f32 %v1484_v25, %v1483_v7 }
 0x2a1   : > { %v1397_v10 = vpop.f32.mrf.mxu2 }
 0x2a2   : > { %v1431_v63 = vsel %vm473_vm3, %v1397_v10, 0.0  ;;  %v1460_v1 = vmul.f32 %v1397_v10, %v1397_v10  ;;  %1514 = vst.msk [vmem:[%s1988_s6 + $0x58] sm:$0xff] %vm473_vm3, %v1397_v10 }
 0x2a3   : > { %v1432_v0 = vadd.f32 %v1431_v63, %v1430_v62 }
 0x2a4   : > { %v1486_v3 = vsel %vm473_vm3, %v1460_v1, 0.0 }
 0x2a5   : > { %v1434_v4 = vadd.f32 %v1433_v44, %v1432_v0  ;;  %v1487_v6 = vadd.f32 %v1486_v3, %v1485_v2 }
 0x2a7   : > { %v1489_v5 = vadd.f32 %v1488_v43, %v1487_v6  ;;  %v1436_v20 = vadd.f32 %v1435_v12, %v1434_v4 }
 0x2a9   : > { %v1491_v24 = vadd.f32 %v1490_v22, %v1489_v5 }
 0x2b8   : > { %v1405_v8 = vpop.f32.mrf.mxu3 }
 0x2b9   : > { %1517 = vst.msk [vmem:[%s1988_s6 + $0x70] sm:$0xff] %vm473_vm3, %v1405_v8  ;;  %v1463_v11 = vmul.f32 %v1405_v8, %v1405_v8  ;;  %v1437_v59 = vsel %vm473_vm3, %v1405_v8, 0.0 }
 0x2ba   : > { %v1438_v26 = vadd.f32 %v1437_v59, %v1436_v20 }
 0x2bb   : > { %v1492_v23 = vsel %vm473_vm3, %v1463_v11, 0.0 }
 0x2bc   : > { %v1493_v39 = vadd.f32 %v1492_v23, %v1491_v24 }
 0x2c0   : > { %v1407_v28 = vpop.f32.mrf.mxu3 }
 0x2c1   : > { %v1439_v37 = vsel %vm473_vm3, %v1407_v28, 0.0  ;;  %v1464_v38 = vmul.f32 %v1407_v28, %v1407_v28  ;;  %1518 = vst.msk [vmem:[%s1988_s6 + $0x78] sm:$0xff] %vm473_vm3, %v1407_v28 }
 0x2c2   : > { %v1440_v40 = vadd.f32 %v1439_v37, %v1438_v26 }
 0x2c3   : > { %v1494_v41 = vsel %vm473_vm3, %v1464_v38, 0.0 }
 0x2c4   : > { %v1441_v42 = vrot.slane %v1440_v40, 4  ;;  %v1495_v13 = vadd.f32 %v1494_v41, %v1493_v39 }
 0x2c6   : > { %v1442_v46 = vadd.f32 %v1441_v42, %v1440_v40  ;;  %v1496_v47 = vrot.slane %v1495_v13, 4 }
 0x2c8   : > { %v1443_v15 = vrot.slane %v1442_v46, 2  ;;  %v1497_v49 = vadd.f32 %v1496_v47, %v1495_v13 }
 0x2ca   : > { %v1444_v53 = vadd.f32 %v1443_v15, %v1442_v46  ;;  %v1498_v29 = vrot.slane %v1497_v49, 2 }
 0x2cc   : > { %v1445_v18 = vrot.slane %v1444_v53, 1  ;;  %v1499_v30 = vadd.f32 %v1498_v29, %v1497_v49 }
 0x2ce   : > { %v1446_v45 = vadd.f32 %v1445_v18, %v1444_v53  ;;  %v1500_v17 = vrot.slane %v1499_v30, 1 }
 0x2d0   : > { %1448 = vst.msk [vmem:[%s1994_s13] sm:$0x1] %vm1447_vm14, %v1446_v45  ;;  %v1501_v50 = vadd.f32 %v1500_v17, %v1499_v30 }
 0x2d2   : > { %1502 = vst.msk [vmem:[%s1994_s13 + $0x1] sm:$0x1] %vm1447_vm14, %v1501_v50 }
 0x2d3 PF: > { %s15_s19 = sadd.s32 1, %s1910_s19   ;;  %s2879_s15 = smov %s1902_s17 }
 0x2d4   : > { %p12_p9 = scmp.ge.s32.totalorder %s15_s19, 6   ;;  %s2880_s16 = smov %s1906_s18 }
 0x2d5   : > { %s2881_s17 = smov %s2884_s20  ;;  %s2882_s18 = smov %s2888_s21 }
 0x2d6   :  { %14 = sbr.rel (!%p12_p9) target bundleno = 3 (0x3), region = 83 }

</bundles_post_ra>
